<compile_context>
chip_gen: v7x
topology: tpu7x:2x2x1
jax: 0.10.0
libtpu: 0.0.40
codegen_flags: <defaults>
</compile_context>

<pallas_src>
import jax
import jax.numpy as jnp
from jax import lax
from jax.experimental import pallas as pl
from jax.experimental.pallas import tpu as pltpu

LANE = 128
_VMEM_LIMIT_BYTES = 48 * 1024 * 1024   # < 64 MiB physical on v7x; raises the
_VMEM_BUDGET_BYTES = 40 * 1024 * 1024  # 16/32 MiB defaults on v5e/v6e.
_TARGET_ROWS = 1024                    # ~85% of HBM roofline per tile-scaling data


def _round_up(v, m):
    return ((v + m - 1) // m) * m


def _pick_imgs_per_block(n, hw, vmem_need_fn, budget, target_rows=_TARGET_ROWS):
    """Pick images per grid step: must divide N and keep the sublane dim
    8-aligned (or be the whole batch); prefer grid >= 2 (v7x has 2 TCs) and
    ~target_rows matmul rows per step, subject to the VMEM budget."""
    divisors = [d for d in range(1, n + 1) if n % d == 0]
    aligned = [d for d in divisors if (d * hw) % 8 == 0 or d == n]
    fit = [d for d in aligned if vmem_need_fn(d * hw) <= budget]
    if not fit:
        fit = [min(aligned, key=lambda d: vmem_need_fn(d * hw))]

    def score(d):
        rows = d * hw
        multi_core = (n // d) >= 2
        return (multi_core, min(rows, target_rows), -rows)

    return max(fit, key=score)


def bottleneck_pallas_nhwc(x_nhwc, params, *, matmul_dtype=jnp.bfloat16,
                           out_dtype=jnp.float32, input_dtype=None,
                           imgs_per_block=None, channel_pad_multiple=LANE):
    """Fused Bottleneck block on an NHWC activation."""
    (w1, s1, b1, w2, s2, b2, w3, s3, b3) = params
    N, H, W, Cin = x_nhwc.shape
    Cw = w1.shape[1]
    Cout = w3.shape[1]
    assert Cin == Cout, "identity residual (downsample=None) needs Cin == Cout"

    in_dtype = matmul_dtype if input_dtype is None else input_dtype
    hw = H * W

    # ---------------- host-side parameter prep (weights only, cheap) --------
    # Fold BN scales into the conv weights; keep only the additive shifts.
    # Lane-pad every channel dim so all in-kernel tensors are full-lane wide
    # (no masked vst) and the im2col pieces are 128-aligned.  Zero padding is
    # exact: padded channels stay identically zero through the whole block.
    # TODO(synk): on v6e/v7x pass channel_pad_multiple=256 for wide layers so
    #             K/N dims fill both 256x256 MXU tiles.
    Cp = _round_up(Cout, channel_pad_multiple)    # residual / in / out channels
    Cwp = _round_up(Cw, channel_pad_multiple)     # bottleneck width

    w1f = jnp.pad(w1 * s1, ((0, Cp - Cin), (0, Cwp - Cw))).astype(matmul_dtype)
    b1f = jnp.pad(b1, ((0, 0), (0, Cwp - Cw))).astype(jnp.float32)
    w2f = jnp.pad(w2 * s2.reshape(1, 1, 1, Cw),
                  ((0, 0), (0, 0), (0, Cwp - Cw), (0, Cwp - Cw)))
    w2f = w2f.reshape(9 * Cwp, Cwp).astype(matmul_dtype)
    b2f = jnp.pad(b2, ((0, 0), (0, Cwp - Cw))).astype(jnp.float32)
    w3f = jnp.pad(w3 * s3, ((0, Cwp - Cw), (0, Cp - Cout))).astype(matmul_dtype)
    b3f = jnp.pad(b3, ((0, 0), (0, Cp - Cout))).astype(jnp.float32)

    # Flattened lane-dense activation slab; rows are (n, h, w) row-major.
    # TODO(synk): pass input_dtype=jnp.float32 for a full-precision residual
    #             (PyTorch keeps the skip connection in f32); default bf16
    #             halves the input HBM traffic.
    x_pad = x_nhwc if Cp == Cin else jnp.pad(
        x_nhwc, ((0, 0), (0, 0), (0, 0), (0, Cp - Cin)))
    x2d = x_pad.reshape(N * hw, Cp).astype(in_dtype)

    # ---------------- block-size selection (VMEM budgeted) ------------------
    mm_bytes = jnp.dtype(matmul_dtype).itemsize
    in_bytes = jnp.dtype(in_dtype).itemsize
    out_bytes = jnp.dtype(out_dtype).itemsize
    const_bytes = sum(int(a.size) * a.dtype.itemsize
                      for a in (w1f, b1f, w2f, b2f, w3f, b3f))

    def vmem_need(rows):
        io = 2 * rows * Cp * (in_bytes + out_bytes)   # double-buffered in/out
        acts = rows * Cwp * 4 * 2                     # y1 / y2 (f32)
        im2col = rows * 9 * Cwp * mm_bytes            # im2col slab (matmul dtype)
        acc = rows * max(Cwp, Cp) * 4                 # live MXU accumulator
        return int(1.15 * (io + acts + im2col + acc + const_bytes))

    if imgs_per_block is None:
        imgs_per_block = _pick_imgs_per_block(N, hw, vmem_need, _VMEM_BUDGET_BYTES)
    else:
        d = max(1, min(int(imgs_per_block), N))
        valid = (N % d == 0) and ((d * hw) % 8 == 0 or d == N)
        imgs_per_block = d if valid else _pick_imgs_per_block(
            N, hw, vmem_need, _VMEM_BUDGET_BYTES)

    Mblk = imgs_per_block * hw
    assert Mblk % hw == 0, "roll-based taps need whole images per block"
    grid = (N // imgs_per_block,)

    Mtot = N * hw
    flops = 2 * Mtot * (Cp * Cwp + 9 * Cwp * Cwp + Cwp * Cp)
    bytes_accessed = Mtot * Cp * (in_bytes + out_bytes) + const_bytes

    # ---------------- the fused kernel ---------------------------------------
    def kernel(x_ref, w1_ref, b1_ref, w2_ref, b2_ref, w3_ref, b3_ref, o_ref):
        M = x_ref.shape[0]

        # conv1 (1x1, BN1 scale folded) + shift + relu
        y1 = jnp.dot(x_ref[...].astype(matmul_dtype), w1_ref[...],
                     preferred_element_type=jnp.float32)
        y1 = jnp.maximum(y1 + b1_ref[...], 0.0)               # (M, Cwp) f32

        # conv2 (3x3, pad=1): 9 vreg-resident shifted taps -> one im2col matmul.
        # Border predicates computed once per block from an iota (no DMA'd
        # coordinate arrays, no integer division) and reused by all 8 taps.
        r = lax.broadcasted_iota(jnp.int32, (M, 1), 0)
        rw = r % W                      # w coordinate
        rhw = r % (H * W)               # h * W + w
        row_ok = {-1: rhw >= W, 0: None, 1: rhw < (H - 1) * W}
        col_ok = {-1: rw >= 1, 0: None, 1: rw < (W - 1)}

        def tap(dh, dw):
            off = dh * W + dw
            t = pltpu.roll(y1, (-off) % M, 0) if off else y1
            valid = row_ok[dh]
            if col_ok[dw] is not None:
                valid = col_ok[dw] if valid is None else (valid & col_ok[dw])
            if valid is not None:
                t = jnp.where(valid, t, 0.0)
            return t.astype(matmul_dtype)   # im2col slab built in matmul dtype

        im2col = jnp.concatenate(
            [tap(dh, dw) for dh in (-1, 0, 1) for dw in (-1, 0, 1)], axis=1)
        y2 = jnp.dot(im2col, w2_ref[...], preferred_element_type=jnp.float32)
        y2 = jnp.maximum(y2 + b2_ref[...], 0.0)                # (M, Cwp) f32

        # conv3 (1x1, BN3 scale folded) + shift + residual + relu.
        y3 = jnp.dot(y2.astype(matmul_dtype), w3_ref[...],
                     preferred_element_type=jnp.float32)
        res = x_ref[...].astype(jnp.float32)   # re-read at the epilogue only
        o_ref[...] = jnp.maximum(y3 + b3_ref[...] + res, 0.0).astype(o_ref.dtype)

    # ---------------- pallas_call plumbing -----------------------------------
    def _run(single_buffer_consts):
        def const_spec(arr):
            nd = arr.ndim
            index_map = lambda g, _nd=nd: (0,) * _nd
            if single_buffer_consts:
                # Constant operands: index_map never changes -> single buffer.
                return pl.BlockSpec(arr.shape, index_map,
                                    pipeline_mode=pl.Buffered(1))
            return pl.BlockSpec(arr.shape, index_map)

        grid_spec = pltpu.PrefetchScalarGridSpec(
            num_scalar_prefetch=0,
            grid=grid,
            in_specs=[
                pl.BlockSpec((Mblk, Cp), lambda g: (g, 0)),
                const_spec(w1f), const_spec(b1f),
                const_spec(w2f), const_spec(b2f),
                const_spec(w3f), const_spec(b3f),
            ],
            out_specs=pl.BlockSpec((Mblk, Cp), lambda g: (g, 0)),
        )
        call = pl.pallas_call(
            kernel,
            out_shape=jax.ShapeDtypeStruct((Mtot, Cp), out_dtype),
            grid_spec=grid_spec,
            compiler_params=pltpu.CompilerParams(
                dimension_semantics=("parallel",),
                vmem_limit_bytes=_VMEM_LIMIT_BYTES),
            cost_estimate=pl.CostEstimate(
                flops=int(flops), transcendentals=0,
                bytes_accessed=int(bytes_accessed)),
        )
        return call(x2d, w1f, b1f, w2f, b2f, w3f, b3f)

    try:
        out2d = jax.block_until_ready(_run(True))
    except Exception:
        # TODO(synk): jax build without BlockSpec.pipeline_mode / Buffered(1);
        # fall back to default double-buffered constant weights.
        out2d = _run(False)

    out = out2d.reshape(N, H, W, Cp)
    return out if Cp == Cout else out[..., :Cout]


def bottleneck_pallas(x_nchw, params, *, matmul_dtype=jnp.bfloat16, **kwargs):
    """NCHW wrapper (PyTorch layout parity).  Prefer the NHWC entry point
    end-to-end to avoid the two boundary transposes."""
    x_nhwc = jnp.transpose(x_nchw, (0, 2, 3, 1)).astype(jnp.float32)
    out = bottleneck_pallas_nhwc(x_nhwc, params, matmul_dtype=matmul_dtype,
                                 **kwargs)
    return jnp.transpose(out.astype(jnp.float32), (0, 3, 1, 2))


def bottleneck_reference(x_nchw, params):
    """Pure-JAX (f32, unfolded-BN) reference for validation."""
    (w1, s1, b1, w2, s2, b2, w3, s3, b3) = params
    x = jnp.transpose(x_nchw, (0, 2, 3, 1)).astype(jnp.float32)
    dn = lax.conv_dimension_numbers(x.shape, (1, 1, 1, 1),
                                    ("NHWC", "HWIO", "NHWC"))
    y = lax.conv_general_dilated(x, w1.reshape(1, 1, *w1.shape), (1, 1),
                                 "VALID", dimension_numbers=dn)
    y = jnp.maximum(y * s1[0] + b1[0], 0.0)
    y = lax.conv_general_dilated(y, w2, (1, 1), "SAME", dimension_numbers=dn)
    y = jnp.maximum(y * s2[0] + b2[0], 0.0)
    y = lax.conv_general_dilated(y, w3.reshape(1, 1, *w3.shape), (1, 1),
                                 "VALID", dimension_numbers=dn)
    y = y * s3[0] + b3[0]
    y = jnp.maximum(y + x, 0.0)
    return jnp.transpose(y, (0, 3, 1, 2))


def make_params(key, inplanes, planes, base_width=64, groups=1):
    width = int(planes * (base_width / 64.0)) * groups
    cout = planes * 4
    keys = jax.random.split(key, 12)
    eps = 1e-5

    def bn(kg, kb, km, kv, c):
        gamma = 1.0 + 0.1 * jax.random.normal(kg, (c,), jnp.float32)
        beta = 0.1 * jax.random.normal(kb, (c,), jnp.float32)
        rmean = 0.1 * jax.random.normal(km, (c,), jnp.float32)
        rvar = 1.0 + 0.1 * jnp.abs(jax.random.normal(kv, (c,), jnp.float32))
        scale = gamma / jnp.sqrt(rvar + eps)
        shift = beta - rmean * scale
        return scale.reshape(1, c), shift.reshape(1, c)

    w1 = 0.1 * jax.random.normal(keys[0], (inplanes, width), jnp.float32)
    w2 = 0.1 * jax.random.normal(keys[1], (3, 3, width, width), jnp.float32)
    w3 = 0.1 * jax.random.normal(keys[2], (width, cout), jnp.float32)
    s1, b1 = bn(keys[3], keys[4], keys[5], keys[6], width)
    s2, b2 = bn(keys[7], keys[8], keys[9], keys[10], width)
    s3, b3 = bn(keys[11], keys[3], keys[5], keys[7], cout)
    return (w1, s1, b1, w2, s2, b2, w3, s3, b3)


if __name__ == "__main__":
    key = jax.random.PRNGKey(0)
    kx, kp = jax.random.split(key)

    # Bottleneck(inplanes=32, planes=8) -> width=8, out_channels=32 == inplanes,
    # so the identity residual (downsample=None) is valid.
    N, inplanes, planes, H, W = 2, 32, 8, 8, 8
    x = jax.random.normal(kx, (N, inplanes, H, W), jnp.float32)   # NCHW input
    params = make_params(kp, inplanes, planes)

    ref = bottleneck_reference(x, params)

    # Optimized path: bf16 MXU operands / input slab, f32 accumulation.
    out_bf16 = jax.block_until_ready(
        bottleneck_pallas(x, params, matmul_dtype=jnp.bfloat16))
    assert out_bf16.shape == (N, planes * 4, H, W)
    assert jnp.allclose(out_bf16, ref, atol=5e-2, rtol=5e-2), \
        f"bf16 max abs diff {jnp.max(jnp.abs(out_bf16 - ref))}"

    # Strict numerical check with f32 matmul operands.
    out_f32 = jax.block_until_ready(
        bottleneck_pallas(x, params, matmul_dtype=jnp.float32))
    assert jnp.allclose(out_f32, ref, atol=2e-3, rtol=2e-3), \
        f"f32 max abs diff {jnp.max(jnp.abs(out_f32 - ref))}"

    print("KERNEL_OK")
</pallas_src>

<mosaic_0001>
module attributes {stable_mosaic.version = 11 : i64} {
  func.func @kernel(%arg0: i32, %arg1: memref<64x128xbf16, #tpu.memory_space<vmem>>, %arg2: memref<128x128xbf16, #tpu.memory_space<vmem>>, %arg3: memref<1x128xf32, #tpu.memory_space<vmem>>, %arg4: memref<1152x128xbf16, #tpu.memory_space<vmem>>, %arg5: memref<1x128xf32, #tpu.memory_space<vmem>>, %arg6: memref<128x128xbf16, #tpu.memory_space<vmem>>, %arg7: memref<1x128xf32, #tpu.memory_space<vmem>>, %arg8: memref<64x128xf32, #tpu.memory_space<vmem>>) attributes {dimension_semantics = [#tpu.dimension_semantics<parallel>], iteration_bounds = array<i64: 2>, scalar_prefetch = 0 : i64, scratch_operands = 0 : i64, tpu.core_type = #tpu.core_type<tc>, window_params = [{transform_indices = @transform_0, window_bounds = array<i64: 64, 128>}, {pipeline_mode = #tpu.pipeline_mode<synchronous>, transform_indices = @transform_1, window_bounds = array<i64: 128, 128>}, {pipeline_mode = #tpu.pipeline_mode<synchronous>, transform_indices = @transform_2, window_bounds = array<i64: 1, 128>}, {pipeline_mode = #tpu.pipeline_mode<synchronous>, transform_indices = @transform_3, window_bounds = array<i64: 1152, 128>}, {pipeline_mode = #tpu.pipeline_mode<synchronous>, transform_indices = @transform_4, window_bounds = array<i64: 1, 128>}, {pipeline_mode = #tpu.pipeline_mode<synchronous>, transform_indices = @transform_5, window_bounds = array<i64: 128, 128>}, {pipeline_mode = #tpu.pipeline_mode<synchronous>, transform_indices = @transform_6, window_bounds = array<i64: 1, 128>}, {transform_indices = @transform_7, window_bounds = array<i64: 64, 128>}]} {
    %c0 = arith.constant 0 : index
    %c0_0 = arith.constant 0 : index
    %0 = vector.load %arg1[%c0, %c0_0] : memref<64x128xbf16, #tpu.memory_space<vmem>>, vector<64x128xbf16>
    %c0_1 = arith.constant 0 : index
    %c0_2 = arith.constant 0 : index
    %1 = vector.load %arg2[%c0_1, %c0_2] : memref<128x128xbf16, #tpu.memory_space<vmem>>, vector<128x128xbf16>
    %cst = arith.constant dense<0.000000e+00> : vector<64x128xf32>
    %2 = tpu.matmul %0, %1, %cst {dimension_numbers = #tpu.dot_dimension_numbers<[1], [0], [0], [1], [0, 0, 1, 1], [], []>} : vector<64x128xbf16>, vector<128x128xbf16>, vector<64x128xf32> -> vector<64x128xf32>
    %c0_3 = arith.constant 0 : index
    %c0_4 = arith.constant 0 : index
    %3 = vector.load %arg3[%c0_3, %c0_4] : memref<1x128xf32, #tpu.memory_space<vmem>>, vector<1x128xf32>
    %4 = vector.broadcast %3 : vector<1x128xf32> to vector<64x128xf32>
    %5 = arith.addf %2, %4 : vector<64x128xf32>
    %cst_5 = arith.constant 0.000000e+00 : f32
    %6 = vector.broadcast %cst_5 : f32 to vector<64x128xf32>
    %7 = arith.maximumf %5, %6 : vector<64x128xf32>
    %8 = tpu.iota {dimensions = array<i32: 0>} : vector<64x1xi32>
    %c8_i32 = arith.constant 8 : i32
    %c0_i32 = arith.constant 0 : i32
    %9 = arith.cmpi eq, %c8_i32, %c0_i32 : i32
    %c1_i32 = arith.constant 1 : i32
    %10 = arith.select %9, %c1_i32, %c8_i32 : i32
    %11 = vector.broadcast %10 : i32 to vector<64x1xi32>
    %12 = arith.remsi %8, %11 : vector<64x1xi32>
    %c0_i32_6 = arith.constant 0 : i32
    %13 = vector.broadcast %c0_i32_6 : i32 to vector<64x1xi32>
    %14 = arith.cmpi ne, %12, %13 : vector<64x1xi32>
    %c0_i32_7 = arith.constant 0 : i32
    %15 = vector.broadcast %c0_i32_7 : i32 to vector<64x1xi32>
    %16 = arith.cmpi slt, %12, %15 : vector<64x1xi32>
    %c0_i32_8 = arith.constant 0 : i32
    %17 = arith.cmpi slt, %10, %c0_i32_8 : i32
    %18 = vector.broadcast %17 : i1 to vector<64x1xi1>
    %19 = vector.broadcast %18 : vector<64x1xi1> to vector<64x1xi1>
    %20 = arith.xori %16, %19 : vector<64x1xi1>
    %21 = arith.andi %20, %14 : vector<64x1xi1>
    %22 = vector.broadcast %10 : i32 to vector<64x1xi32>
    %23 = arith.addi %12, %22 : vector<64x1xi32>
    %24 = arith.select %21, %23, %12 : vector<64x1xi1>, vector<64x1xi32>
    %c64_i32 = arith.constant 64 : i32
    %c0_i32_9 = arith.constant 0 : i32
    %25 = arith.cmpi eq, %c64_i32, %c0_i32_9 : i32
    %c1_i32_10 = arith.constant 1 : i32
    %26 = arith.select %25, %c1_i32_10, %c64_i32 : i32
    %27 = vector.broadcast %26 : i32 to vector<64x1xi32>
    %28 = arith.remsi %8, %27 : vector<64x1xi32>
    %c0_i32_11 = arith.constant 0 : i32
    %29 = vector.broadcast %c0_i32_11 : i32 to vector<64x1xi32>
    %30 = arith.cmpi ne, %28, %29 : vector<64x1xi32>
    %c0_i32_12 = arith.constant 0 : i32
    %31 = vector.broadcast %c0_i32_12 : i32 to vector<64x1xi32>
    %32 = arith.cmpi slt, %28, %31 : vector<64x1xi32>
    %c0_i32_13 = arith.constant 0 : i32
    %33 = arith.cmpi slt, %26, %c0_i32_13 : i32
    %34 = vector.broadcast %33 : i1 to vector<64x1xi1>
    %35 = vector.broadcast %34 : vector<64x1xi1> to vector<64x1xi1>
    %36 = arith.xori %32, %35 : vector<64x1xi1>
    %37 = arith.andi %36, %30 : vector<64x1xi1>
    %38 = vector.broadcast %26 : i32 to vector<64x1xi32>
    %39 = arith.addi %28, %38 : vector<64x1xi32>
    %40 = arith.select %37, %39, %28 : vector<64x1xi1>, vector<64x1xi32>
    %c8_i32_14 = arith.constant 8 : i32
    %41 = vector.broadcast %c8_i32_14 : i32 to vector<64x1xi32>
    %42 = arith.cmpi sge, %40, %41 : vector<64x1xi32>
    %c56_i32 = arith.constant 56 : i32
    %43 = vector.broadcast %c56_i32 : i32 to vector<64x1xi32>
    %44 = arith.cmpi slt, %40, %43 : vector<64x1xi32>
    %c1_i32_15 = arith.constant 1 : i32
    %45 = vector.broadcast %c1_i32_15 : i32 to vector<64x1xi32>
    %46 = arith.cmpi sge, %24, %45 : vector<64x1xi32>
    %c7_i32 = arith.constant 7 : i32
    %47 = vector.broadcast %c7_i32 : i32 to vector<64x1xi32>
    %48 = arith.cmpi slt, %24, %47 : vector<64x1xi32>
    %c9_i32 = arith.constant 9 : i32
    %49 = tpu.dynamic_rotate %7 by %c9_i32 dim 0 : vector<64x128xf32>, i32 -> vector<64x128xf32>
    %50 = arith.andi %42, %46 : vector<64x1xi1>
    %cst_16 = arith.constant 0.000000e+00 : f32
    %51 = vector.shape_cast %50 : vector<64x1xi1> to vector<64x1xi1>
    %52 = vector.broadcast %51 : vector<64x1xi1> to vector<64x128xi1>
    %53 = vector.broadcast %cst_16 : f32 to vector<64x128xf32>
    %54 = arith.select %52, %49, %53 : vector<64x128xi1>, vector<64x128xf32>
    %55 = arith.truncf %54 : vector<64x128xf32> to vector<64x128xbf16>
    %c8_i32_17 = arith.constant 8 : i32
    %56 = tpu.dynamic_rotate %7 by %c8_i32_17 dim 0 : vector<64x128xf32>, i32 -> vector<64x128xf32>
    %cst_18 = arith.constant 0.000000e+00 : f32
    %57 = vector.shape_cast %42 : vector<64x1xi1> to vector<64x1xi1>
    %58 = vector.broadcast %57 : vector<64x1xi1> to vector<64x128xi1>
    %59 = vector.broadcast %cst_18 : f32 to vector<64x128xf32>
    %60 = arith.select %58, %56, %59 : vector<64x128xi1>, vector<64x128xf32>
    %61 = arith.truncf %60 : vector<64x128xf32> to vector<64x128xbf16>
    %c7_i32_19 = arith.constant 7 : i32
    %62 = tpu.dynamic_rotate %7 by %c7_i32_19 dim 0 : vector<64x128xf32>, i32 -> vector<64x128xf32>
    %63 = arith.andi %42, %48 : vector<64x1xi1>
    %cst_20 = arith.constant 0.000000e+00 : f32
    %64 = vector.shape_cast %63 : vector<64x1xi1> to vector<64x1xi1>
    %65 = vector.broadcast %64 : vector<64x1xi1> to vector<64x128xi1>
    %66 = vector.broadcast %cst_20 : f32 to vector<64x128xf32>
    %67 = arith.select %65, %62, %66 : vector<64x128xi1>, vector<64x128xf32>
    %68 = arith.truncf %67 : vector<64x128xf32> to vector<64x128xbf16>
    %c1_i32_21 = arith.constant 1 : i32
    %69 = tpu.dynamic_rotate %7 by %c1_i32_21 dim 0 : vector<64x128xf32>, i32 -> vector<64x128xf32>
    %cst_22 = arith.constant 0.000000e+00 : f32
    %70 = vector.shape_cast %46 : vector<64x1xi1> to vector<64x1xi1>
    %71 = vector.broadcast %70 : vector<64x1xi1> to vector<64x128xi1>
    %72 = vector.broadcast %cst_22 : f32 to vector<64x128xf32>
    %73 = arith.select %71, %69, %72 : vector<64x128xi1>, vector<64x128xf32>
    %74 = arith.truncf %73 : vector<64x128xf32> to vector<64x128xbf16>
    %75 = arith.truncf %7 : vector<64x128xf32> to vector<64x128xbf16>
    %c63_i32 = arith.constant 63 : i32
    %76 = tpu.dynamic_rotate %7 by %c63_i32 dim 0 : vector<64x128xf32>, i32 -> vector<64x128xf32>
    %cst_23 = arith.constant 0.000000e+00 : f32
    %77 = vector.shape_cast %48 : vector<64x1xi1> to vector<64x1xi1>
    %78 = vector.broadcast %77 : vector<64x1xi1> to vector<64x128xi1>
    %79 = vector.broadcast %cst_23 : f32 to vector<64x128xf32>
    %80 = arith.select %78, %76, %79 : vector<64x128xi1>, vector<64x128xf32>
    %81 = arith.truncf %80 : vector<64x128xf32> to vector<64x128xbf16>
    %c57_i32 = arith.constant 57 : i32
    %82 = tpu.dynamic_rotate %7 by %c57_i32 dim 0 : vector<64x128xf32>, i32 -> vector<64x128xf32>
    %83 = arith.andi %44, %46 : vector<64x1xi1>
    %cst_24 = arith.constant 0.000000e+00 : f32
    %84 = vector.shape_cast %83 : vector<64x1xi1> to vector<64x1xi1>
    %85 = vector.broadcast %84 : vector<64x1xi1> to vector<64x128xi1>
    %86 = vector.broadcast %cst_24 : f32 to vector<64x128xf32>
    %87 = arith.select %85, %82, %86 : vector<64x128xi1>, vector<64x128xf32>
    %88 = arith.truncf %87 : vector<64x128xf32> to vector<64x128xbf16>
    %c56_i32_25 = arith.constant 56 : i32
    %89 = tpu.dynamic_rotate %7 by %c56_i32_25 dim 0 : vector<64x128xf32>, i32 -> vector<64x128xf32>
    %cst_26 = arith.constant 0.000000e+00 : f32
    %90 = vector.shape_cast %44 : vector<64x1xi1> to vector<64x1xi1>
    %91 = vector.broadcast %90 : vector<64x1xi1> to vector<64x128xi1>
    %92 = vector.broadcast %cst_26 : f32 to vector<64x128xf32>
    %93 = arith.select %91, %89, %92 : vector<64x128xi1>, vector<64x128xf32>
    %94 = arith.truncf %93 : vector<64x128xf32> to vector<64x128xbf16>
    %c55_i32 = arith.constant 55 : i32
    %95 = tpu.dynamic_rotate %7 by %c55_i32 dim 0 : vector<64x128xf32>, i32 -> vector<64x128xf32>
    %96 = arith.andi %44, %48 : vector<64x1xi1>
    %cst_27 = arith.constant 0.000000e+00 : f32
    %97 = vector.shape_cast %96 : vector<64x1xi1> to vector<64x1xi1>
    %98 = vector.broadcast %97 : vector<64x1xi1> to vector<64x128xi1>
    %99 = vector.broadcast %cst_27 : f32 to vector<64x128xf32>
    %100 = arith.select %98, %95, %99 : vector<64x128xi1>, vector<64x128xf32>
    %101 = arith.truncf %100 : vector<64x128xf32> to vector<64x128xbf16>
    %102 = tpu.concatenate %55, %61, %68, %74, %75, %81, %88, %94, %101 in 1 : vector<64x128xbf16>, vector<64x128xbf16>, vector<64x128xbf16>, vector<64x128xbf16>, vector<64x128xbf16>, vector<64x128xbf16>, vector<64x128xbf16>, vector<64x128xbf16>, vector<64x128xbf16> -> vector<64x1152xbf16>
    %c0_28 = arith.constant 0 : index
    %c0_29 = arith.constant 0 : index
    %103 = vector.load %arg4[%c0_28, %c0_29] : memref<1152x128xbf16, #tpu.memory_space<vmem>>, vector<1152x128xbf16>
    %cst_30 = arith.constant dense<0.000000e+00> : vector<64x128xf32>
    %104 = tpu.matmul %102, %103, %cst_30 {dimension_numbers = #tpu.dot_dimension_numbers<[1], [0], [0], [1], [0, 0, 1, 1], [], []>} : vector<64x1152xbf16>, vector<1152x128xbf16>, vector<64x128xf32> -> vector<64x128xf32>
    %c0_31 = arith.constant 0 : index
    %c0_32 = arith.constant 0 : index
    %105 = vector.load %arg5[%c0_31, %c0_32] : memref<1x128xf32, #tpu.memory_space<vmem>>, vector<1x128xf32>
    %106 = vector.broadcast %105 : vector<1x128xf32> to vector<64x128xf32>
    %107 = arith.addf %104, %106 : vector<64x128xf32>
    %cst_33 = arith.constant 0.000000e+00 : f32
    %108 = vector.broadcast %cst_33 : f32 to vector<64x128xf32>
    %109 = arith.maximumf %107, %108 : vector<64x128xf32>
    %110 = arith.truncf %109 : vector<64x128xf32> to vector<64x128xbf16>
    %c0_34 = arith.constant 0 : index
    %c0_35 = arith.constant 0 : index
    %111 = vector.load %arg6[%c0_34, %c0_35] : memref<128x128xbf16, #tpu.memory_space<vmem>>, vector<128x128xbf16>
    %cst_36 = arith.constant dense<0.000000e+00> : vector<64x128xf32>
    %112 = tpu.matmul %110, %111, %cst_36 {dimension_numbers = #tpu.dot_dimension_numbers<[1], [0], [0], [1], [0, 0, 1, 1], [], []>} : vector<64x128xbf16>, vector<128x128xbf16>, vector<64x128xf32> -> vector<64x128xf32>
    %c0_37 = arith.constant 0 : index
    %c0_38 = arith.constant 0 : index
    %113 = vector.load %arg1[%c0_37, %c0_38] : memref<64x128xbf16, #tpu.memory_space<vmem>>, vector<64x128xbf16>
    %114 = arith.extf %113 : vector<64x128xbf16> to vector<64x128xf32>
    %c0_39 = arith.constant 0 : index
    %c0_40 = arith.constant 0 : index
    %115 = vector.load %arg7[%c0_39, %c0_40] : memref<1x128xf32, #tpu.memory_space<vmem>>, vector<1x128xf32>
    %116 = vector.broadcast %115 : vector<1x128xf32> to vector<64x128xf32>
    %117 = arith.addf %112, %116 : vector<64x128xf32>
    %118 = arith.addf %117, %114 : vector<64x128xf32>
    %cst_41 = arith.constant 0.000000e+00 : f32
    %119 = vector.broadcast %cst_41 : f32 to vector<64x128xf32>
    %120 = arith.maximumf %118, %119 : vector<64x128xf32>
    %c0_42 = arith.constant 0 : index
    %c0_43 = arith.constant 0 : index
    %121 = vector.load %arg8[%c0_42, %c0_43] : memref<64x128xf32, #tpu.memory_space<vmem>>, vector<64x128xf32>
    tpu.vector_store %arg8[%c0_42, %c0_43], %120 {strides = array<i32>} : memref<64x128xf32, #tpu.memory_space<vmem>>, vector<64x128xf32>,
    return
  }
  func.func @transform_0(%arg0: i32) -> (i32, i32) {
    %c0_i32 = arith.constant 0 : i32
    %c0_i32_0 = arith.constant 0 : i32
    return %arg0, %c0_i32 : i32, i32
  }
  func.func @transform_1(%arg0: i32) -> (i32, i32) {
    %c0_i32 = arith.constant 0 : i32
    %c0_i32_0 = arith.constant 0 : i32
    %c0_i32_1 = arith.constant 0 : i32
    return %c0_i32, %c0_i32_0 : i32, i32
  }
  func.func @transform_2(%arg0: i32) -> (i32, i32) {
    %c0_i32 = arith.constant 0 : i32
    %c0_i32_0 = arith.constant 0 : i32
    %c0_i32_1 = arith.constant 0 : i32
    return %c0_i32, %c0_i32_0 : i32, i32
  }
  func.func @transform_3(%arg0: i32) -> (i32, i32) {
    %c0_i32 = arith.constant 0 : i32
    %c0_i32_0 = arith.constant 0 : i32
    %c0_i32_1 = arith.constant 0 : i32
    return %c0_i32, %c0_i32_0 : i32, i32
  }
  func.func @transform_4(%arg0: i32) -> (i32, i32) {
    %c0_i32 = arith.constant 0 : i32
    %c0_i32_0 = arith.constant 0 : i32
    %c0_i32_1 = arith.constant 0 : i32
    return %c0_i32, %c0_i32_0 : i32, i32
  }
  func.func @transform_5(%arg0: i32) -> (i32, i32) {
    %c0_i32 = arith.constant 0 : i32
    %c0_i32_0 = arith.constant 0 : i32
    %c0_i32_1 = arith.constant 0 : i32
    return %c0_i32, %c0_i32_0 : i32, i32
  }
  func.func @transform_6(%arg0: i32) -> (i32, i32) {
    %c0_i32 = arith.constant 0 : i32
    %c0_i32_0 = arith.constant 0 : i32
    %c0_i32_1 = arith.constant 0 : i32
    return %c0_i32, %c0_i32_0 : i32, i32
  }
  func.func @transform_7(%arg0: i32) -> (i32, i32) {
    %c0_i32 = arith.constant 0 : i32
    %c0_i32_0 = arith.constant 0 : i32
    return %arg0, %c0_i32 : i32, i32
  }
}

module attributes {stable_mosaic.version = 11 : i64} {
  func.func @kernel(%arg0: i32, %arg1: memref<64x128xbf16, #tpu.memory_space<vmem>>, %arg2: memref<128x128xbf16, #tpu.memory_space<vmem>>, %arg3: memref<1x128xf32, #tpu.memory_space<vmem>>, %arg4: memref<1152x128xbf16, #tpu.memory_space<vmem>>, %arg5: memref<1x128xf32, #tpu.memory_space<vmem>>, %arg6: memref<128x128xbf16, #tpu.memory_space<vmem>>, %arg7: memref<1x128xf32, #tpu.memory_space<vmem>>, %arg8: memref<64x128xf32, #tpu.memory_space<vmem>>) attributes {dimension_semantics = [#tpu.dimension_semantics<parallel>], iteration_bounds = array<i64: 2>, scalar_prefetch = 0 : i64, scratch_operands = 0 : i64, tpu.core_type = #tpu.core_type<tc>, window_params = [{transform_indices = @transform_0, window_bounds = array<i64: 64, 128>}, {pipeline_mode = #tpu.pipeline_mode<synchronous>, transform_indices = @transform_1, window_bounds = array<i64: 128, 128>}, {pipeline_mode = #tpu.pipeline_mode<synchronous>, transform_indices = @transform_2, window_bounds = array<i64: 1, 128>}, {pipeline_mode = #tpu.pipeline_mode<synchronous>, transform_indices = @transform_3, window_bounds = array<i64: 1152, 128>}, {pipeline_mode = #tpu.pipeline_mode<synchronous>, transform_indices = @transform_4, window_bounds = array<i64: 1, 128>}, {pipeline_mode = #tpu.pipeline_mode<synchronous>, transform_indices = @transform_5, window_bounds = array<i64: 128, 128>}, {pipeline_mode = #tpu.pipeline_mode<synchronous>, transform_indices = @transform_6, window_bounds = array<i64: 1, 128>}, {transform_indices = @transform_7, window_bounds = array<i64: 64, 128>}]} {
    %c0 = arith.constant 0 : index
    %c0_0 = arith.constant 0 : index
    %0 = vector.load %arg1[%c0, %c0_0] : memref<64x128xbf16, #tpu.memory_space<vmem>>, vector<64x128xbf16>
    %c0_1 = arith.constant 0 : index
    %c0_2 = arith.constant 0 : index
    %1 = vector.load %arg2[%c0_1, %c0_2] : memref<128x128xbf16, #tpu.memory_space<vmem>>, vector<128x128xbf16>
    %cst = arith.constant dense<0.000000e+00> : vector<64x128xf32>
    %2 = tpu.matmul %0, %1, %cst {dimension_numbers = #tpu.dot_dimension_numbers<[1], [0], [0], [1], [0, 0, 1, 1], [], []>} : vector<64x128xbf16>, vector<128x128xbf16>, vector<64x128xf32> -> vector<64x128xf32>
    %c0_3 = arith.constant 0 : index
    %c0_4 = arith.constant 0 : index
    %3 = vector.load %arg3[%c0_3, %c0_4] : memref<1x128xf32, #tpu.memory_space<vmem>>, vector<1x128xf32>
    %4 = vector.broadcast %3 : vector<1x128xf32> to vector<64x128xf32>
    %5 = arith.addf %2, %4 : vector<64x128xf32>
    %cst_5 = arith.constant 0.000000e+00 : f32
    %6 = vector.broadcast %cst_5 : f32 to vector<64x128xf32>
    %7 = arith.maximumf %5, %6 : vector<64x128xf32>
    %8 = tpu.iota {dimensions = array<i32: 0>} : vector<64x1xi32>
    %c8_i32 = arith.constant 8 : i32
    %c0_i32 = arith.constant 0 : i32
    %9 = arith.cmpi eq, %c8_i32, %c0_i32 : i32
    %c1_i32 = arith.constant 1 : i32
    %10 = arith.select %9, %c1_i32, %c8_i32 : i32
    %11 = vector.broadcast %10 : i32 to vector<64x1xi32>
    %12 = arith.remsi %8, %11 : vector<64x1xi32>
    %c0_i32_6 = arith.constant 0 : i32
    %13 = vector.broadcast %c0_i32_6 : i32 to vector<64x1xi32>
    %14 = arith.cmpi ne, %12, %13 : vector<64x1xi32>
    %c0_i32_7 = arith.constant 0 : i32
    %15 = vector.broadcast %c0_i32_7 : i32 to vector<64x1xi32>
    %16 = arith.cmpi slt, %12, %15 : vector<64x1xi32>
    %c0_i32_8 = arith.constant 0 : i32
    %17 = arith.cmpi slt, %10, %c0_i32_8 : i32
    %18 = vector.broadcast %17 : i1 to vector<64x1xi1>
    %19 = vector.broadcast %18 : vector<64x1xi1> to vector<64x1xi1>
    %20 = arith.xori %16, %19 : vector<64x1xi1>
    %21 = arith.andi %20, %14 : vector<64x1xi1>
    %22 = vector.broadcast %10 : i32 to vector<64x1xi32>
    %23 = arith.addi %12, %22 : vector<64x1xi32>
    %24 = arith.select %21, %23, %12 : vector<64x1xi1>, vector<64x1xi32>
    %c64_i32 = arith.constant 64 : i32
    %c0_i32_9 = arith.constant 0 : i32
    %25 = arith.cmpi eq, %c64_i32, %c0_i32_9 : i32
    %c1_i32_10 = arith.constant 1 : i32
    %26 = arith.select %25, %c1_i32_10, %c64_i32 : i32
    %27 = vector.broadcast %26 : i32 to vector<64x1xi32>
    %28 = arith.remsi %8, %27 : vector<64x1xi32>
    %c0_i32_11 = arith.constant 0 : i32
    %29 = vector.broadcast %c0_i32_11 : i32 to vector<64x1xi32>
    %30 = arith.cmpi ne, %28, %29 : vector<64x1xi32>
    %c0_i32_12 = arith.constant 0 : i32
    %31 = vector.broadcast %c0_i32_12 : i32 to vector<64x1xi32>
    %32 = arith.cmpi slt, %28, %31 : vector<64x1xi32>
    %c0_i32_13 = arith.constant 0 : i32
    %33 = arith.cmpi slt, %26, %c0_i32_13 : i32
    %34 = vector.broadcast %33 : i1 to vector<64x1xi1>
    %35 = vector.broadcast %34 : vector<64x1xi1> to vector<64x1xi1>
    %36 = arith.xori %32, %35 : vector<64x1xi1>
    %37 = arith.andi %36, %30 : vector<64x1xi1>
    %38 = vector.broadcast %26 : i32 to vector<64x1xi32>
    %39 = arith.addi %28, %38 : vector<64x1xi32>
    %40 = arith.select %37, %39, %28 : vector<64x1xi1>, vector<64x1xi32>
    %c8_i32_14 = arith.constant 8 : i32
    %41 = vector.broadcast %c8_i32_14 : i32 to vector<64x1xi32>
    %42 = arith.cmpi sge, %40, %41 : vector<64x1xi32>
    %c56_i32 = arith.constant 56 : i32
    %43 = vector.broadcast %c56_i32 : i32 to vector<64x1xi32>
    %44 = arith.cmpi slt, %40, %43 : vector<64x1xi32>
    %c1_i32_15 = arith.constant 1 : i32
    %45 = vector.broadcast %c1_i32_15 : i32 to vector<64x1xi32>
    %46 = arith.cmpi sge, %24, %45 : vector<64x1xi32>
    %c7_i32 = arith.constant 7 : i32
    %47 = vector.broadcast %c7_i32 : i32 to vector<64x1xi32>
    %48 = arith.cmpi slt, %24, %47 : vector<64x1xi32>
    %c9_i32 = arith.constant 9 : i32
    %49 = tpu.dynamic_rotate %7 by %c9_i32 dim 0 : vector<64x128xf32>, i32 -> vector<64x128xf32>
    %50 = arith.andi %42, %46 : vector<64x1xi1>
    %cst_16 = arith.constant 0.000000e+00 : f32
    %51 = vector.shape_cast %50 : vector<64x1xi1> to vector<64x1xi1>
    %52 = vector.broadcast %51 : vector<64x1xi1> to vector<64x128xi1>
    %53 = vector.broadcast %cst_16 : f32 to vector<64x128xf32>
    %54 = arith.select %52, %49, %53 : vector<64x128xi1>, vector<64x128xf32>
    %55 = arith.truncf %54 : vector<64x128xf32> to vector<64x128xbf16>
    %c8_i32_17 = arith.constant 8 : i32
    %56 = tpu.dynamic_rotate %7 by %c8_i32_17 dim 0 : vector<64x128xf32>, i32 -> vector<64x128xf32>
    %cst_18 = arith.constant 0.000000e+00 : f32
    %57 = vector.shape_cast %42 : vector<64x1xi1> to vector<64x1xi1>
    %58 = vector.broadcast %57 : vector<64x1xi1> to vector<64x128xi1>
    %59 = vector.broadcast %cst_18 : f32 to vector<64x128xf32>
    %60 = arith.select %58, %56, %59 : vector<64x128xi1>, vector<64x128xf32>
    %61 = arith.truncf %60 : vector<64x128xf32> to vector<64x128xbf16>
    %c7_i32_19 = arith.constant 7 : i32
    %62 = tpu.dynamic_rotate %7 by %c7_i32_19 dim 0 : vector<64x128xf32>, i32 -> vector<64x128xf32>
    %63 = arith.andi %42, %48 : vector<64x1xi1>
    %cst_20 = arith.constant 0.000000e+00 : f32
    %64 = vector.shape_cast %63 : vector<64x1xi1> to vector<64x1xi1>
    %65 = vector.broadcast %64 : vector<64x1xi1> to vector<64x128xi1>
    %66 = vector.broadcast %cst_20 : f32 to vector<64x128xf32>
    %67 = arith.select %65, %62, %66 : vector<64x128xi1>, vector<64x128xf32>
    %68 = arith.truncf %67 : vector<64x128xf32> to vector<64x128xbf16>
    %c1_i32_21 = arith.constant 1 : i32
    %69 = tpu.dynamic_rotate %7 by %c1_i32_21 dim 0 : vector<64x128xf32>, i32 -> vector<64x128xf32>
    %cst_22 = arith.constant 0.000000e+00 : f32
    %70 = vector.shape_cast %46 : vector<64x1xi1> to vector<64x1xi1>
    %71 = vector.broadcast %70 : vector<64x1xi1> to vector<64x128xi1>
    %72 = vector.broadcast %cst_22 : f32 to vector<64x128xf32>
    %73 = arith.select %71, %69, %72 : vector<64x128xi1>, vector<64x128xf32>
    %74 = arith.truncf %73 : vector<64x128xf32> to vector<64x128xbf16>
    %75 = arith.truncf %7 : vector<64x128xf32> to vector<64x128xbf16>
    %c63_i32 = arith.constant 63 : i32
    %76 = tpu.dynamic_rotate %7 by %c63_i32 dim 0 : vector<64x128xf32>, i32 -> vector<64x128xf32>
    %cst_23 = arith.constant 0.000000e+00 : f32
    %77 = vector.shape_cast %48 : vector<64x1xi1> to vector<64x1xi1>
    %78 = vector.broadcast %77 : vector<64x1xi1> to vector<64x128xi1>
    %79 = vector.broadcast %cst_23 : f32 to vector<64x128xf32>
    %80 = arith.select %78, %76, %79 : vector<64x128xi1>, vector<64x128xf32>
    %81 = arith.truncf %80 : vector<64x128xf32> to vector<64x128xbf16>
    %c57_i32 = arith.constant 57 : i32
    %82 = tpu.dynamic_rotate %7 by %c57_i32 dim 0 : vector<64x128xf32>, i32 -> vector<64x128xf32>
    %83 = arith.andi %44, %46 : vector<64x1xi1>
    %cst_24 = arith.constant 0.000000e+00 : f32
    %84 = vector.shape_cast %83 : vector<64x1xi1> to vector<64x1xi1>
    %85 = vector.broadcast %84 : vector<64x1xi1> to vector<64x128xi1>
    %86 = vector.broadcast %cst_24 : f32 to vector<64x128xf32>
    %87 = arith.select %85, %82, %86 : vector<64x128xi1>, vector<64x128xf32>
    %88 = arith.truncf %87 : vector<64x128xf32> to vector<64x128xbf16>
    %c56_i32_25 = arith.constant 56 : i32
    %89 = tpu.dynamic_rotate %7 by %c56_i32_25 dim 0 : vector<64x128xf32>, i32 -> vector<64x128xf32>
    %cst_26 = arith.constant 0.000000e+00 : f32
    %90 = vector.shape_cast %44 : vector<64x1xi1> to vector<64x1xi1>
    %91 = vector.broadcast %90 : vector<64x1xi1> to vector<64x128xi1>
    %92 = vector.broadcast %cst_26 : f32 to vector<64x128xf32>
    %93 = arith.select %91, %89, %92 : vector<64x128xi1>, vector<64x128xf32>
    %94 = arith.truncf %93 : vector<64x128xf32> to vector<64x128xbf16>
    %c55_i32 = arith.constant 55 : i32
    %95 = tpu.dynamic_rotate %7 by %c55_i32 dim 0 : vector<64x128xf32>, i32 -> vector<64x128xf32>
    %96 = arith.andi %44, %48 : vector<64x1xi1>
    %cst_27 = arith.constant 0.000000e+00 : f32
    %97 = vector.shape_cast %96 : vector<64x1xi1> to vector<64x1xi1>
    %98 = vector.broadcast %97 : vector<64x1xi1> to vector<64x128xi1>
    %99 = vector.broadcast %cst_27 : f32 to vector<64x128xf32>
    %100 = arith.select %98, %95, %99 : vector<64x128xi1>, vector<64x128xf32>
    %101 = arith.truncf %100 : vector<64x128xf32> to vector<64x128xbf16>
    %102 = tpu.concatenate %55, %61, %68, %74, %75, %81, %88, %94, %101 in 1 : vector<64x128xbf16>, vector<64x128xbf16>, vector<64x128xbf16>, vector<64x128xbf16>, vector<64x128xbf16>, vector<64x128xbf16>, vector<64x128xbf16>, vector<64x128xbf16>, vector<64x128xbf16> -> vector<64x1152xbf16>
    %c0_28 = arith.constant 0 : index
    %c0_29 = arith.constant 0 : index
    %103 = vector.load %arg4[%c0_28, %c0_29] : memref<1152x128xbf16, #tpu.memory_space<vmem>>, vector<1152x128xbf16>
    %cst_30 = arith.constant dense<0.000000e+00> : vector<64x128xf32>
    %104 = tpu.matmul %102, %103, %cst_30 {dimension_numbers = #tpu.dot_dimension_numbers<[1], [0], [0], [1], [0, 0, 1, 1], [], []>} : vector<64x1152xbf16>, vector<1152x128xbf16>, vector<64x128xf32> -> vector<64x128xf32>
    %c0_31 = arith.constant 0 : index
    %c0_32 = arith.constant 0 : index
    %105 = vector.load %arg5[%c0_31, %c0_32] : memref<1x128xf32, #tpu.memory_space<vmem>>, vector<1x128xf32>
    %106 = vector.broadcast %105 : vector<1x128xf32> to vector<64x128xf32>
    %107 = arith.addf %104, %106 : vector<64x128xf32>
    %cst_33 = arith.constant 0.000000e+00 : f32
    %108 = vector.broadcast %cst_33 : f32 to vector<64x128xf32>
    %109 = arith.maximumf %107, %108 : vector<64x128xf32>
    %110 = arith.truncf %109 : vector<64x128xf32> to vector<64x128xbf16>
    %c0_34 = arith.constant 0 : index
    %c0_35 = arith.constant 0 : index
    %111 = vector.load %arg6[%c0_34, %c0_35] : memref<128x128xbf16, #tpu.memory_space<vmem>>, vector<128x128xbf16>
    %cst_36 = arith.constant dense<0.000000e+00> : vector<64x128xf32>
    %112 = tpu.matmul %110, %111, %cst_36 {dimension_numbers = #tpu.dot_dimension_numbers<[1], [0], [0], [1], [0, 0, 1, 1], [], []>} : vector<64x128xbf16>, vector<128x128xbf16>, vector<64x128xf32> -> vector<64x128xf32>
    %c0_37 = arith.constant 0 : index
    %c0_38 = arith.constant 0 : index
    %113 = vector.load %arg1[%c0_37, %c0_38] : memref<64x128xbf16, #tpu.memory_space<vmem>>, vector<64x128xbf16>
    %114 = arith.extf %113 : vector<64x128xbf16> to vector<64x128xf32>
    %c0_39 = arith.constant 0 : index
    %c0_40 = arith.constant 0 : index
    %115 = vector.load %arg7[%c0_39, %c0_40] : memref<1x128xf32, #tpu.memory_space<vmem>>, vector<1x128xf32>
    %116 = vector.broadcast %115 : vector<1x128xf32> to vector<64x128xf32>
    %117 = arith.addf %112, %116 : vector<64x128xf32>
    %118 = arith.addf %117, %114 : vector<64x128xf32>
    %cst_41 = arith.constant 0.000000e+00 : f32
    %119 = vector.broadcast %cst_41 : f32 to vector<64x128xf32>
    %120 = arith.maximumf %118, %119 : vector<64x128xf32>
    %c0_42 = arith.constant 0 : index
    %c0_43 = arith.constant 0 : index
    %121 = vector.load %arg8[%c0_42, %c0_43] : memref<64x128xf32, #tpu.memory_space<vmem>>, vector<64x128xf32>
    tpu.vector_store %arg8[%c0_42, %c0_43], %120 {strides = array<i32>} : memref<64x128xf32, #tpu.memory_space<vmem>>, vector<64x128xf32>,
    return
  }
  func.func @transform_0(%arg0: i32) -> (i32, i32) {
    %c0_i32 = arith.constant 0 : i32
    %c0_i32_0 = arith.constant 0 : i32
    return %arg0, %c0_i32 : i32, i32
  }
  func.func @transform_1(%arg0: i32) -> (i32, i32) {
    %c0_i32 = arith.constant 0 : i32
    %c0_i32_0 = arith.constant 0 : i32
    %c0_i32_1 = arith.constant 0 : i32
    return %c0_i32, %c0_i32_0 : i32, i32
  }
  func.func @transform_2(%arg0: i32) -> (i32, i32) {
    %c0_i32 = arith.constant 0 : i32
    %c0_i32_0 = arith.constant 0 : i32
    %c0_i32_1 = arith.constant 0 : i32
    return %c0_i32, %c0_i32_0 : i32, i32
  }
  func.func @transform_3(%arg0: i32) -> (i32, i32) {
    %c0_i32 = arith.constant 0 : i32
    %c0_i32_0 = arith.constant 0 : i32
    %c0_i32_1 = arith.constant 0 : i32
    return %c0_i32, %c0_i32_0 : i32, i32
  }
  func.func @transform_4(%arg0: i32) -> (i32, i32) {
    %c0_i32 = arith.constant 0 : i32
    %c0_i32_0 = arith.constant 0 : i32
    %c0_i32_1 = arith.constant 0 : i32
    return %c0_i32, %c0_i32_0 : i32, i32
  }
  func.func @transform_5(%arg0: i32) -> (i32, i32) {
    %c0_i32 = arith.constant 0 : i32
    %c0_i32_0 = arith.constant 0 : i32
    %c0_i32_1 = arith.constant 0 : i32
    return %c0_i32, %c0_i32_0 : i32, i32
  }
  func.func @transform_6(%arg0: i32) -> (i32, i32) {
    %c0_i32 = arith.constant 0 : i32
    %c0_i32_0 = arith.constant 0 : i32
    %c0_i32_1 = arith.constant 0 : i32
    return %c0_i32, %c0_i32_0 : i32, i32
  }
  func.func @transform_7(%arg0: i32) -> (i32, i32) {
    %c0_i32 = arith.constant 0 : i32
    %c0_i32_0 = arith.constant 0 : i32
    return %arg0, %c0_i32 : i32, i32
  }
}

</mosaic_0001>

<bundles_post_ra>
// kernel: tpu_custom_call.1
= control target key start
LH: loop header
LB: loop body
LE: loop exit
PB: predicated region body
PF: predicated region fallthrough
CT: control target
= control target key end

     0   :  { %12 = vsyncpa [#allocation3], 0  ;;  %s3865_s0 = inlined_call_operand.hbm [shape: bf16[128,128], index: 0, kind: input, shape index: {}]   ;;  %s3866_s1 = inlined_call_operand.hbm [shape: bf16[128,128], index: 1, kind: input, shape index: {}]   ;;  %s3867_s2 = inlined_call_operand.vmem [shape: f32[1,128], index: 2, kind: input, shape index: {}]   ;;  %s3868_s3 = inlined_call_operand.hbm [shape: bf16[1152,128], index: 3, kind: input, shape index: {}]   ;;  %s3869_s4 = inlined_call_operand.vmem [shape: f32[1,128], index: 4, kind: input, shape index: {}]   ;;  %s3870_s5 = inlined_call_operand.hbm [shape: bf16[128,128], index: 5, kind: input, shape index: {}]   ;;  %s3871_s6 = inlined_call_operand.vmem [shape: f32[1,128], index: 6, kind: input, shape index: {}]   ;;  %s3872_s7 = inlined_call_operand.hbm [shape: f32[128,128], index: 7, kind: output, shape index: {}]  }
   0x1   :  { %14 = vsyncpa [#allocation3 + $0x1], 0 }
   0x2   :  { %15 = vsyncpa [#allocation6], 0 }
   0x3   :  { %16 = vsyncpa [#allocation9], 0 }
   0x4   :  { %17 = vsyncpa [#allocation4], 0 }
   0x5   :  { %19 = vsyncpa [#allocation4 + $0x1], 0  ;;  %s3148_s24 = smov 0   ;;  %s3150_s25 = smov 0  }
   0x6   :  { %s3152_s26 = smov 0   ;;  %s3154_s27 = smov 0  }
   0x7 LB: > { %s3169_s28 = sadd.s32 4294967295, %s3095_s27   ;;  %s2251_s29 = sadd.s32 4294967294, %s3095_s27   ;;  %s3095_s27 = sphi %s3154_s27, %s3933_s27   ;;  %s3091_s26 = sphi %s3152_s26, %s3932_s26   ;;  %s3087_s25 = sphi %s3150_s25, %s3931_s25   ;;  %s3083_s24 = sphi %s3148_s24, %s3930_s24  }
   0x8   : > { %p45_p0 = scmp.ne.s32.totalorder %s3087_s25, %s3083_s24  ;;  %p3873_p1 = scmp.eq.s32.totalorder %s3169_s28, 0 }
   0x9   : > { %p201_p3 = scmp.eq.s32.totalorder %s2251_s29, 1  ;;  %p2252_p5 = scmp.ge.s32.totalorder %s3095_s27, 1 }
   0xa   : > { %p3178_p4 = por %p3873_p1, %p45_p0  ;;  %p208_p7 = scmp.lt.s32.totalorder %s3095_s27, 3 }
   0xb   : > { %p3183_p6 = por %p201_p3, %p45_p0  ;;  %s3097_s10 = smov [#allocation5]  }
   0xc   : > { %s3879_s30 = scalar_select %p3178_p4, 1, 0 }
   0xd   : > { %s3880_s8 = scalar_select %p3183_p6, 1, 0 }
   0xe   : > { %p3188_p8 = pnand %p2252_p5, %p208_p7  ;;  %s220_s11 = sshll.u32 %s3097_s10, 4  ;;  %s3192_s11 = int_to_ptr.vmem [resolvable:$true] %s220_s11 }
   0xf   : > { %3881 = sst [smem:[#allocation15_spill]] %s3880_s8  ;;  %s3098_s13 = smov [#allocation7]  }
  0x10   : > { %s3882_s9 = scalar_select %p3188_p8, 1, 0 }
  0x11   : > { %p2740_p9 = pneg %p3188_p8  ;;  %s236_s14 = sshll.u32 %s3098_s13, 4  ;;  %s3203_s14 = int_to_ptr.vmem [resolvable:$true] %s236_s14 }
  0x12   : > { %s3099_s15 = smov [#allocation8]   ;;  %s2907_s19 = scalar_lea.hbm %s3866_s1, 1024 }
  0x13   : > { %p3199_p11 = pnand %p2740_p9, %p3873_p1  ;;  %s3205_s16 = sshll.u32 %s3099_s15, 4  ;;  %s253_s16 = int_to_ptr.vmem [resolvable:$true] %s3205_s16 }
  0x14   : > { %p2908_p12 = scmp.ne.s32.totalorder %s3866_s1, %s2907_s19  ;;  %p2914_p5 = scmp.lt.u32.totalorder %s2907_s19, %s3866_s1 }
  0x15   : > { %p3215_p13 = pneg %p3199_p11 }
  0x17   : > { %p2910_p0 = pnand %p3215_p13, %p2908_p12 }
  0x19   : > { %p2911_p3 = pneg %p2910_p0 }
  0x1b   : > { %p2916_p7 = pnand %p2914_p5, %p2911_p3 }
  0x1d   : > { %2919 = shalt.err (!%p2916_p7)
}
  0x1e   : > { %s2920_s10 = scalar_lea.vmem %s3192_s11, 1024  ;;  %p2928_p2 = scmp.lt.s32.totalorder %s3192_s11, %s3192_s11 }
  0x1f   : > { %p2921_p9 = scmp.ne.s32.totalorder %s3192_s11, %s2920_s10  ;;  %p2929_p6 = scmp.lt.s32.totalorder %s2920_s10, %s2920_s10 }
  0x21   : > { %p2923_p10 = pnand %p2921_p9, %p3215_p13  ;;  %p2930_p12 = por %p2929_p6, %p2928_p2 }
  0x23   : > { %p2924_p1 = pneg %p2923_p10 }
  0x25   : > { %p2931_p0 = pnand %p2930_p12, %p2924_p1 }
  0x27   : > { %2934 = shalt.err (!%p2931_p0)
}
  0x28   : > { %s3100_s13 = smov 64   ;;  %s3101_s15 = smov 4  }
  0x29   : > { %2743 = dma.hbm_to_vmem [thread:$0]  (!%p3199_p11), %s3866_s1, 1024, %s3192_s11, [#allocation6], %s3100_s13, %s3100_s13, %s3101_s15  }
  0x2a   : > { %s2935_s21 = scalar_lea.hbm %s3868_s3, 9216 }
  0x2b   : > { %p2936_p1 = scmp.ne.s32.totalorder %s3868_s3, %s2935_s21  ;;  %p2942_p10 = scmp.lt.u32.totalorder %s2935_s21, %s3868_s3 }
  0x2d   : > { %p2938_p2 = pnand %p2936_p1, %p3215_p13 }
  0x2f   : > { %p2939_p6 = pneg %p2938_p2 }
  0x31   : > { %p2944_p3 = pnand %p2942_p10, %p2939_p6 }
  0x33   : > { %2947 = shalt.err (!%p2944_p3)
}
  0x34   : > { %s2948_s11 = scalar_lea.vmem %s3203_s14, 9216  ;;  %p2956_p12 = scmp.lt.s32.totalorder %s3203_s14, %s3203_s14 }
  0x35   : > { %p2949_p5 = scmp.ne.s32.totalorder %s3203_s14, %s2948_s11  ;;  %p2957_p0 = scmp.lt.s32.totalorder %s2948_s11, %s2948_s11 }
  0x37   : > { %p2951_p7 = pnand %p2949_p5, %p3215_p13  ;;  %p2958_p1 = por %p2957_p0, %p2956_p12 }
  0x39   : > { %p2952_p9 = pneg %p2951_p7 }
  0x3b   : > { %p2959_p2 = pnand %p2958_p1, %p2952_p9 }
  0x3d   : > { %2962 = shalt.err (!%p2959_p2)
}
  0x3e   : > { %2746 = dma.hbm_to_vmem [thread:$0]  (!%p3199_p11), %s3868_s3, 9216, %s3203_s14, [#allocation6], %s3100_s13, %s3100_s13, %s3101_s15  }
  0x3f   : > { %s2963_s20 = scalar_lea.hbm %s3870_s5, 1024 }
  0x40   : > { %p2964_p6 = scmp.ne.s32.totalorder %s3870_s5, %s2963_s20  ;;  %p2970_p5 = scmp.lt.u32.totalorder %s2963_s20, %s3870_s5 }
  0x42   : > { %p2966_p10 = pnand %p2964_p6, %p3215_p13 }
  0x44   : > { %p2967_p3 = pneg %p2966_p10 }
  0x46   : > { %p2972_p7 = pnand %p2970_p5, %p2967_p3 }
  0x48   : > { %2975 = shalt.err (!%p2972_p7)
}
  0x49   : > { %s2976_s11 = scalar_lea.vmem %s253_s16, 1024  ;;  %p2984_p1 = scmp.lt.s32.totalorder %s253_s16, %s253_s16 }
  0x4a   : > { %p2977_p9 = scmp.ne.s32.totalorder %s253_s16, %s2976_s11  ;;  %p2985_p2 = scmp.lt.s32.totalorder %s2976_s11, %s2976_s11 }
  0x4c   : > { %p2979_p12 = pnand %p2977_p9, %p3215_p13  ;;  %p2986_p4 = por %p2985_p2, %p2984_p1 }
  0x4e   : > { %p2980_p0 = pneg %p2979_p12 }
  0x50   : > { %p2987_p8 = pnand %p2986_p4, %p2980_p0 }
  0x52   : > { %2990 = shalt.err (!%p2987_p8)
}
  0x53   : > { %2749 = dma.hbm_to_vmem [thread:$0]  (!%p3199_p11), %s3870_s5, 1024, %s253_s16, [#allocation9], %s3100_s13, %s3100_s13, %s3101_s15  }
  0x54   : > { %s3288_s22 = sadd.s32 1, %s3095_s27   ;;  %s32_s17 = sadd.s32 1, %s3091_s26 }
  0x55   : > { %s29_s12 = ssub.s32 %s3095_s27, %s3288_s22  ;;  %p39_p8 = scmp.ne.s32.totalorder %s3091_s26, %s3087_s25 }
  0x56   : > { %p30_p4 = scmp.eq.s32.totalorder %s29_s12, 0  ;;  %p40_p13 = scmp.eq.s32.totalorder %s3095_s27, 0 }
  0x57   : > { %p2761_p6 = scmp.lt.s32.totalorder %s3095_s27, 2  ;;  %p3885_p3 = scmp.eq.s32.totalorder %s3169_s28, 1 }
  0x58   : > { %s3298_s18 = scalar_select %p30_p4, %s3091_s26, %s32_s17  }
  0x59   : > { %p41_p10 = por %p40_p13, %p39_p8  ;;  %p3302_p5 = por %p3885_p3, %p39_p8 }
  0x5a   : > { %s269_s20 = sand.u32 1, %s3091_s26   ;;  %s2438_s21 = sshll.u32 %s3095_s27, 9 }
  0x5b   : > { %s2257_s16 = sshll.u32 %s269_s20, 5  ;;  %s3311_s10 = scalar_lea.hbm %s3865_s0, %s2438_s21 }
  0x5c   : > { %s273_s11 = scalar_lea.vmem [#allocation2], %s2257_s16  ;;  %p3313_p11 = pnand %p2761_p6, %p41_p10 }
  0x5d   : > { %s280_s14 = sshll.u32 %s273_s11, 4  ;;  %s3319_s12 = scalar_lea.sflag [#allocation3], %s269_s20  ;;  %s3317_s14 = int_to_ptr.vmem [resolvable:$true] %s280_s14 }
  0x5e   : > { %s2991_s17 = scalar_lea.hbm %s3311_s10, 512  ;;  %p2993_p9 = pneg %p3313_p11 }
  0x5f   : > { %p2992_p7 = scmp.ne.s32.totalorder %s3311_s10, %s2991_s17  ;;  %s2996_s23 = scalar_lea.hbm %s3865_s0, 1024 }
  0x60   : > { %p2997_p1 = scmp.lt.u32.totalorder %s3311_s10, %s3865_s0  ;;  %p2998_p2 = scmp.lt.u32.totalorder %s2996_s23, %s2991_s17 }
  0x61   : > { %p2994_p12 = pnand %p2993_p9, %p2992_p7  ;;  %p3000_p8 = scmp.lt.u32.totalorder %s2991_s17, %s3311_s10 }
  0x62   : > { %p2999_p4 = por %p2998_p2, %p2997_p1 }
  0x63   : > { %p2995_p0 = pneg %p2994_p12 }
  0x64   : > { %p3001_p13 = por %p3000_p8, %p2999_p4 }
  0x66   : > { %p3002_p6 = pnand %p3001_p13, %p2995_p0 }
  0x68   : > { %3005 = shalt.err (!%p3002_p6)
}
  0x69   : > { %s3006_s20 = scalar_lea.vmem %s3317_s14, 512  ;;  %s3102_s21 = smov [#allocation2]  }
  0x6a   : > { %p3007_p10 = scmp.ne.s32.totalorder %s3317_s14, %s3006_s20  ;;  %s3011_s16 = sshll.u32 %s3102_s21, 4  ;;  %s3012_s16 = int_to_ptr.vmem [resolvable:$false] %s3011_s16 }
  0x6b   : > { %s3013_s29 = scalar_lea.vmem %s3012_s16, 1024  ;;  %p3014_p12 = scmp.lt.s32.totalorder %s3317_s14, %s3012_s16 }
  0x6c   : > { %p3009_p3 = pnand %p3007_p10, %p2993_p9  ;;  %p3015_p1 = scmp.lt.s32.totalorder %s3013_s29, %s3006_s20 }
  0x6e   : > { %p3010_p7 = pneg %p3009_p3  ;;  %p3016_p2 = por %p3015_p1, %p3014_p12 }
  0x70   : > { %p3017_p4 = pnand %p3016_p2, %p3010_p7 }
  0x72   : > { %3020 = shalt.err (!%p3017_p4)
}
  0x73   : > { %2753 = dma.hbm_to_vmem [thread:$0]  (!%p3313_p11), %s3311_s10, 512, %s3317_s14, %s3319_s12, %s3100_s13, %s3100_s13, %s3101_s15  }
  0x74   : > { %p3888_p9 = scmp.ne.s32.totalorder %s3882_s9, 0 }
  0x75   : > { %s3353_s17 = sand.u32 (!%p3888_p9), 1, %s3087_s25   ;;  %p3889_p0 = scmp.ne.s32.totalorder (!%p3888_p9), %s3879_s30, 0 }
  0x76   : > { %292 = sbr.rel (%p3888_p9) target bundleno = 927 (0x39f), region = 48  ;;  %s2261_s23 = sshll.u32 (!%p3888_p9), %s3353_s17, 5 }
  0x77   : > { %s295_s11 = scalar_lea.sflag (!%p3888_p9), [#allocation3], %s3353_s17  ;;  %s3357_s20 = scalar_lea.vmem (!%p3888_p9), [#allocation2], %s2261_s23 }
  0x7d   : > { %3066 = dma.done.wait (%p3889_p0), %s295_s11, 512  }
  0x7e   : > { %3068 = vsyncadd (%p3889_p0), %s295_s11, 4294966784  ;;  %p3890_p11 = scmp.eq.s32.totalorder %s3169_s28, 0 }
  0x80   : > { %3070 = dma.done.wait (%p3890_p11), [#allocation6], 10240   ;;  %p3891_p8 = pmov %p3890_p11 }
  0x82   : > { %3072 = vsyncadd (%p3891_p8), [#allocation6], 4294957056  ;;  %p3892_p13 = pmov %p3891_p8 }
  0x83   : > { %p3893_p6 = pmov %p3891_p8 }
  0x84   : > { %3074 = dma.done.wait (%p3892_p13), [#allocation9], 1024  }
  0x85   : > { %3076 = vsyncadd (%p3893_p6), [#allocation9], 4294966272  ;;  %v2807_v0 = vld [vmem:[#allocation5] sm:$0xff]   ;;  %v2808_v1 = vld [vmem:[#allocation5 + $0x8] sm:$0xff]   ;;  %v520_v46 = vlaneseq  ;;  %vm3877_vm7 = vmmov 1   ;;  %s2265_s8 = sshll.u32 %s3353_s17, 6 }
  0x86   : > { %2636 = vmatprep.subr.bf16.mxu0 %v2807_v0  ;;  %v2809_v2 = vld [vmem:[#allocation5 + $0x10] sm:$0xff]   ;;  %v2810_v3 = vld [vmem:[#allocation5 + $0x18] sm:$0xff]   ;;  %v344_v4 = vld [vmem:[%s3357_s20] sm:$0xff]   ;;  %s3802_s12 = scalar_lea.vmem [#allocation10], %s2265_s8  ;;  %s2439_s16 = sshll.u32 %s3169_s28, 10 }
  0x87   : > { %2637 = vmatpush3.bf16.msra.mxu0 %v2807_v0  ;;  %v2819_v5 = vld [vmem:[#allocation7 + $0x40] sm:$0xff]   ;;  %2652 = vmatprep.mubr.bf16.mxu0 %v344_v4  ;;  %v2823_v8 = vld [vmem:[#allocation7 + $0x48] sm:$0xff]   ;;  %v2827_v11 = vld [vmem:[#allocation7 + $0x50] sm:$0xff]   ;;  %v3375_v47 = vshrl.u32 %v520_v46, 7  ;;  %s2149_s21 = sshll.u32 %s3802_s12, 4  ;;  %s3818_s11 = scalar_lea.hbm %s3872_s7, %s2439_s16  ;;  %s3812_s21 = int_to_ptr.vmem [resolvable:$true] %s2149_s21 }
  0x88   : > { %2638 = vmatprep.subr.bf16.mxu0 %v2808_v1  ;;  %v2820_v6 = vld [vmem:[#allocation7] sm:$0xff]   ;;  %2452 = vmatprep.subr.bf16.mxu1 %v2819_v5  ;;  %v2824_v9 = vld [vmem:[#allocation7 + $0x8] sm:$0xff]   ;;  %v2828_v12 = vld [vmem:[#allocation7 + $0x10] sm:$0xff]   ;;  %s2136_s28 = scalar_lea.sflag [#allocation4], %s3353_s17  ;;  %s3105_s30 = smov [#allocation10]  }
  0x89   : > { %v2811_v7 = vld [vmem:[#allocation5 + $0x20] sm:$0xff]   ;;  %2453 = vmatpush3.bf16.msra.mxu1 %v2820_v6  ;;  %v2812_v10 = vld [vmem:[#allocation5 + $0x28] sm:$0xff]   ;;  %v2813_v13 = vld [vmem:[#allocation5 + $0x30] sm:$0xff]   ;;  %v522_v48 = vadd.s32 8, %v3375_v47  ;;  %v3382_v54 = vadd.s32 16, %v3375_v47  ;;  %v3385_v55 = vadd.s32 24, %v3375_v47 }
  0x8a   : > { %2454 = vmatprep.subr.bf16.mxu1 %v2823_v8  ;;  %v2814_v14 = vld [vmem:[#allocation5 + $0x38] sm:$0xff]   ;;  %v346_v16 = vld [vmem:[%s3357_s20 + $0x8] sm:$0xff]   ;;  %v348_v17 = vld [vmem:[%s3357_s20 + $0x10] sm:$0xff]   ;;  %v533_v58 = vand.u32 7, %v3375_v47  ;;  %vm842_vm0 = vcmp.lt.s32.totalorder %v3375_v47, 7  ;;  %vm761_vm1 = vcmp.lt.s32.totalorder %v3375_v47, 1 }
  0x8b   : > { %2639 = vmatpush3.bf16.msra.mxu0 %v2808_v1  ;;  %v2831_v15 = vld [vmem:[#allocation7 + $0x58] sm:$0xff]   ;;  %v2821_v18 = vld [vmem:[#allocation7 + $0xc0] sm:$0xff]   ;;  %v2825_v20 = vld [vmem:[#allocation7 + $0xc8] sm:$0xff]   ;;  %v540_v53 = vand.u32 7, %v522_v48  ;;  %v554_v4 = vand.u32 7, %v3385_v55  ;;  %v3103_v8 = vmov 0.0  }
  0x8c   : > { %2640 = vmatprep.subr.bf16.mxu0 %v2809_v2  ;;  %v2822_v19 = vld [vmem:[#allocation7 + $0x80] sm:$0xff]   ;;  %v350_v21 = vld [vmem:[%s3357_s20 + $0x18] sm:$0xff]   ;;  %v2826_v22 = vld [vmem:[#allocation7 + $0x88] sm:$0xff]   ;;  %vm3411_vm3 = vcmp.ge.s32.totalorder %v533_v58, 1  ;;  %s3025_s9 = sshll.u32 %s3105_s30, 4  ;;  %s3026_s9 = int_to_ptr.vmem [resolvable:$false] %s3025_s9 }
  0x8d   : > { %2455 = vmatpush3.bf16.msra.mxu1 %v2824_v9  ;;  %v2829_v23 = vld [vmem:[#allocation7 + $0xd0] sm:$0xff]   ;;  %v2832_v25 = vld [vmem:[#allocation7 + $0x18] sm:$0xff]   ;;  %v2835_v28 = vld [vmem:[#allocation7 + $0x60] sm:$0xff]   ;;  %vm3397_vm2 = vcmp.ge.s32.totalorder %v540_v53, 1  ;;  %vm3424_vm4 = vcmp.lt.s32.totalorder %v540_v53, 7  ;;  %vm3440_vm6 = vcmp.ge.s32.totalorder %v554_v4, 1  ;;  %p3028_p12 = scmp.lt.s32.totalorder %s3812_s21, %s3026_s9 }
  0x8e   : > { %2456 = vmatprep.subr.bf16.mxu1 %v2827_v11  ;;  %v2830_v24 = vld [vmem:[#allocation7 + $0x90] sm:$0xff]   ;;  %v2833_v26 = vld [vmem:[#allocation7 + $0xd8] sm:$0xff]   ;;  %v2836_v29 = vld [vmem:[#allocation7 + $0x20] sm:$0xff]   ;;  %vm748_vm13 = vcmp.lt.s32.totalorder %v554_v4, 7  ;;  %s3027_s13 = scalar_lea.vmem %s3026_s9, 2048 }
  0x8f   : > { %2641 = vmatpush3.bf16.msra.mxu0 %v2809_v2  ;;  %v2834_v27 = vld [vmem:[#allocation7 + $0x98] sm:$0xff]   ;;  %v2837_v30 = vld [vmem:[#allocation7 + $0xe0] sm:$0xff]   ;;  %v2839_v32 = vld [vmem:[#allocation7 + $0x68] sm:$0xff]  }
  0x90   : > { %2642 = vmatprep.subr.bf16.mxu0 %v2810_v3  ;;  %v2838_v31 = vld [vmem:[#allocation7 + $0xa0] sm:$0xff]   ;;  %v2840_v33 = vld [vmem:[#allocation7 + $0x28] sm:$0xff]   ;;  %v2843_v36 = vld [vmem:[#allocation7 + $0x70] sm:$0xff]  }
  0x91   : > { %2457 = vmatpush3.bf16.msra.mxu1 %v2828_v12  ;;  %v2841_v34 = vld [vmem:[#allocation7 + $0xe8] sm:$0xff]   ;;  %v2844_v37 = vld [vmem:[#allocation7 + $0x30] sm:$0xff]   ;;  %v2847_v40 = vld [vmem:[#allocation7 + $0x78] sm:$0xff]  }
  0x92   : > { %2458 = vmatprep.subr.bf16.mxu1 %v2831_v15  ;;  %v2842_v35 = vld [vmem:[#allocation7 + $0xa8] sm:$0xff]   ;;  %v2845_v38 = vld [vmem:[#allocation7 + $0xf0] sm:$0xff]   ;;  %v2848_v41 = vld [vmem:[#allocation7 + $0x38] sm:$0xff]  }
  0x93   : > { %2643 = vmatpush3.bf16.msra.mxu0 %v2810_v3  ;;  %v2846_v39 = vld [vmem:[#allocation7 + $0xb0] sm:$0xff]   ;;  %v2849_v42 = vld [vmem:[#allocation7 + $0xf8] sm:$0xff]   ;;  %v2851_v44 = vld [vmem:[#allocation7 + $0x140] sm:$0xff]   ;;  %v547_v3 = vand.u32 7, %v3382_v54 }
  0x94   : > { %2644 = vmatprep.subr.bf16.mxu0 %v2811_v7  ;;  %v2850_v43 = vld [vmem:[#allocation7 + $0xb8] sm:$0xff]   ;;  %v2853_v45 = vld [vmem:[#allocation7 + $0x1c0] sm:$0xff]   ;;  %vm3510_vm8 = vmpackc.low %vm3397_vm2, %vm3877_vm7 }
  0x95   : > { %2459 = vmatpush3.bf16.msra.mxu1 %v2832_v25  ;;  %v2266_v49 = vld [vmem:[%s3867_s2] ss:$0 sm:$0xff]  ;;  %vm3434_vm5 = vcmp.ge.s32.totalorder %v547_v3, 1  ;;  %vm2364_vm9 = vmpackc.low %vm3397_vm2, %vm3411_vm3  ;;  %vm747_vm12 = vcmp.lt.s32.totalorder %v547_v3, 7  ;;  %v2862_v54 = vld [vmem:[#allocation7 + $0x190] sm:$0xff]   ;;  %vm3926_vm2 = vmmov 1  }
  0x96   : > { %2460 = vmatprep.subr.bf16.mxu1 %v2835_v28  ;;  %vm3552_vm10 = vmpackc.low %vm3424_vm4, %vm3877_vm7  ;;  %v2865_v3 = vld [vmem:[#allocation7 + $0x1d8] sm:$0xff]   ;;  %v2887_v2 = vld [vmem:[#allocation7 + $0x220] sm:$0xff]  }
  0x97   : > { %2645 = vmatpush3.bf16.msra.mxu0 %v2811_v7  ;;  %vm3581_vm11 = vmpackc.low %vm3440_vm6, %vm3434_vm5  ;;  %v2864_v4 = vld [vmem:[#allocation7 + $0x118] sm:$0xff]  }
  0x98   : > { %2646 = vmatprep.subr.bf16.mxu0 %v2812_v10 }
  0x99   : > { %2461 = vmatpush3.bf16.msra.mxu1 %v2836_v29 }
  0x9a   : > { %2462 = vmatprep.subr.bf16.mxu1 %v2839_v32 }
  0x9b   : > { %2647 = vmatpush3.bf16.msra.mxu0 %v2812_v10  ;;  %v2890_v10 = vld [vmem:[#allocation7 + $0x238] sm:$0xff]  }
  0x9c   : > { %2648 = vmatprep.subr.bf16.mxu0 %v2813_v13 }
  0x9d   : > { %2463 = vmatpush3.bf16.msra.mxu1 %v2840_v33 }
  0x9e   : > { %2464 = vmatprep.subr.bf16.mxu1 %v2843_v36 }
  0x9f   : > { %2649 = vmatpush3.bf16.msra.mxu0 %v2813_v13 }
  0xa0   : > { %2650 = vmatprep.subr.bf16.mxu0 %v2814_v14 }
  0xa1   : > { %2465 = vmatpush3.bf16.msra.mxu1 %v2844_v37  ;;  %v3472_v37 = vadd.s32 40, %v3375_v47 }
  0xa2   : > { %2466 = vmatprep.subr.bf16.mxu1 %v2847_v40 }
  0xa3   : > { %2651 = vmatpush3.bf16.msra.mxu0 %v2814_v14 }
  0xa4   : > { %2492 = vmatprep.subr.bf16.mxu0 %v2821_v18 }
  0xa5   : > { %2467 = vmatpush3.bf16.msra.mxu1 %v2848_v41 }
  0xa6   : > { %2653 = vmatmul.mubr.bf16.vlgmr.msra.gmra.mrb[0].mxu0 %v346_v16  ;;  %2532 = vmatprep.subr.bf16.mxu1 %v2851_v44 }
  0xa7   : > { %2656 = vmatprep.mubr.bf16.mxu0 %v348_v17  ;;  %2493 = vmatpush3.bf16.msra.mxu0 %v2822_v19  ;;  %v2894_v19 = vld [vmem:[#allocation8 + $0x18] sm:$0xff]  }
  0xa8   : > { %2494 = vmatprep.subr.bf16.mxu0 %v2825_v20 }
  0xab   : > { %2495 = vmatpush3.bf16.msra.mxu0 %v2826_v22 }
  0xac   : > { %2496 = vmatprep.subr.bf16.mxu0 %v2829_v23  ;;  %v2856_v23 = vld [vmem:[#allocation7 + $0x108] sm:$0xff]  }
  0xae   : > { %2657 = vmatmul.mubr.bf16.gmra.mrb[4].mxu0 %v350_v21 }
  0xaf   : > { %2497 = vmatpush3.bf16.msra.mxu0 %v2830_v24  ;;  %v568_v24 = vand.u32 7, %v3472_v37 }
  0xb0   : > { %2498 = vmatprep.subr.bf16.mxu0 %v2833_v26 }
  0xb1   : > { %vm742_vm15 = vcmp.ge.s32.totalorder %v568_v24, 1  ;;  %vm750_vm6 = vcmp.lt.s32.totalorder %v568_v24, 7  ;;  %v2873_v24 = vld [vmem:[#allocation7 + $0x1e8] sm:$0xff]  }
  0xb3   : > { %2499 = vmatpush3.bf16.msra.mxu0 %v2834_v27  ;;  %v3453_v27 = vadd.s32 32, %v3375_v47 }
  0xb4   : > { %2500 = vmatprep.subr.bf16.mxu0 %v2837_v30 }
  0xb7   : > { %2501 = vmatpush3.bf16.msra.mxu0 %v2838_v31 }
  0xb8   : > { %2502 = vmatprep.subr.bf16.mxu0 %v2841_v34 }
  0xbb   : > { %2503 = vmatpush3.bf16.msra.mxu0 %v2842_v35 }
  0xbc   : > { %2504 = vmatprep.subr.bf16.mxu0 %v2845_v38 }
  0xbf   : > { %2505 = vmatpush3.bf16.msra.mxu0 %v2846_v39 }
  0xc0   : > { %2506 = vmatprep.subr.bf16.mxu0 %v2849_v42 }
  0xc3   : > { %2507 = vmatpush3.bf16.msra.mxu0 %v2850_v43 }
  0xc4   : > { %2572 = vmatprep.subr.bf16.mxu0 %v2853_v45 }
 0x179   : > { %v2654_v50 = vpop.f32.mrb[0].mxu0 }
 0x17a   : > { %v490_v51 = vadd.f32 %v2654_v50, %v2266_v49  ;;  %v481_v52 = vpop.f32.mrb[1].mxu0 }
 0x17b   : > { %v482_v56 = vadd.f32 %v2266_v49, %v481_v52  ;;  %v2655_v57 = vpop.f32.mrb[2].mxu0 }
 0x17c   : > { %v3388_v59 = vmax.f32 %v490_v51, 0.0  ;;  %v493_v60 = vadd.f32 %v2655_v57, %v2266_v49  ;;  %v484_v61 = vpop.f32.mrb[3].mxu0 }
 0x17d   : > { %v3390_v62 = vmax.f32 %v482_v56, 0.0  ;;  %v485_v63 = vadd.f32 %v2266_v49, %v484_v61 }
 0x17e   : > { %v755_v0 = vrot.slane %v3388_v59, 7  ;;  %v3395_v1 = vmax.f32 %v493_v60, 0.0  ;;  %v836_v5 = vrot.slane %v3388_v59, 1 }
 0x17f   : > { %v753_v6 = vrot.slane %v3390_v62, 7  ;;  %v3405_v7 = vmax.f32 %v485_v63, 0.0  ;;  %v830_v9 = vpack.c.bf16 %v3390_v62, %v3103_v8  ;;  %v834_v11 = vrot.slane %v3390_v62, 1 }
 0x180   : > { %v756_v12 = vrot.slane %v3395_v1, 7  ;;  %v837_v13 = vrot.slane %v3395_v1, 1  ;;  %v916_v14 = vpack.c.bf16 %v3395_v1, %v3388_v59 }
 0x181   : > { %v754_v15 = vrot.slane %v3405_v7, 7  ;;  %v835_v16 = vrot.slane %v3405_v7, 1  ;;  %v915_v17 = vpack.c.bf16 %v3405_v7, %v3390_v62  ;;  %v2658_v18 = vpop.f32.mrb[4].mxu0  ;;  %1662 = vmatprep.mubr.bf16.mxu1 %v830_v9  ;;  %v3430_v20 = vpack.c.bf16 %v3388_v59, %v3405_v7  ;;  %v2852_v9 = vld [vmem:[#allocation7 + $0x100] sm:$0xff]   ;;  %v2886_v62 = vld [vmem:[#allocation7 + $0x218] sm:$0xff]   ;;  %v2888_v7 = vld [vmem:[#allocation7 + $0x228] sm:$0xff]  }
 0x182   : > { %v506_v21 = vadd.f32 %v2658_v18, %v2266_v49  ;;  %v497_v22 = vpop.f32.mrb[5].mxu0  ;;  %v3446_v25 = vsel %vm761_vm1, %v755_v0, %v756_v12  ;;  %v3450_v26 = vsel %vm842_vm0, %v836_v5, %v837_v13 }
 0x183   : > { %v3459_v28 = vsel %vm842_vm0, %v834_v11, %v835_v16  ;;  %v498_v29 = vadd.f32 %v2266_v49, %v497_v22  ;;  %v2659_v30 = vpop.f32.mrb[6].mxu0  ;;  %v768_v31 = vsel %vm761_vm1, %v753_v6, %v754_v15  ;;  %v3465_v32 = vsel %vm761_vm1, %v754_v15, %v755_v0 }
 0x184   : > { %v3467_v33 = vmax.f32 %v506_v21, 0.0  ;;  %v509_v34 = vadd.f32 %v2659_v30, %v2266_v49  ;;  %v500_v35 = vpop.f32.mrb[7].mxu0  ;;  %v2371_v36 = vpack.c.bf16 %v3446_v25, %v3465_v32  ;;  %v3477_v40 = vpack.c.bf16 %v3465_v32, %v768_v31  ;;  %v2855_v21 = vld [vmem:[#allocation7 + $0x148] sm:$0xff]  }
 0x185   : > { %v3474_v38 = vmax.f32 %v498_v29, 0.0  ;;  %v501_v39 = vadd.f32 %v2266_v49, %v500_v35  ;;  %v3481_v41 = vsel %vm842_vm0, %v835_v16, %v836_v5  ;;  %v2368_v44 = vpack.c.bf16 %v3459_v28, %v3103_v8  ;;  %v2854_v29 = vld [vmem:[#allocation7 + $0x180] sm:$0xff]  }
 0x186   : > { %v759_v42 = vrot.slane %v3467_v33, 7  ;;  %v3484_v43 = vmax.f32 %v509_v34, 0.0  ;;  %v3490_v45 = vpack.c.bf16 %v3450_v26, %v3481_v41  ;;  %v840_v51 = vrot.slane %v3467_v33, 1 }
 0x187   : > { %v757_v46 = vrot.slane %v3474_v38, 7  ;;  %v838_v48 = vrot.slane %v3474_v38, 1  ;;  %v3494_v49 = vmax.f32 %v501_v39, 0.0  ;;  %v3498_v50 = vpack.c.bf16 %v3474_v38, %v3395_v1  ;;  %v2857_v39 = vld [vmem:[#allocation7 + $0x1c8] sm:$0xff]   ;;  %v2889_v1 = vld [vmem:[#allocation7 + $0x230] sm:$0xff]  }
 0x188   : > { %v760_v52 = vrot.slane %v3484_v43, 7  ;;  %v841_v53 = vrot.slane %v3484_v43, 1  ;;  %v2389_v56 = vpack.c.bf16 %v3481_v41, %v3459_v28  ;;  %v2882_v28 = vld [vmem:[#allocation7 + $0x1b8] sm:$0xff]   ;;  %v2884_v41 = vld [vmem:[#allocation7 + $0x208] sm:$0xff]   ;;  %v1010_v59 = vpack.c.bf16 %v3103_v8, %v3484_v43 }
 0x189   : > { %v758_v57 = vrot.slane %v3494_v49, 7  ;;  %v839_v60 = vrot.slane %v3494_v49, 1  ;;  %v3516_v63 = vsel %vm761_vm1, %v756_v12, %v757_v46  ;;  %v3520_v0 = vpack.c.bf16 %v3467_v33, %v3494_v49 }
 0x18a   : > { %v769_v5 = vsel %vm761_vm1, %v760_v52, %v753_v6  ;;  %v3530_v15 = vpack.c.bf16 %v3516_v63, %v3446_v25  ;;  %v3534_v12 = vsel %vm842_vm0, %v837_v13, %v838_v48  ;;  %v3538_v16 = vsel %vm761_vm1, %v759_v42, %v760_v52 }
 0x18b   : > { %v2353_v6 = vpack.c.bf16 %v769_v5, %v3103_v8  ;;  %v2365_v18 = vpack.c.bf16 %v768_v31, %v769_v5  ;;  %v3543_v22 = vsel %vm761_vm1, %v757_v46, %v758_v57  ;;  %v3547_v25 = vsel %vm842_vm0, %v838_v48, %v839_v60  ;;  %v2858_v5 = vld [vmem:[#allocation7 + $0x188] sm:$0xff]  }
 0x18c   : > { %v2377_v30 = vpack.c.bf16 %v3543_v22, %v3516_v63  ;;  %v3560_v31 = vpack.c.bf16 %v3547_v25, %v3534_v12  ;;  %v3564_v32 = vsel %vm761_vm1, %v758_v57, %v759_v42  ;;  %v3568_v34 = vsel %vm842_vm0, %v840_v51, %v841_v53 }
 0x18d   : > { %2354 = vmatmul.mubr.msk.bf16.vlgmr.msra.gmra.mrb[0].mxu1 %vm3510_vm8, %v2353_v6  ;;  %2366 = vmatprep.mubr.msk.bf16.mxu0 %vm2364_vm9, %v2365_v18  ;;  %v561_v42 = vand.u32 7, %v3453_v27  ;;  %v2383_v46 = vpack.c.bf16 %v3538_v16, %v3564_v32  ;;  %v3590_v48 = vpack.c.bf16 %v3564_v32, %v3543_v22  ;;  %v3594_v52 = vsel %vm842_vm0, %v839_v60, %v840_v51  ;;  %v2859_v51 = vld [vmem:[#allocation7 + $0x150] sm:$0xff]  }
 0x18e   : > { %2533 = vmatpush3.bf16.msra.mxu1 %v2852_v9  ;;  %1670 = vmatprep.mubr.bf16.mxu1 %v3430_v20  ;;  %v3600_v27 = vpack.c.bf16 %v3568_v34, %v3594_v52  ;;  %v2392_v57 = vpack.c.bf16 %v3534_v12, %v3450_v26  ;;  %v2395_v61 = vpack.c.bf16 %v3594_v52, %v3547_v25  ;;  %v528_v18 = vadd.s32 56, %v3375_v47  ;;  %v2877_v32 = vld [vmem:[#allocation7 + $0x1f0] sm:$0xff]   ;;  %v2895_v26 = vld [vmem:[#allocation8 + $0x20] sm:$0xff]  }
 0x18f   : > { %2369 = vmatmul.mubr.msk.bf16.vlgmr.msra.gmra.mrb[8].mxu0 %vm3552_vm10, %v2368_v44  ;;  %2534 = vmatprep.subr.bf16.mxu1 %v2855_v21  ;;  %v917_v60 = vpack.c.bf16 %v3494_v49, %v3474_v38  ;;  %v3614_v37 = vsel %vm842_vm0, %v841_v53, %v834_v11  ;;  %v918_v63 = vpack.c.bf16 %v3484_v43, %v3467_v33  ;;  %v2861_v11 = vld [vmem:[#allocation7 + $0x1d0] sm:$0xff]   ;;  %vm741_vm14 = vcmp.ge.s32.totalorder %v561_v42, 1  ;;  %v2863_v21 = vld [vmem:[#allocation7 + $0x158] sm:$0xff]   ;;  %vm3636_vm0 = vmpackc.low %vm748_vm13, %vm747_vm12 }
 0x190   : > { %2372 = vmatprep.mubr.msk.bf16.mxu0 %vm3581_vm11, %v2371_v36  ;;  %2573 = vmatpush3.bf16.msra.mxu0 %v2854_v29  ;;  %v2398_v44 = vpack.c.bf16 %v3614_v37, %v3568_v34  ;;  %v3624_v9 = vpack.c.bf16 %v3103_v8, %v3538_v16  ;;  %v3628_v6 = vpack.c.bf16 %v3103_v8, %v3614_v37  ;;  %v2860_v36 = vld [vmem:[#allocation7 + $0x110] sm:$0xff]   ;;  %v527_v53 = vadd.s32 48, %v3375_v47  ;;  %vm3643_vm1 = vmpackc.low %vm742_vm15, %vm741_vm14  ;;  %v2879_v47 = vld [vmem:[#allocation7 + $0x178] sm:$0xff]  }
 0x191   : > { %2574 = vmatprep.subr.bf16.mxu0 %v2857_v39  ;;  %v582_v29 = vand.u32 7, %v528_v18  ;;  %v2867_v39 = vld [vmem:[#allocation7 + $0x160] sm:$0xff]   ;;  %vm749_vm5 = vcmp.lt.s32.totalorder %v561_v42, 7  ;;  %v2872_v18 = vld [vmem:[#allocation7 + $0x128] sm:$0xff]   ;;  %vm3686_vm14 = vcmp.lt.s32.totalorder %v533_v58, 7  ;;  %v2878_v58 = vld [vmem:[#allocation7 + $0x1b0] sm:$0xff]  }
 0x192   : > { %2535 = vmatpush3.bf16.msra.mxu1 %v2856_v23  ;;  %v575_v13 = vand.u32 7, %v527_v53  ;;  %v2866_v23 = vld [vmem:[#allocation7 + $0x198] sm:$0xff]   ;;  %v2871_v53 = vld [vmem:[#allocation7 + $0x168] sm:$0xff]   ;;  %vm3661_vm12 = vmpackc.low %vm750_vm6, %vm749_vm5 }
 0x193   : > { %2536 = vmatprep.subr.bf16.mxu1 %v2859_v51  ;;  %v2869_v51 = vld [vmem:[#allocation7 + $0x1e0] sm:$0xff]   ;;  %vm3657_vm10 = vcmp.ge.s32.totalorder %v582_v29, 1  ;;  %vm3694_vm5 = vcmp.lt.s32.totalorder %v582_v29, 7  ;;  %vm2388_vm6 = vmpackc.low %vm3424_vm4, %vm3686_vm14  ;;  %v2880_v29 = vld [vmem:[#allocation7 + $0x138] sm:$0xff]  }
 0x194   : > { %2575 = vmatpush3.bf16.msra.mxu0 %v2858_v5  ;;  %v2868_v5 = vld [vmem:[#allocation7 + $0x120] sm:$0xff]   ;;  %vm3653_vm8 = vcmp.ge.s32.totalorder %v575_v13, 1  ;;  %vm3690_vm15 = vcmp.lt.s32.totalorder %v575_v13, 7  ;;  %v2881_v13 = vld [vmem:[#allocation7 + $0x1f8] sm:$0xff]   ;;  %v2896_v33 = vld [vmem:[#allocation8 + $0x28] sm:$0xff]  }
 0x195   : > { %2357 = vmatmul.mubr.msk.bf16.gmra.mrb[4].mxu1 %vm3581_vm11, %v3477_v40  ;;  %2576 = vmatprep.subr.bf16.mxu0 %v2861_v11  ;;  %v2870_v42 = vld [vmem:[#allocation7 + $0x1a0] sm:$0xff]   ;;  %vm2361_vm13 = vmpackc.low %vm3657_vm10, %vm3653_vm8  ;;  %v2897_v38 = vld [vmem:[#allocation8 + $0x30] sm:$0xff]  }
 0x196   : > { %2537 = vmatpush3.bf16.msra.mxu1 %v2860_v36  ;;  %1678 = vmatprep.mubr.bf16.mxu1 %v3498_v50  ;;  %vm2385_vm7 = vmpackc.low %vm3694_vm5, %vm3690_vm15  ;;  %v2891_v8 = vld [vmem:[#allocation8] sm:$0xff]  }
 0x197   : > { %2375 = vmatmul.mubr.msk.bf16.gmra.mrb[12].mxu0 %vm3636_vm0, %v3490_v45  ;;  %2538 = vmatprep.subr.bf16.mxu1 %v2863_v21  ;;  %v2875_v21 = vld [vmem:[#allocation7 + $0x170] sm:$0xff]   ;;  %vm2409_vm3 = vmpackc.low %vm3926_vm2, %vm3653_vm8 }
 0x198   : > { %2378 = vmatprep.mubr.msk.bf16.mxu0 %vm3643_vm1, %v2377_v30  ;;  %2577 = vmatpush3.bf16.msra.mxu0 %v2862_v54  ;;  %v2874_v54 = vld [vmem:[#allocation7 + $0x1a8] sm:$0xff]  }
 0x199   : > { %2578 = vmatprep.subr.bf16.mxu0 %v2865_v3 }
 0x19a   : > { %2539 = vmatpush3.bf16.msra.mxu1 %v2864_v4 }
 0x19b   : > { %2540 = vmatprep.subr.bf16.mxu1 %v2867_v39  ;;  %v2883_v39 = vld [vmem:[#allocation7 + $0x200] sm:$0xff]  }
 0x19c   : > { %2579 = vmatpush3.bf16.msra.mxu0 %v2866_v23 }
 0x19d   : > { %2360 = vmatmul.mubr.msk.bf16.gmra.mrb[8].mxu1 %vm3643_vm1, %v3530_v15  ;;  %2580 = vmatprep.subr.bf16.mxu0 %v2869_v51 }
 0x19e   : > { %2541 = vmatpush3.bf16.msra.mxu1 %v2868_v5  ;;  %1686 = vmatprep.mubr.bf16.mxu1 %v3520_v0 }
 0x19f   : > { %2381 = vmatmul.mubr.msk.bf16.gmra.mrb[16].mxu0 %vm3661_vm12, %v3560_v31  ;;  %2542 = vmatprep.subr.bf16.mxu1 %v2871_v53 }
 0x1a0   : > { %2384 = vmatprep.mubr.msk.bf16.mxu0 %vm2361_vm13, %v2383_v46  ;;  %2581 = vmatpush3.bf16.msra.mxu0 %v2870_v42  ;;  %v2876_v46 = vld [vmem:[#allocation7 + $0x130] sm:$0xff]  }
 0x1a1   : > { %2582 = vmatprep.subr.bf16.mxu0 %v2873_v24 }
 0x1a2   : > { %2543 = vmatpush3.bf16.msra.mxu1 %v2872_v18 }
 0x1a3   : > { %2544 = vmatprep.subr.bf16.mxu1 %v2875_v21 }
 0x1a4   : > { %2583 = vmatpush3.bf16.msra.mxu0 %v2874_v54 }
 0x1a5   : > { %2363 = vmatmul.mubr.msk.bf16.gmra.mrb[12].mxu1 %vm2361_vm13, %v3590_v48  ;;  %2584 = vmatprep.subr.bf16.mxu0 %v2877_v32 }
 0x1a6   : > { %2545 = vmatpush3.bf16.msra.mxu1 %v2876_v46  ;;  %2390 = vmatprep.mubr.msk.bf16.mxu1 %vm2388_vm6, %v2389_v56 }
 0x1a7   : > { %2387 = vmatmul.mubr.msk.bf16.gmra.mrb[20].mxu0 %vm2385_vm7, %v3600_v27  ;;  %2546 = vmatprep.subr.bf16.mxu1 %v2879_v47 }
 0x1a8   : > { %2585 = vmatpush3.bf16.msra.mxu0 %v2878_v58  ;;  %1857 = vmatprep.mubr.bf16.mxu0 %v3430_v20  ;;  %v2885_v20 = vld [vmem:[#allocation7 + $0x210] sm:$0xff]  }
 0x1a9   : > { %2586 = vmatprep.subr.bf16.mxu0 %v2881_v13 }
 0x1aa   : > { %2547 = vmatpush3.bf16.msra.mxu1 %v2880_v29 }
 0x1ab   : > { %2660 = vmatprep.subr.bf16.mxu1 %v2883_v39 }
 0x1ac   : > { %2587 = vmatpush3.bf16.msra.mxu0 %v2882_v28 }
 0x1ad   : > { %1793 = vmatmul.mubr.bf16.vlgmr.msra.gmra.mrb[16].mxu1 %v915_v17  ;;  %2684 = vmatprep.subr.bf16.mxu0 %v2891_v8  ;;  %v2893_v17 = vld [vmem:[#allocation8 + $0x10] sm:$0xff]  }
 0x1ae   : > { %2661 = vmatpush3.bf16.msra.mxu1 %v2883_v39  ;;  %2393 = vmatprep.mubr.msk.bf16.mxu1 %vm3636_vm0, %v2392_v57 }
 0x1af   : > { %2402 = vmatmul.mubr.msk.bf16.vlgmr.msra.gmra.mrb[24].mxu0 %vm2364_vm9, %v3477_v40  ;;  %2662 = vmatprep.subr.bf16.mxu1 %v2884_v41  ;;  %v2898_v40 = vld [vmem:[#allocation8 + $0x38] sm:$0xff]  }
 0x1b0   : > { %1865 = vmatprep.mubr.bf16.mxu0 %v3498_v50  ;;  %2685 = vmatpush3.bf16.msra.mxu0 %v2891_v8 }
 0x1b2   : > { %2663 = vmatpush3.bf16.msra.mxu1 %v2884_v41 }
 0x1b3   : > { %2664 = vmatprep.subr.bf16.mxu1 %v2885_v20 }
 0x1b5   : > { %1801 = vmatmul.mubr.bf16.gmra.mrb[20].mxu1 %v916_v14  ;;  %v2892_v14 = vld [vmem:[#allocation8 + $0x8] sm:$0xff]  }
 0x1b6   : > { %2665 = vmatpush3.bf16.msra.mxu1 %v2885_v20  ;;  %2396 = vmatprep.mubr.msk.bf16.mxu1 %vm3661_vm12, %v2395_v61 }
 0x1b7   : > { %2405 = vmatmul.mubr.msk.bf16.gmra.mrb[28].mxu0 %vm3581_vm11, %v3530_v15  ;;  %2666 = vmatprep.subr.bf16.mxu1 %v2886_v62 }
 0x1b8   : > { %1873 = vmatprep.mubr.bf16.mxu0 %v3520_v0  ;;  %2686 = vmatprep.subr.bf16.mxu0 %v2892_v14 }
 0x1b9   : > { %2687 = vmatpush3.bf16.msra.mxu0 %v2892_v14 }
 0x1ba   : > { %2667 = vmatpush3.bf16.msra.mxu1 %v2886_v62  ;;  %2688 = vmatprep.subr.bf16.mxu0 %v2893_v17 }
 0x1bb   : > { %2668 = vmatprep.subr.bf16.mxu1 %v2887_v2 }
 0x1bd   : > { %1809 = vmatmul.mubr.bf16.gmra.mrb[24].mxu1 %v917_v60  ;;  %2689 = vmatpush3.bf16.msra.mxu0 %v2893_v17 }
 0x1be   : > { %2669 = vmatpush3.bf16.msra.mxu1 %v2887_v2  ;;  %2399 = vmatprep.mubr.msk.bf16.mxu1 %vm2385_vm7, %v2398_v44  ;;  %vm2421_vm7 = vmpackc.low %vm3926_vm2, %vm3690_vm15 }
 0x1bf   : > { %2408 = vmatmul.mubr.msk.bf16.gmra.mrb[32].mxu0 %vm3643_vm1, %v3590_v48  ;;  %2670 = vmatprep.subr.bf16.mxu1 %v2888_v7 }
 0x1c0   : > { %1881 = vmatprep.mubr.bf16.mxu0 %v1010_v59  ;;  %2690 = vmatprep.subr.bf16.mxu0 %v2894_v19 }
 0x1c1   : > { %2691 = vmatpush3.bf16.msra.mxu0 %v2894_v19 }
 0x1c2   : > { %2671 = vmatpush3.bf16.msra.mxu1 %v2888_v7  ;;  %2692 = vmatprep.subr.bf16.mxu0 %v2895_v26 }
 0x1c3   : > { %2672 = vmatprep.subr.bf16.mxu1 %v2889_v1 }
 0x1c5   : > { %1817 = vmatmul.mubr.bf16.gmra.mrb[28].mxu1 %v918_v63  ;;  %2693 = vmatpush3.bf16.msra.mxu0 %v2895_v26 }
 0x1c6   : > { %2673 = vmatpush3.bf16.msra.mxu1 %v2889_v1  ;;  %2676 = vmatprep.mubr.msk.bf16.mxu1 %vm2388_vm6, %v3490_v45  ;;  %v2279_v45 = vld [vmem:[%s3869_s4] ss:$0 sm:$0xff] }
 0x1c7   : > { %2411 = vmatmul.mubr.msk.bf16.gmra.mrb[36].mxu0 %vm2409_vm3, %v3624_v9  ;;  %2674 = vmatprep.subr.bf16.mxu1 %v2890_v10 }
 0x1c8   : > { %2694 = vmatprep.subr.bf16.mxu0 %v2896_v33 }
 0x1c9   : > { %2695 = vmatpush3.bf16.msra.mxu0 %v2896_v33 }
 0x1ca   : > { %2675 = vmatpush3.bf16.msra.mxu1 %v2890_v10  ;;  %2696 = vmatprep.subr.bf16.mxu0 %v2897_v38 }
 0x1cb   : > { %2708 = vmatprep.subr.bf16.mxu1 %v2891_v8 }
 0x1cd   : > { %2677 = vmatmul.mubr.msk.bf16.vlgmr.msra.gmra.mrb[32].mxu1 %vm3636_vm0, %v3560_v31  ;;  %2697 = vmatpush3.bf16.msra.mxu0 %v2897_v38 }
 0x1ce   : > { %2680 = vmatprep.mubr.msk.bf16.mxu1 %vm3661_vm12, %v3600_v27  ;;  %2716 = vmatpush3.bf16.msra.mxu1 %v2891_v8 }
 0x1cf   : > { %2709 = vmatprep.subr.bf16.mxu1 %v2892_v14  ;;  %2698 = vmatprep.subr.bf16.mxu0 %v2898_v40 }
 0x1d1   : > { %2699 = vmatpush3.bf16.msra.mxu0 %v2898_v40 }
 0x1d2   : > { %2717 = vmatpush3.bf16.msra.mxu1 %v2892_v14 }
 0x1d3   : > { %2710 = vmatprep.subr.bf16.mxu1 %v2893_v17 }
 0x1d5   : > { %2681 = vmatmul.mubr.msk.bf16.gmra.mrb[36].mxu1 %vm2421_vm7, %v3628_v6 }
 0x1d6   : > { %2718 = vmatpush3.bf16.msra.mxu1 %v2893_v17 }
 0x1d7   : > { %2711 = vmatprep.subr.bf16.mxu1 %v2894_v19 }
 0x1da   : > { %2719 = vmatpush3.bf16.msra.mxu1 %v2894_v19 }
 0x1db   : > { %2712 = vmatprep.subr.bf16.mxu1 %v2895_v26 }
 0x1de   : > { %2720 = vmatpush3.bf16.msra.mxu1 %v2895_v26 }
 0x1df   : > { %2713 = vmatprep.subr.bf16.mxu1 %v2896_v33 }
 0x1e2   : > { %2721 = vmatpush3.bf16.msra.mxu1 %v2896_v33 }
 0x1e3   : > { %2714 = vmatprep.subr.bf16.mxu1 %v2897_v38 }
 0x1e6   : > { %2722 = vmatpush3.bf16.msra.mxu1 %v2897_v38 }
 0x1e7   : > { %2715 = vmatprep.subr.bf16.mxu1 %v2898_v40 }
 0x1ea   : > { %2723 = vmatpush3.bf16.msra.mxu1 %v2898_v40 }
 0x260   : > { %v2468_v43 = vpop.f32.mrb[0].mxu1 }
 0x261   : > { %v2469_v49 = vpop.f32.mrb[1].mxu1 }
 0x262   : > { %v2470_v50 = vadd.f32 %v2469_v49, %v2468_v43  ;;  %v2508_v56 = vpop.f32.mrb[8].mxu0  ;;  %v2471_v0 = vpop.f32.mrb[2].mxu1 }
 0x263   : > { %v2509_v15 = vpop.f32.mrb[9].mxu0  ;;  %v2472_v12 = vpop.f32.mrb[3].mxu1 }
 0x264   : > { %v1665_v25 = vadd.f32 %v2470_v50, %v2279_v45  ;;  %v2510_v31 = vadd.f32 %v2509_v15, %v2508_v56  ;;  %v2473_v34 = vadd.f32 %v2472_v12, %v2471_v0  ;;  %v2511_v35 = vpop.f32.mrb[10].mxu0 }
 0x265   : > { %v2512_v48 = vpop.f32.mrb[11].mxu0 }
 0x266   : > { %v1730_v52 = vadd.f32 %v2510_v31, %v1665_v25  ;;  %v1668_v27 = vadd.f32 %v2473_v34, %v2279_v45  ;;  %v2513_v57 = vadd.f32 %v2512_v48, %v2511_v35 }
 0x268   : > { %v1733_v61 = vadd.f32 %v2513_v57, %v1668_v27  ;;  %v2474_v60 = vpop.f32.mrb[4].mxu1 }
 0x269   : > { %v2475_v37 = vpop.f32.mrb[5].mxu1 }
 0x26a   : > { %v2476_v63 = vadd.f32 %v2475_v37, %v2474_v60  ;;  %v2514_v44 = vpop.f32.mrb[12].mxu0  ;;  %v2477_v9 = vpop.f32.mrb[6].mxu1 }
 0x26b   : > { %v2515_v6 = vpop.f32.mrb[13].mxu0  ;;  %v2478_v22 = vpop.f32.mrb[7].mxu1 }
 0x26c   : > { %v1673_v55 = vadd.f32 %v2476_v63, %v2279_v45  ;;  %v2516_v23 = vadd.f32 %v2515_v6, %v2514_v44  ;;  %v2479_v51 = vadd.f32 %v2478_v22, %v2477_v9  ;;  %v2517_v5 = vpop.f32.mrb[14].mxu0 }
 0x26d   : > { %v2518_v11 = vpop.f32.mrb[15].mxu0 }
 0x26e   : > { %v1738_v36 = vadd.f32 %v2516_v23, %v1673_v55  ;;  %v1676_v53 = vadd.f32 %v2479_v51, %v2279_v45  ;;  %v2519_v30 = vadd.f32 %v2518_v11, %v2517_v5 }
 0x270   : > { %v1741_v42 = vadd.f32 %v2519_v30, %v1676_v53  ;;  %v2480_v24 = vpop.f32.mrb[8].mxu1 }
 0x271   : > { %v2481_v18 = vpop.f32.mrb[9].mxu1 }
 0x272   : > { %v2482_v21 = vadd.f32 %v2481_v18, %v2480_v24  ;;  %v2520_v54 = vpop.f32.mrb[16].mxu0  ;;  %v2483_v3 = vpop.f32.mrb[10].mxu1 }
 0x273   : > { %v2521_v4 = vpop.f32.mrb[17].mxu0  ;;  %v2484_v16 = vpop.f32.mrb[11].mxu1 }
 0x274   : > { %v1681_v32 = vadd.f32 %v2482_v21, %v2279_v45  ;;  %v2522_v46 = vadd.f32 %v2521_v4, %v2520_v54  ;;  %v2485_v47 = vadd.f32 %v2484_v16, %v2483_v3  ;;  %v2523_v58 = vpop.f32.mrb[18].mxu0 }
 0x275   : > { %v2524_v13 = vpop.f32.mrb[19].mxu0 }
 0x276   : > { %v1746_v29 = vadd.f32 %v2522_v46, %v1681_v32  ;;  %v1684_v39 = vadd.f32 %v2485_v47, %v2279_v45  ;;  %v2525_v28 = vadd.f32 %v2524_v13, %v2523_v58 }
 0x278   : > { %v1749_v41 = vadd.f32 %v2525_v28, %v1684_v39  ;;  %v2486_v20 = vpop.f32.mrb[12].mxu1 }
 0x279   : > { %v2487_v62 = vpop.f32.mrb[13].mxu1 }
 0x27a   : > { %v2488_v2 = vadd.f32 %v2487_v62, %v2486_v20  ;;  %v2526_v7 = vpop.f32.mrb[20].mxu0  ;;  %v2489_v59 = vpop.f32.mrb[14].mxu1 }
 0x27b   : > { %v2527_v1 = vpop.f32.mrb[21].mxu0  ;;  %v2490_v10 = vpop.f32.mrb[15].mxu1 }
 0x27c   : > { %v1689_v8 = vadd.f32 %v2488_v2, %v2279_v45  ;;  %v2528_v14 = vadd.f32 %v2527_v1, %v2526_v7  ;;  %v2491_v17 = vadd.f32 %v2490_v10, %v2489_v59  ;;  %v2529_v19 = vpop.f32.mrb[22].mxu0 }
 0x27d   : > { %v2530_v26 = vpop.f32.mrb[23].mxu0 }
 0x27e   : > { %v1754_v33 = vadd.f32 %v2528_v14, %v1689_v8  ;;  %v1692_v38 = vadd.f32 %v2491_v17, %v2279_v45  ;;  %v2531_v40 = vadd.f32 %v2530_v26, %v2529_v19 }
 0x280   : > { %v1757_v43 = vadd.f32 %v2531_v40, %v1692_v38  ;;  %v2548_v49 = vpop.f32.mrb[16].mxu1 }
 0x281   : > { %v2549_v50 = vpop.f32.mrb[17].mxu1 }
 0x282   : > { %v2550_v56 = vadd.f32 %v2549_v50, %v2548_v49  ;;  %v2588_v0 = vpop.f32.mrb[24].mxu0  ;;  %v2551_v15 = vpop.f32.mrb[18].mxu1 }
 0x283   : > { %v2589_v12 = vpop.f32.mrb[25].mxu0  ;;  %v2552_v25 = vpop.f32.mrb[19].mxu1 }
 0x284   : > { %v1795_v31 = vadd.f32 %v2550_v56, %v1730_v52  ;;  %v2590_v34 = vadd.f32 %v2589_v12, %v2588_v0  ;;  %v2553_v35 = vadd.f32 %v2552_v25, %v2551_v15  ;;  %v2591_v48 = vpop.f32.mrb[26].mxu0 }
 0x285   : > { %v2592_v27 = vpop.f32.mrb[27].mxu0 }
 0x286   : > { %v1798_v57 = vadd.f32 %v2553_v35, %v1733_v61  ;;  %v2593_v60 = vadd.f32 %v2592_v27, %v2591_v48  ;;  %v1860_v37 = vadd.f32 %v2590_v34, %v1795_v31 }
 0x288   : > { %v2554_v63 = vpop.f32.mrb[20].mxu1  ;;  %v1863_v44 = vadd.f32 %v2593_v60, %v1798_v57 }
 0x289   : > { %v2555_v45 = vpop.f32.mrb[21].mxu1 }
 0x28a   : > { %v2556_v9 = vadd.f32 %v2555_v45, %v2554_v63  ;;  %v2594_v6 = vpop.f32.mrb[28].mxu0  ;;  %v2557_v22 = vpop.f32.mrb[22].mxu1 }
 0x28b   : > { %v2595_v55 = vpop.f32.mrb[29].mxu0  ;;  %v2558_v23 = vpop.f32.mrb[23].mxu1 }
 0x28c   : > { %v1803_v51 = vadd.f32 %v2556_v9, %v1738_v36  ;;  %v2596_v5 = vadd.f32 %v2595_v55, %v2594_v6  ;;  %v2559_v11 = vadd.f32 %v2558_v23, %v2557_v22  ;;  %v2597_v53 = vpop.f32.mrb[30].mxu0 }
 0x28d   : > { %v2598_v52 = vpop.f32.mrb[31].mxu0 }
 0x28e   : > { %v1806_v30 = vadd.f32 %v2559_v11, %v1741_v42  ;;  %v2599_v24 = vadd.f32 %v2598_v52, %v2597_v53  ;;  %v1868_v18 = vadd.f32 %v2596_v5, %v1803_v51 }
 0x290   : > { %v2560_v21 = vpop.f32.mrb[24].mxu1  ;;  %v1871_v61 = vadd.f32 %v2599_v24, %v1806_v30  ;;  %v2424_v30 = vld [vmem:[%s3871_s6] ss:$0 sm:$0xff]  ;;  %v2903_v24 = vld [vmem:[%s3357_s20 + $0x8] sm:$0xff]  }
 0x291   : > { %v2561_v54 = vpop.f32.mrb[25].mxu1 }
 0x292   : > { %v2562_v3 = vadd.f32 %v2561_v54, %v2560_v21  ;;  %v2600_v4 = vpop.f32.mrb[32].mxu0  ;;  %v2563_v16 = vpop.f32.mrb[26].mxu1  ;;  %v2904_v21 = vld [vmem:[%s3357_s20] sm:$0xff]  }
 0x293   : > { %v2601_v32 = vpop.f32.mrb[33].mxu0  ;;  %v2564_v46 = vpop.f32.mrb[27].mxu1 }
 0x294   : > { %v1811_v47 = vadd.f32 %v2562_v3, %v1746_v29  ;;  %v2602_v58 = vadd.f32 %v2601_v32, %v2600_v4  ;;  %v2565_v13 = vadd.f32 %v2564_v46, %v2563_v16  ;;  %v2603_v39 = vpop.f32.mrb[34].mxu0  ;;  %v1986_v16 = vunpack.c.h.bf16 %v2903_v24 }
 0x295   : > { %v2604_v36 = vpop.f32.mrb[35].mxu0  ;;  %v1984_v32 = vunpack.c.h.bf16 %v2904_v21 }
 0x296   : > { %v1814_v28 = vadd.f32 %v2565_v13, %v1749_v41  ;;  %v2605_v20 = vadd.f32 %v2604_v36, %v2603_v39  ;;  %v1876_v62 = vadd.f32 %v2602_v58, %v1811_v47 }
 0x298   : > { %v2566_v2 = vpop.f32.mrb[28].mxu1  ;;  %v1879_v42 = vadd.f32 %v2605_v20, %v1814_v28 }
 0x299   : > { %v2567_v7 = vpop.f32.mrb[29].mxu1 }
 0x29a   : > { %v2568_v59 = vadd.f32 %v2567_v7, %v2566_v2  ;;  %v2606_v1 = vpop.f32.mrb[36].mxu0  ;;  %v2569_v10 = vpop.f32.mrb[30].mxu1 }
 0x29b   : > { %v2607_v8 = vpop.f32.mrb[37].mxu0  ;;  %v2570_v14 = vpop.f32.mrb[31].mxu1 }
 0x29c   : > { %v1819_v17 = vadd.f32 %v2568_v59, %v1754_v33  ;;  %v2608_v19 = vadd.f32 %v2607_v8, %v2606_v1  ;;  %v2571_v26 = vadd.f32 %v2570_v14, %v2569_v10  ;;  %v2609_v38 = vpop.f32.mrb[38].mxu0  ;;  %v2905_v59 = vld [vmem:[%s3357_s20 + $0x18] sm:$0xff]   ;;  %v2906_v14 = vld [vmem:[%s3357_s20 + $0x10] sm:$0xff]   ;;  %s3021_s20 = scalar_lea.vmem %s3812_s21, 1024 }
 0x29d   : > { %v2610_v29 = vpop.f32.mrb[39].mxu0  ;;  %v1989_v1 = vunpack.c.l.bf16 %v2905_v59  ;;  %p3022_p10 = scmp.ne.s32.totalorder %s3812_s21, %s3021_s20  ;;  %p3029_p1 = scmp.lt.s32.totalorder %s3027_s13, %s3021_s20 }
 0x29e   : > { %v1822_v40 = vadd.f32 %v2571_v26, %v1757_v43  ;;  %v2611_v49 = vadd.f32 %v2610_v29, %v2609_v38  ;;  %v1884_v50 = vadd.f32 %v2608_v19, %v1819_v17  ;;  %v1987_v17 = vunpack.c.l.bf16 %v2906_v14 }
 0x29f   : > { %v1990_v38 = vunpack.c.h.bf16 %v2905_v59  ;;  %p3023_p3 = pnand %p3022_p10, %p3302_p5  ;;  %p3030_p2 = por %p3029_p1, %p3028_p12 }
 0x2a0   : > { %v2678_v56 = vpop.f32.mrb[32].mxu1  ;;  %v1887_v41 = vadd.f32 %v2611_v49, %v1822_v40  ;;  %v1988_v49 = vunpack.c.h.bf16 %v2906_v14 }
 0x2a1   : > { %v1933_v0 = vadd.f32 %v2678_v56, %v1868_v18  ;;  %v1924_v15 = vpop.f32.mrb[33].mxu1  ;;  %v1985_v18 = vunpack.c.l.bf16 %v2903_v24  ;;  %p3024_p7 = pneg %p3023_p3 }
 0x2a2   : > { %v1925_v12 = vadd.f32 %v1924_v15, %v1860_v37  ;;  %v2679_v25 = vpop.f32.mrb[34].mxu1 }
 0x2a3   : > { %v1936_v31 = vadd.f32 %v2679_v25, %v1871_v61  ;;  %v1927_v34 = vpop.f32.mrb[35].mxu1  ;;  %v1957_v48 = vmax.f32 %v1933_v0, 0.0  ;;  %v1983_v61 = vunpack.c.l.bf16 %v2904_v21  ;;  %p3031_p4 = pnand %p3030_p2, %p3024_p7 }
 0x2a4   : > { %v1928_v35 = vadd.f32 %v1927_v34, %v1863_v44  ;;  %v1955_v57 = vmax.f32 %v1925_v12, 0.0 }
 0x2a5   : > { %v1958_v27 = vmax.f32 %v1936_v31, 0.0 }
 0x2a6   : > { %v1956_v33 = vmax.f32 %v1928_v35, 0.0 }
 0x2a7   : > { %v1964_v60 = vpack.c.bf16 %v1958_v27, %v1957_v48 }
 0x2a8   : > { %v1963_v63 = vpack.c.bf16 %v1956_v33, %v1955_v57  ;;  %v2682_v45 = vpop.f32.mrb[36].mxu1 }
 0x2a9   : > { %v1949_v9 = vadd.f32 %v2682_v45, %v1884_v50  ;;  %v1940_v43 = vpop.f32.mrb[37].mxu1 }
 0x2aa   : > { %v1941_v6 = vadd.f32 %v1940_v43, %v1876_v62  ;;  %v2683_v22 = vpop.f32.mrb[38].mxu1  ;;  %2700 = vmatprep.mubr.bf16.mxu0 %v1963_v63 }
 0x2ab   : > { %v1952_v55 = vadd.f32 %v2683_v22, %v1887_v41  ;;  %v1943_v37 = vpop.f32.mrb[39].mxu1  ;;  %2701 = vmatmul.mubr.bf16.vlgmr.msra.gmra.mrb[40].mxu0 %v1964_v60  ;;  %v1961_v44 = vmax.f32 %v1949_v9, 0.0 }
 0x2ac   : > { %v1944_v23 = vadd.f32 %v1943_v37, %v1879_v42  ;;  %v1959_v5 = vmax.f32 %v1941_v6, 0.0 }
 0x2ad   : > { %v1962_v51 = vmax.f32 %v1952_v55, 0.0 }
 0x2ae   : > { %v1960_v11 = vmax.f32 %v1944_v23, 0.0 }
 0x2af   : > { %v1966_v53 = vpack.c.bf16 %v1962_v51, %v1961_v44 }
 0x2b0   : > { %v1965_v52 = vpack.c.bf16 %v1960_v11, %v1959_v5 }
 0x2b2   : > { %2704 = vmatprep.mubr.bf16.mxu1 %v1965_v52 }
 0x2b3   : > { %2705 = vmatmul.mubr.bf16.vlgmr.msra.gmra.mrb[40].mxu1 %v1966_v53 }
 0x37e   : > { %v2702_v54 = vpop.f32.mrb[40].mxu0 }
 0x37f   : > { %v2089_v3 = vadd.f32 %v2702_v54, %v2424_v30  ;;  %v2080_v4 = vpop.f32.mrb[41].mxu0 }
 0x380   : > { %v2081_v46 = vadd.f32 %v2424_v30, %v2080_v4  ;;  %v2703_v47 = vpop.f32.mrb[42].mxu0 }
 0x381   : > { %v2113_v58 = vadd.f32 %v2089_v3, %v1985_v18  ;;  %v2092_v13 = vadd.f32 %v2703_v47, %v2424_v30  ;;  %v2083_v39 = vpop.f32.mrb[43].mxu0 }
 0x382   : > { %v2111_v36 = vadd.f32 %v2081_v46, %v1983_v61  ;;  %v2084_v28 = vadd.f32 %v2424_v30, %v2083_v39 }
 0x383   : > { %v2121_v20 = vmax.f32 %v2113_v58, 0.0  ;;  %v2114_v62 = vadd.f32 %v2092_v13, %v1986_v16 }
 0x384   : > { %v2119_v2 = vmax.f32 %v2111_v36, 0.0  ;;  %v2112_v42 = vadd.f32 %v2084_v28, %v1984_v32 }
 0x385   : > { %2129 = vst [vmem:[%s3802_s12 + $0x10] sm:$0xff] %v2121_v20  ;;  %v2122_v7 = vmax.f32 %v2114_v62, 0.0 }
 0x386   : > { %2127 = vst [vmem:[%s3802_s12] sm:$0xff] %v2119_v2  ;;  %v2120_v10 = vmax.f32 %v2112_v42, 0.0  ;;  %v2706_v8 = vpop.f32.mrb[40].mxu1 }
 0x387   : > { %2130 = vst [vmem:[%s3802_s12 + $0x18] sm:$0xff] %v2122_v7  ;;  %v2105_v19 = vadd.f32 %v2706_v8, %v2424_v30  ;;  %v2096_v26 = vpop.f32.mrb[41].mxu1 }
 0x388   : > { %2128 = vst [vmem:[%s3802_s12 + $0x8] sm:$0xff] %v2120_v10  ;;  %v2097_v29 = vadd.f32 %v2424_v30, %v2096_v26  ;;  %v2707_v40 = vpop.f32.mrb[42].mxu1 }
 0x389   : > { %v2117_v50 = vadd.f32 %v2105_v19, %v1989_v1  ;;  %v2108_v56 = vadd.f32 %v2707_v40, %v2424_v30  ;;  %v2099_v41 = vpop.f32.mrb[43].mxu1 }
 0x38a   : > { %v2115_v0 = vadd.f32 %v2097_v29, %v1987_v17  ;;  %v2100_v15 = vadd.f32 %v2424_v30, %v2099_v41 }
 0x38b   : > { %v2125_v12 = vmax.f32 %v2117_v50, 0.0  ;;  %v2118_v25 = vadd.f32 %v2108_v56, %v1990_v38 }
 0x38c   : > { %v2123_v31 = vmax.f32 %v2115_v0, 0.0  ;;  %v2116_v34 = vadd.f32 %v2100_v15, %v1988_v49 }
 0x38d   : > { %2133 = vst [vmem:[%s3802_s12 + $0x30] sm:$0xff] %v2125_v12  ;;  %v2126_v35 = vmax.f32 %v2118_v25, 0.0 }
 0x38e   : > { %2131 = vst [vmem:[%s3802_s12 + $0x20] sm:$0xff] %v2123_v31  ;;  %v2124_v48 = vmax.f32 %v2116_v34, 0.0 }
 0x38f   : > { %2134 = vst [vmem:[%s3802_s12 + $0x38] sm:$0xff] %v2126_v35 }
 0x390   : > { %2132 = vst [vmem:[%s3802_s12 + $0x28] sm:$0xff] %v2124_v48 }
 0x391   : > { %3034 = shalt.err (!%p3031_p4)
}
 0x392   : > { %s3035_s15 = scalar_lea.hbm %s3818_s11, 1024  ;;  %s3039_s8 = scalar_lea.hbm %s3872_s7, 2048 }
 0x393   : > { %p3036_p9 = scmp.ne.s32.totalorder %s3818_s11, %s3035_s15  ;;  %p3040_p8 = scmp.lt.u32.totalorder %s3818_s11, %s3872_s7 }
 0x394   : > { %p3041_p13 = scmp.lt.u32.totalorder %s3039_s8, %s3035_s15  ;;  %p3043_p10 = scmp.lt.u32.totalorder %s3035_s15, %s3818_s11 }
 0x395   : > { %p3037_p0 = pnand %p3036_p9, %p3302_p5 }
 0x396   : > { %p3042_p6 = por %p3041_p13, %p3040_p8 }
 0x397   : > { %p3038_p11 = pneg %p3037_p0 }
 0x398   : > { %p3044_p3 = por %p3043_p10, %p3042_p6 }
 0x39a   : > { %p3045_p7 = pnand %p3044_p3, %p3038_p11 }
 0x39c   : > { %3048 = shalt.err (!%p3045_p7)
}
 0x39d   : > { %s3106_s29 = smov 128   ;;  %s3107_s23 = smov 8  }
 0x39e   : > { %2738 = dma.vmem_to_hbm [thread:$0]  (%p3302_p5), %s3812_s21, 1024, %s3818_s11, %s2136_s28, %s3106_s29, %s3106_s29, %s3107_s23  }
 0x39f PF: > { %s3927_s20 = sld [smem:[#allocation15_spill]]  ;;  %s2164_s30 = sand.u32 1, %s3083_s24  }
 0x3a0   : > { %p3929_p1 = scmp.ge.s32.totalorder %s3095_s27, 2  ;;  %s2165_s9 = scalar_lea.sflag [#allocation4], %s2164_s30 }
 0x3a5   : > { %p3928_p12 = scmp.ne.s32.totalorder %s3927_s20, 0 }
 0x3a7   : > { %p2755_p2 = pnand %p3929_p1, %p3928_p12 }
 0x3a9   : > { %3078 = dma.done.wait (!%p2755_p2), %s2165_s9, 1024  }
 0x3aa   : > { %3080 = vsyncadd (!%p2755_p2), %s2165_s9, 4294966272  ;;  %p22_p4 = scmp.ge.s32.totalorder %s3288_s22, 4   ;;  %s3930_s24 = smov %s3087_s25 }
 0x3ab   : > { %s3931_s25 = smov %s3091_s26  ;;  %s3932_s26 = smov %s3298_s18 }
 0x3ac   : > { %s3933_s27 = smov %s3288_s22  ;;  %24 = sbr.rel (!%p22_p4) target bundleno = 7 (0x7), region = 105 }
 0x3b3   :  { %2170 = vsyncpa [#allocation3], 1 }
 0x3b4   :  { %2172 = vsyncpa [#allocation3 + $0x1], 1 }
 0x3b5   :  { %2173 = vsyncpa [#allocation6], 1 }
 0x3b6   :  { %2174 = vsyncpa [#allocation9], 1 }
 0x3b7   :  { %2175 = vsyncpa [#allocation4], 1 }
 0x3b8   :  { %2177 = vsyncpa [#allocation4 + $0x1], 1 }

// kernel: tpu_custom_call.1
= control target key start
LH: loop header
LB: loop body
LE: loop exit
PB: predicated region body
PF: predicated region fallthrough
CT: control target
= control target key end

     0   :  { %12 = vsyncpa [#allocation3], 0  ;;  %s3865_s0 = inlined_call_operand.hbm [shape: bf16[128,128], index: 0, kind: input, shape index: {}]   ;;  %s3866_s1 = inlined_call_operand.hbm [shape: bf16[128,128], index: 1, kind: input, shape index: {}]   ;;  %s3867_s2 = inlined_call_operand.vmem [shape: f32[1,128], index: 2, kind: input, shape index: {}]   ;;  %s3868_s3 = inlined_call_operand.hbm [shape: bf16[1152,128], index: 3, kind: input, shape index: {}]   ;;  %s3869_s4 = inlined_call_operand.vmem [shape: f32[1,128], index: 4, kind: input, shape index: {}]   ;;  %s3870_s5 = inlined_call_operand.hbm [shape: bf16[128,128], index: 5, kind: input, shape index: {}]   ;;  %s3871_s6 = inlined_call_operand.vmem [shape: f32[1,128], index: 6, kind: input, shape index: {}]   ;;  %s3872_s7 = inlined_call_operand.hbm [shape: f32[128,128], index: 7, kind: output, shape index: {}]  }
   0x1   :  { %14 = vsyncpa [#allocation3 + $0x1], 0 }
   0x2   :  { %15 = vsyncpa [#allocation6], 0 }
   0x3   :  { %16 = vsyncpa [#allocation9], 0 }
   0x4   :  { %17 = vsyncpa [#allocation4], 0 }
   0x5   :  { %19 = vsyncpa [#allocation4 + $0x1], 0  ;;  %s3148_s24 = smov 0   ;;  %s3150_s25 = smov 0  }
   0x6   :  { %s3152_s26 = smov 0   ;;  %s3154_s27 = smov 0  }
   0x7 LB: > { %s3169_s28 = sadd.s32 4294967295, %s3095_s27   ;;  %s2251_s29 = sadd.s32 4294967294, %s3095_s27   ;;  %s3095_s27 = sphi %s3154_s27, %s3933_s27   ;;  %s3091_s26 = sphi %s3152_s26, %s3932_s26   ;;  %s3087_s25 = sphi %s3150_s25, %s3931_s25   ;;  %s3083_s24 = sphi %s3148_s24, %s3930_s24  }
   0x8   : > { %p45_p0 = scmp.ne.s32.totalorder %s3087_s25, %s3083_s24  ;;  %p3873_p1 = scmp.eq.s32.totalorder %s3169_s28, 0 }
   0x9   : > { %p201_p3 = scmp.eq.s32.totalorder %s2251_s29, 1  ;;  %p2252_p5 = scmp.ge.s32.totalorder %s3095_s27, 1 }
   0xa   : > { %p3178_p4 = por %p3873_p1, %p45_p0  ;;  %p208_p7 = scmp.lt.s32.totalorder %s3095_s27, 3 }
   0xb   : > { %p3183_p6 = por %p201_p3, %p45_p0  ;;  %s3097_s10 = smov [#allocation5]  }
   0xc   : > { %s3879_s30 = scalar_select %p3178_p4, 1, 0 }
   0xd   : > { %s3880_s8 = scalar_select %p3183_p6, 1, 0 }
   0xe   : > { %p3188_p8 = pnand %p2252_p5, %p208_p7  ;;  %s220_s11 = sshll.u32 %s3097_s10, 4  ;;  %s3192_s11 = int_to_ptr.vmem [resolvable:$true] %s220_s11 }
   0xf   : > { %3881 = sst [smem:[#allocation15_spill]] %s3880_s8  ;;  %s3098_s13 = smov [#allocation7]  }
  0x10   : > { %s3882_s9 = scalar_select %p3188_p8, 1, 0 }
  0x11   : > { %p2740_p9 = pneg %p3188_p8  ;;  %s236_s14 = sshll.u32 %s3098_s13, 4  ;;  %s3203_s14 = int_to_ptr.vmem [resolvable:$true] %s236_s14 }
  0x12   : > { %s3099_s15 = smov [#allocation8]   ;;  %s2907_s19 = scalar_lea.hbm %s3866_s1, 1024 }
  0x13   : > { %p3199_p11 = pnand %p2740_p9, %p3873_p1  ;;  %s3205_s16 = sshll.u32 %s3099_s15, 4  ;;  %s253_s16 = int_to_ptr.vmem [resolvable:$true] %s3205_s16 }
  0x14   : > { %p2908_p12 = scmp.ne.s32.totalorder %s3866_s1, %s2907_s19  ;;  %p2914_p5 = scmp.lt.u32.totalorder %s2907_s19, %s3866_s1 }
  0x15   : > { %p3215_p13 = pneg %p3199_p11 }
  0x17   : > { %p2910_p0 = pnand %p3215_p13, %p2908_p12 }
  0x19   : > { %p2911_p3 = pneg %p2910_p0 }
  0x1b   : > { %p2916_p7 = pnand %p2914_p5, %p2911_p3 }
  0x1d   : > { %2919 = shalt.err (!%p2916_p7)
}
  0x1e   : > { %s2920_s10 = scalar_lea.vmem %s3192_s11, 1024  ;;  %p2928_p2 = scmp.lt.s32.totalorder %s3192_s11, %s3192_s11 }
  0x1f   : > { %p2921_p9 = scmp.ne.s32.totalorder %s3192_s11, %s2920_s10  ;;  %p2929_p6 = scmp.lt.s32.totalorder %s2920_s10, %s2920_s10 }
  0x21   : > { %p2923_p10 = pnand %p2921_p9, %p3215_p13  ;;  %p2930_p12 = por %p2929_p6, %p2928_p2 }
  0x23   : > { %p2924_p1 = pneg %p2923_p10 }
  0x25   : > { %p2931_p0 = pnand %p2930_p12, %p2924_p1 }
  0x27   : > { %2934 = shalt.err (!%p2931_p0)
}
  0x28   : > { %s3100_s13 = smov 64   ;;  %s3101_s15 = smov 4  }
  0x29   : > { %2743 = dma.hbm_to_vmem [thread:$0]  (!%p3199_p11), %s3866_s1, 1024, %s3192_s11, [#allocation6], %s3100_s13, %s3100_s13, %s3101_s15  }
  0x2a   : > { %s2935_s21 = scalar_lea.hbm %s3868_s3, 9216 }
  0x2b   : > { %p2936_p1 = scmp.ne.s32.totalorder %s3868_s3, %s2935_s21  ;;  %p2942_p10 = scmp.lt.u32.totalorder %s2935_s21, %s3868_s3 }
  0x2d   : > { %p2938_p2 = pnand %p2936_p1, %p3215_p13 }
  0x2f   : > { %p2939_p6 = pneg %p2938_p2 }
  0x31   : > { %p2944_p3 = pnand %p2942_p10, %p2939_p6 }
  0x33   : > { %2947 = shalt.err (!%p2944_p3)
}
  0x34   : > { %s2948_s11 = scalar_lea.vmem %s3203_s14, 9216  ;;  %p2956_p12 = scmp.lt.s32.totalorder %s3203_s14, %s3203_s14 }
  0x35   : > { %p2949_p5 = scmp.ne.s32.totalorder %s3203_s14, %s2948_s11  ;;  %p2957_p0 = scmp.lt.s32.totalorder %s2948_s11, %s2948_s11 }
  0x37   : > { %p2951_p7 = pnand %p2949_p5, %p3215_p13  ;;  %p2958_p1 = por %p2957_p0, %p2956_p12 }
  0x39   : > { %p2952_p9 = pneg %p2951_p7 }
  0x3b   : > { %p2959_p2 = pnand %p2958_p1, %p2952_p9 }
  0x3d   : > { %2962 = shalt.err (!%p2959_p2)
}
  0x3e   : > { %2746 = dma.hbm_to_vmem [thread:$0]  (!%p3199_p11), %s3868_s3, 9216, %s3203_s14, [#allocation6], %s3100_s13, %s3100_s13, %s3101_s15  }
  0x3f   : > { %s2963_s20 = scalar_lea.hbm %s3870_s5, 1024 }
  0x40   : > { %p2964_p6 = scmp.ne.s32.totalorder %s3870_s5, %s2963_s20  ;;  %p2970_p5 = scmp.lt.u32.totalorder %s2963_s20, %s3870_s5 }
  0x42   : > { %p2966_p10 = pnand %p2964_p6, %p3215_p13 }
  0x44   : > { %p2967_p3 = pneg %p2966_p10 }
  0x46   : > { %p2972_p7 = pnand %p2970_p5, %p2967_p3 }
  0x48   : > { %2975 = shalt.err (!%p2972_p7)
}
  0x49   : > { %s2976_s11 = scalar_lea.vmem %s253_s16, 1024  ;;  %p2984_p1 = scmp.lt.s32.totalorder %s253_s16, %s253_s16 }
  0x4a   : > { %p2977_p9 = scmp.ne.s32.totalorder %s253_s16, %s2976_s11  ;;  %p2985_p2 = scmp.lt.s32.totalorder %s2976_s11, %s2976_s11 }
  0x4c   : > { %p2979_p12 = pnand %p2977_p9, %p3215_p13  ;;  %p2986_p4 = por %p2985_p2, %p2984_p1 }
  0x4e   : > { %p2980_p0 = pneg %p2979_p12 }
  0x50   : > { %p2987_p8 = pnand %p2986_p4, %p2980_p0 }
  0x52   : > { %2990 = shalt.err (!%p2987_p8)
}
  0x53   : > { %2749 = dma.hbm_to_vmem [thread:$0]  (!%p3199_p11), %s3870_s5, 1024, %s253_s16, [#allocation9], %s3100_s13, %s3100_s13, %s3101_s15  }
  0x54   : > { %s3288_s22 = sadd.s32 1, %s3095_s27   ;;  %s32_s17 = sadd.s32 1, %s3091_s26 }
  0x55   : > { %s29_s12 = ssub.s32 %s3095_s27, %s3288_s22  ;;  %p39_p8 = scmp.ne.s32.totalorder %s3091_s26, %s3087_s25 }
  0x56   : > { %p30_p4 = scmp.eq.s32.totalorder %s29_s12, 0  ;;  %p40_p13 = scmp.eq.s32.totalorder %s3095_s27, 0 }
  0x57   : > { %p2761_p6 = scmp.lt.s32.totalorder %s3095_s27, 2  ;;  %p3885_p3 = scmp.eq.s32.totalorder %s3169_s28, 1 }
  0x58   : > { %s3298_s18 = scalar_select %p30_p4, %s3091_s26, %s32_s17  }
  0x59   : > { %p41_p10 = por %p40_p13, %p39_p8  ;;  %p3302_p5 = por %p3885_p3, %p39_p8 }
  0x5a   : > { %s269_s20 = sand.u32 1, %s3091_s26   ;;  %s2438_s21 = sshll.u32 %s3095_s27, 9 }
  0x5b   : > { %s2257_s16 = sshll.u32 %s269_s20, 5  ;;  %s3311_s10 = scalar_lea.hbm %s3865_s0, %s2438_s21 }
  0x5c   : > { %s273_s11 = scalar_lea.vmem [#allocation2], %s2257_s16  ;;  %p3313_p11 = pnand %p2761_p6, %p41_p10 }
  0x5d   : > { %s280_s14 = sshll.u32 %s273_s11, 4  ;;  %s3319_s12 = scalar_lea.sflag [#allocation3], %s269_s20  ;;  %s3317_s14 = int_to_ptr.vmem [resolvable:$true] %s280_s14 }
  0x5e   : > { %s2991_s17 = scalar_lea.hbm %s3311_s10, 512  ;;  %p2993_p9 = pneg %p3313_p11 }
  0x5f   : > { %p2992_p7 = scmp.ne.s32.totalorder %s3311_s10, %s2991_s17  ;;  %s2996_s23 = scalar_lea.hbm %s3865_s0, 1024 }
  0x60   : > { %p2997_p1 = scmp.lt.u32.totalorder %s3311_s10, %s3865_s0  ;;  %p2998_p2 = scmp.lt.u32.totalorder %s2996_s23, %s2991_s17 }
  0x61   : > { %p2994_p12 = pnand %p2993_p9, %p2992_p7  ;;  %p3000_p8 = scmp.lt.u32.totalorder %s2991_s17, %s3311_s10 }
  0x62   : > { %p2999_p4 = por %p2998_p2, %p2997_p1 }
  0x63   : > { %p2995_p0 = pneg %p2994_p12 }
  0x64   : > { %p3001_p13 = por %p3000_p8, %p2999_p4 }
  0x66   : > { %p3002_p6 = pnand %p3001_p13, %p2995_p0 }
  0x68   : > { %3005 = shalt.err (!%p3002_p6)
}
  0x69   : > { %s3006_s20 = scalar_lea.vmem %s3317_s14, 512  ;;  %s3102_s21 = smov [#allocation2]  }
  0x6a   : > { %p3007_p10 = scmp.ne.s32.totalorder %s3317_s14, %s3006_s20  ;;  %s3011_s16 = sshll.u32 %s3102_s21, 4  ;;  %s3012_s16 = int_to_ptr.vmem [resolvable:$false] %s3011_s16 }
  0x6b   : > { %s3013_s29 = scalar_lea.vmem %s3012_s16, 1024  ;;  %p3014_p12 = scmp.lt.s32.totalorder %s3317_s14, %s3012_s16 }
  0x6c   : > { %p3009_p3 = pnand %p3007_p10, %p2993_p9  ;;  %p3015_p1 = scmp.lt.s32.totalorder %s3013_s29, %s3006_s20 }
  0x6e   : > { %p3010_p7 = pneg %p3009_p3  ;;  %p3016_p2 = por %p3015_p1, %p3014_p12 }
  0x70   : > { %p3017_p4 = pnand %p3016_p2, %p3010_p7 }
  0x72   : > { %3020 = shalt.err (!%p3017_p4)
}
  0x73   : > { %2753 = dma.hbm_to_vmem [thread:$0]  (!%p3313_p11), %s3311_s10, 512, %s3317_s14, %s3319_s12, %s3100_s13, %s3100_s13, %s3101_s15  }
  0x74   : > { %p3888_p9 = scmp.ne.s32.totalorder %s3882_s9, 0 }
  0x75   : > { %s3353_s17 = sand.u32 (!%p3888_p9), 1, %s3087_s25   ;;  %p3889_p0 = scmp.ne.s32.totalorder (!%p3888_p9), %s3879_s30, 0 }
  0x76   : > { %292 = sbr.rel (%p3888_p9) target bundleno = 927 (0x39f), region = 48  ;;  %s2261_s23 = sshll.u32 (!%p3888_p9), %s3353_s17, 5 }
  0x77   : > { %s295_s11 = scalar_lea.sflag (!%p3888_p9), [#allocation3], %s3353_s17  ;;  %s3357_s20 = scalar_lea.vmem (!%p3888_p9), [#allocation2], %s2261_s23 }
  0x7d   : > { %3066 = dma.done.wait (%p3889_p0), %s295_s11, 512  }
  0x7e   : > { %3068 = vsyncadd (%p3889_p0), %s295_s11, 4294966784  ;;  %p3890_p11 = scmp.eq.s32.totalorder %s3169_s28, 0 }
  0x80   : > { %3070 = dma.done.wait (%p3890_p11), [#allocation6], 10240   ;;  %p3891_p8 = pmov %p3890_p11 }
  0x82   : > { %3072 = vsyncadd (%p3891_p8), [#allocation6], 4294957056  ;;  %p3892_p13 = pmov %p3891_p8 }
  0x83   : > { %p3893_p6 = pmov %p3891_p8 }
  0x84   : > { %3074 = dma.done.wait (%p3892_p13), [#allocation9], 1024  }
  0x85   : > { %3076 = vsyncadd (%p3893_p6), [#allocation9], 4294966272  ;;  %v2807_v0 = vld [vmem:[#allocation5] sm:$0xff]   ;;  %v2808_v1 = vld [vmem:[#allocation5 + $0x8] sm:$0xff]   ;;  %v520_v46 = vlaneseq  ;;  %vm3877_vm7 = vmmov 1   ;;  %s2265_s8 = sshll.u32 %s3353_s17, 6 }
  0x86   : > { %2636 = vmatprep.subr.bf16.mxu0 %v2807_v0  ;;  %v2809_v2 = vld [vmem:[#allocation5 + $0x10] sm:$0xff]   ;;  %v2810_v3 = vld [vmem:[#allocation5 + $0x18] sm:$0xff]   ;;  %v344_v4 = vld [vmem:[%s3357_s20] sm:$0xff]   ;;  %s3802_s12 = scalar_lea.vmem [#allocation10], %s2265_s8  ;;  %s2439_s16 = sshll.u32 %s3169_s28, 10 }
  0x87   : > { %2637 = vmatpush3.bf16.msra.mxu0 %v2807_v0  ;;  %v2819_v5 = vld [vmem:[#allocation7 + $0x40] sm:$0xff]   ;;  %2652 = vmatprep.mubr.bf16.mxu0 %v344_v4  ;;  %v2823_v8 = vld [vmem:[#allocation7 + $0x48] sm:$0xff]   ;;  %v2827_v11 = vld [vmem:[#allocation7 + $0x50] sm:$0xff]   ;;  %v3375_v47 = vshrl.u32 %v520_v46, 7  ;;  %s2149_s21 = sshll.u32 %s3802_s12, 4  ;;  %s3818_s11 = scalar_lea.hbm %s3872_s7, %s2439_s16  ;;  %s3812_s21 = int_to_ptr.vmem [resolvable:$true] %s2149_s21 }
  0x88   : > { %2638 = vmatprep.subr.bf16.mxu0 %v2808_v1  ;;  %v2820_v6 = vld [vmem:[#allocation7] sm:$0xff]   ;;  %2452 = vmatprep.subr.bf16.mxu1 %v2819_v5  ;;  %v2824_v9 = vld [vmem:[#allocation7 + $0x8] sm:$0xff]   ;;  %v2828_v12 = vld [vmem:[#allocation7 + $0x10] sm:$0xff]   ;;  %s2136_s28 = scalar_lea.sflag [#allocation4], %s3353_s17  ;;  %s3105_s30 = smov [#allocation10]  }
  0x89   : > { %v2811_v7 = vld [vmem:[#allocation5 + $0x20] sm:$0xff]   ;;  %2453 = vmatpush3.bf16.msra.mxu1 %v2820_v6  ;;  %v2812_v10 = vld [vmem:[#allocation5 + $0x28] sm:$0xff]   ;;  %v2813_v13 = vld [vmem:[#allocation5 + $0x30] sm:$0xff]   ;;  %v522_v48 = vadd.s32 8, %v3375_v47  ;;  %v3382_v54 = vadd.s32 16, %v3375_v47  ;;  %v3385_v55 = vadd.s32 24, %v3375_v47 }
  0x8a   : > { %2454 = vmatprep.subr.bf16.mxu1 %v2823_v8  ;;  %v2814_v14 = vld [vmem:[#allocation5 + $0x38] sm:$0xff]   ;;  %v346_v16 = vld [vmem:[%s3357_s20 + $0x8] sm:$0xff]   ;;  %v348_v17 = vld [vmem:[%s3357_s20 + $0x10] sm:$0xff]   ;;  %v533_v58 = vand.u32 7, %v3375_v47  ;;  %vm842_vm0 = vcmp.lt.s32.totalorder %v3375_v47, 7  ;;  %vm761_vm1 = vcmp.lt.s32.totalorder %v3375_v47, 1 }
  0x8b   : > { %2639 = vmatpush3.bf16.msra.mxu0 %v2808_v1  ;;  %v2831_v15 = vld [vmem:[#allocation7 + $0x58] sm:$0xff]   ;;  %v2821_v18 = vld [vmem:[#allocation7 + $0xc0] sm:$0xff]   ;;  %v2825_v20 = vld [vmem:[#allocation7 + $0xc8] sm:$0xff]   ;;  %v540_v53 = vand.u32 7, %v522_v48  ;;  %v554_v4 = vand.u32 7, %v3385_v55  ;;  %v3103_v8 = vmov 0.0  }
  0x8c   : > { %2640 = vmatprep.subr.bf16.mxu0 %v2809_v2  ;;  %v2822_v19 = vld [vmem:[#allocation7 + $0x80] sm:$0xff]   ;;  %v350_v21 = vld [vmem:[%s3357_s20 + $0x18] sm:$0xff]   ;;  %v2826_v22 = vld [vmem:[#allocation7 + $0x88] sm:$0xff]   ;;  %vm3411_vm3 = vcmp.ge.s32.totalorder %v533_v58, 1  ;;  %s3025_s9 = sshll.u32 %s3105_s30, 4  ;;  %s3026_s9 = int_to_ptr.vmem [resolvable:$false] %s3025_s9 }
  0x8d   : > { %2455 = vmatpush3.bf16.msra.mxu1 %v2824_v9  ;;  %v2829_v23 = vld [vmem:[#allocation7 + $0xd0] sm:$0xff]   ;;  %v2832_v25 = vld [vmem:[#allocation7 + $0x18] sm:$0xff]   ;;  %v2835_v28 = vld [vmem:[#allocation7 + $0x60] sm:$0xff]   ;;  %vm3397_vm2 = vcmp.ge.s32.totalorder %v540_v53, 1  ;;  %vm3424_vm4 = vcmp.lt.s32.totalorder %v540_v53, 7  ;;  %vm3440_vm6 = vcmp.ge.s32.totalorder %v554_v4, 1  ;;  %p3028_p12 = scmp.lt.s32.totalorder %s3812_s21, %s3026_s9 }
  0x8e   : > { %2456 = vmatprep.subr.bf16.mxu1 %v2827_v11  ;;  %v2830_v24 = vld [vmem:[#allocation7 + $0x90] sm:$0xff]   ;;  %v2833_v26 = vld [vmem:[#allocation7 + $0xd8] sm:$0xff]   ;;  %v2836_v29 = vld [vmem:[#allocation7 + $0x20] sm:$0xff]   ;;  %vm748_vm13 = vcmp.lt.s32.totalorder %v554_v4, 7  ;;  %s3027_s13 = scalar_lea.vmem %s3026_s9, 2048 }
  0x8f   : > { %2641 = vmatpush3.bf16.msra.mxu0 %v2809_v2  ;;  %v2834_v27 = vld [vmem:[#allocation7 + $0x98] sm:$0xff]   ;;  %v2837_v30 = vld [vmem:[#allocation7 + $0xe0] sm:$0xff]   ;;  %v2839_v32 = vld [vmem:[#allocation7 + $0x68] sm:$0xff]  }
  0x90   : > { %2642 = vmatprep.subr.bf16.mxu0 %v2810_v3  ;;  %v2838_v31 = vld [vmem:[#allocation7 + $0xa0] sm:$0xff]   ;;  %v2840_v33 = vld [vmem:[#allocation7 + $0x28] sm:$0xff]   ;;  %v2843_v36 = vld [vmem:[#allocation7 + $0x70] sm:$0xff]  }
  0x91   : > { %2457 = vmatpush3.bf16.msra.mxu1 %v2828_v12  ;;  %v2841_v34 = vld [vmem:[#allocation7 + $0xe8] sm:$0xff]   ;;  %v2844_v37 = vld [vmem:[#allocation7 + $0x30] sm:$0xff]   ;;  %v2847_v40 = vld [vmem:[#allocation7 + $0x78] sm:$0xff]  }
  0x92   : > { %2458 = vmatprep.subr.bf16.mxu1 %v2831_v15  ;;  %v2842_v35 = vld [vmem:[#allocation7 + $0xa8] sm:$0xff]   ;;  %v2845_v38 = vld [vmem:[#allocation7 + $0xf0] sm:$0xff]   ;;  %v2848_v41 = vld [vmem:[#allocation7 + $0x38] sm:$0xff]  }
  0x93   : > { %2643 = vmatpush3.bf16.msra.mxu0 %v2810_v3  ;;  %v2846_v39 = vld [vmem:[#allocation7 + $0xb0] sm:$0xff]   ;;  %v2849_v42 = vld [vmem:[#allocation7 + $0xf8] sm:$0xff]   ;;  %v2851_v44 = vld [vmem:[#allocation7 + $0x140] sm:$0xff]   ;;  %v547_v3 = vand.u32 7, %v3382_v54 }
  0x94   : > { %2644 = vmatprep.subr.bf16.mxu0 %v2811_v7  ;;  %v2850_v43 = vld [vmem:[#allocation7 + $0xb8] sm:$0xff]   ;;  %v2853_v45 = vld [vmem:[#allocation7 + $0x1c0] sm:$0xff]   ;;  %vm3510_vm8 = vmpackc.low %vm3397_vm2, %vm3877_vm7 }
  0x95   : > { %2459 = vmatpush3.bf16.msra.mxu1 %v2832_v25  ;;  %v2266_v49 = vld [vmem:[%s3867_s2] ss:$0 sm:$0xff]  ;;  %vm3434_vm5 = vcmp.ge.s32.totalorder %v547_v3, 1  ;;  %vm2364_vm9 = vmpackc.low %vm3397_vm2, %vm3411_vm3  ;;  %vm747_vm12 = vcmp.lt.s32.totalorder %v547_v3, 7  ;;  %v2862_v54 = vld [vmem:[#allocation7 + $0x190] sm:$0xff]   ;;  %vm3926_vm2 = vmmov 1  }
  0x96   : > { %2460 = vmatprep.subr.bf16.mxu1 %v2835_v28  ;;  %vm3552_vm10 = vmpackc.low %vm3424_vm4, %vm3877_vm7  ;;  %v2865_v3 = vld [vmem:[#allocation7 + $0x1d8] sm:$0xff]   ;;  %v2887_v2 = vld [vmem:[#allocation7 + $0x220] sm:$0xff]  }
  0x97   : > { %2645 = vmatpush3.bf16.msra.mxu0 %v2811_v7  ;;  %vm3581_vm11 = vmpackc.low %vm3440_vm6, %vm3434_vm5  ;;  %v2864_v4 = vld [vmem:[#allocation7 + $0x118] sm:$0xff]  }
  0x98   : > { %2646 = vmatprep.subr.bf16.mxu0 %v2812_v10 }
  0x99   : > { %2461 = vmatpush3.bf16.msra.mxu1 %v2836_v29 }
  0x9a   : > { %2462 = vmatprep.subr.bf16.mxu1 %v2839_v32 }
  0x9b   : > { %2647 = vmatpush3.bf16.msra.mxu0 %v2812_v10  ;;  %v2890_v10 = vld [vmem:[#allocation7 + $0x238] sm:$0xff]  }
  0x9c   : > { %2648 = vmatprep.subr.bf16.mxu0 %v2813_v13 }
  0x9d   : > { %2463 = vmatpush3.bf16.msra.mxu1 %v2840_v33 }
  0x9e   : > { %2464 = vmatprep.subr.bf16.mxu1 %v2843_v36 }
  0x9f   : > { %2649 = vmatpush3.bf16.msra.mxu0 %v2813_v13 }
  0xa0   : > { %2650 = vmatprep.subr.bf16.mxu0 %v2814_v14 }
  0xa1   : > { %2465 = vmatpush3.bf16.msra.mxu1 %v2844_v37  ;;  %v3472_v37 = vadd.s32 40, %v3375_v47 }
  0xa2   : > { %2466 = vmatprep.subr.bf16.mxu1 %v2847_v40 }
  0xa3   : > { %2651 = vmatpush3.bf16.msra.mxu0 %v2814_v14 }
  0xa4   : > { %2492 = vmatprep.subr.bf16.mxu0 %v2821_v18 }
  0xa5   : > { %2467 = vmatpush3.bf16.msra.mxu1 %v2848_v41 }
  0xa6   : > { %2653 = vmatmul.mubr.bf16.vlgmr.msra.gmra.mrb[0].mxu0 %v346_v16  ;;  %2532 = vmatprep.subr.bf16.mxu1 %v2851_v44 }
  0xa7   : > { %2656 = vmatprep.mubr.bf16.mxu0 %v348_v17  ;;  %2493 = vmatpush3.bf16.msra.mxu0 %v2822_v19  ;;  %v2894_v19 = vld [vmem:[#allocation8 + $0x18] sm:$0xff]  }
  0xa8   : > { %2494 = vmatprep.subr.bf16.mxu0 %v2825_v20 }
  0xab   : > { %2495 = vmatpush3.bf16.msra.mxu0 %v2826_v22 }
  0xac   : > { %2496 = vmatprep.subr.bf16.mxu0 %v2829_v23  ;;  %v2856_v23 = vld [vmem:[#allocation7 + $0x108] sm:$0xff]  }
  0xae   : > { %2657 = vmatmul.mubr.bf16.gmra.mrb[4].mxu0 %v350_v21 }
  0xaf   : > { %2497 = vmatpush3.bf16.msra.mxu0 %v2830_v24  ;;  %v568_v24 = vand.u32 7, %v3472_v37 }
  0xb0   : > { %2498 = vmatprep.subr.bf16.mxu0 %v2833_v26 }
  0xb1   : > { %vm742_vm15 = vcmp.ge.s32.totalorder %v568_v24, 1  ;;  %vm750_vm6 = vcmp.lt.s32.totalorder %v568_v24, 7  ;;  %v2873_v24 = vld [vmem:[#allocation7 + $0x1e8] sm:$0xff]  }
  0xb3   : > { %2499 = vmatpush3.bf16.msra.mxu0 %v2834_v27  ;;  %v3453_v27 = vadd.s32 32, %v3375_v47 }
  0xb4   : > { %2500 = vmatprep.subr.bf16.mxu0 %v2837_v30 }
  0xb7   : > { %2501 = vmatpush3.bf16.msra.mxu0 %v2838_v31 }
  0xb8   : > { %2502 = vmatprep.subr.bf16.mxu0 %v2841_v34 }
  0xbb   : > { %2503 = vmatpush3.bf16.msra.mxu0 %v2842_v35 }
  0xbc   : > { %2504 = vmatprep.subr.bf16.mxu0 %v2845_v38 }
  0xbf   : > { %2505 = vmatpush3.bf16.msra.mxu0 %v2846_v39 }
  0xc0   : > { %2506 = vmatprep.subr.bf16.mxu0 %v2849_v42 }
  0xc3   : > { %2507 = vmatpush3.bf16.msra.mxu0 %v2850_v43 }
  0xc4   : > { %2572 = vmatprep.subr.bf16.mxu0 %v2853_v45 }
 0x179   : > { %v2654_v50 = vpop.f32.mrb[0].mxu0 }
 0x17a   : > { %v490_v51 = vadd.f32 %v2654_v50, %v2266_v49  ;;  %v481_v52 = vpop.f32.mrb[1].mxu0 }
 0x17b   : > { %v482_v56 = vadd.f32 %v2266_v49, %v481_v52  ;;  %v2655_v57 = vpop.f32.mrb[2].mxu0 }
 0x17c   : > { %v3388_v59 = vmax.f32 %v490_v51, 0.0  ;;  %v493_v60 = vadd.f32 %v2655_v57, %v2266_v49  ;;  %v484_v61 = vpop.f32.mrb[3].mxu0 }
 0x17d   : > { %v3390_v62 = vmax.f32 %v482_v56, 0.0  ;;  %v485_v63 = vadd.f32 %v2266_v49, %v484_v61 }
 0x17e   : > { %v755_v0 = vrot.slane %v3388_v59, 7  ;;  %v3395_v1 = vmax.f32 %v493_v60, 0.0  ;;  %v836_v5 = vrot.slane %v3388_v59, 1 }
 0x17f   : > { %v753_v6 = vrot.slane %v3390_v62, 7  ;;  %v3405_v7 = vmax.f32 %v485_v63, 0.0  ;;  %v830_v9 = vpack.c.bf16 %v3390_v62, %v3103_v8  ;;  %v834_v11 = vrot.slane %v3390_v62, 1 }
 0x180   : > { %v756_v12 = vrot.slane %v3395_v1, 7  ;;  %v837_v13 = vrot.slane %v3395_v1, 1  ;;  %v916_v14 = vpack.c.bf16 %v3395_v1, %v3388_v59 }
 0x181   : > { %v754_v15 = vrot.slane %v3405_v7, 7  ;;  %v835_v16 = vrot.slane %v3405_v7, 1  ;;  %v915_v17 = vpack.c.bf16 %v3405_v7, %v3390_v62  ;;  %v2658_v18 = vpop.f32.mrb[4].mxu0  ;;  %1662 = vmatprep.mubr.bf16.mxu1 %v830_v9  ;;  %v3430_v20 = vpack.c.bf16 %v3388_v59, %v3405_v7  ;;  %v2852_v9 = vld [vmem:[#allocation7 + $0x100] sm:$0xff]   ;;  %v2886_v62 = vld [vmem:[#allocation7 + $0x218] sm:$0xff]   ;;  %v2888_v7 = vld [vmem:[#allocation7 + $0x228] sm:$0xff]  }
 0x182   : > { %v506_v21 = vadd.f32 %v2658_v18, %v2266_v49  ;;  %v497_v22 = vpop.f32.mrb[5].mxu0  ;;  %v3446_v25 = vsel %vm761_vm1, %v755_v0, %v756_v12  ;;  %v3450_v26 = vsel %vm842_vm0, %v836_v5, %v837_v13 }
 0x183   : > { %v3459_v28 = vsel %vm842_vm0, %v834_v11, %v835_v16  ;;  %v498_v29 = vadd.f32 %v2266_v49, %v497_v22  ;;  %v2659_v30 = vpop.f32.mrb[6].mxu0  ;;  %v768_v31 = vsel %vm761_vm1, %v753_v6, %v754_v15  ;;  %v3465_v32 = vsel %vm761_vm1, %v754_v15, %v755_v0 }
 0x184   : > { %v3467_v33 = vmax.f32 %v506_v21, 0.0  ;;  %v509_v34 = vadd.f32 %v2659_v30, %v2266_v49  ;;  %v500_v35 = vpop.f32.mrb[7].mxu0  ;;  %v2371_v36 = vpack.c.bf16 %v3446_v25, %v3465_v32  ;;  %v3477_v40 = vpack.c.bf16 %v3465_v32, %v768_v31  ;;  %v2855_v21 = vld [vmem:[#allocation7 + $0x148] sm:$0xff]  }
 0x185   : > { %v3474_v38 = vmax.f32 %v498_v29, 0.0  ;;  %v501_v39 = vadd.f32 %v2266_v49, %v500_v35  ;;  %v3481_v41 = vsel %vm842_vm0, %v835_v16, %v836_v5  ;;  %v2368_v44 = vpack.c.bf16 %v3459_v28, %v3103_v8  ;;  %v2854_v29 = vld [vmem:[#allocation7 + $0x180] sm:$0xff]  }
 0x186   : > { %v759_v42 = vrot.slane %v3467_v33, 7  ;;  %v3484_v43 = vmax.f32 %v509_v34, 0.0  ;;  %v3490_v45 = vpack.c.bf16 %v3450_v26, %v3481_v41  ;;  %v840_v51 = vrot.slane %v3467_v33, 1 }
 0x187   : > { %v757_v46 = vrot.slane %v3474_v38, 7  ;;  %v838_v48 = vrot.slane %v3474_v38, 1  ;;  %v3494_v49 = vmax.f32 %v501_v39, 0.0  ;;  %v3498_v50 = vpack.c.bf16 %v3474_v38, %v3395_v1  ;;  %v2857_v39 = vld [vmem:[#allocation7 + $0x1c8] sm:$0xff]   ;;  %v2889_v1 = vld [vmem:[#allocation7 + $0x230] sm:$0xff]  }
 0x188   : > { %v760_v52 = vrot.slane %v3484_v43, 7  ;;  %v841_v53 = vrot.slane %v3484_v43, 1  ;;  %v2389_v56 = vpack.c.bf16 %v3481_v41, %v3459_v28  ;;  %v2882_v28 = vld [vmem:[#allocation7 + $0x1b8] sm:$0xff]   ;;  %v2884_v41 = vld [vmem:[#allocation7 + $0x208] sm:$0xff]   ;;  %v1010_v59 = vpack.c.bf16 %v3103_v8, %v3484_v43 }
 0x189   : > { %v758_v57 = vrot.slane %v3494_v49, 7  ;;  %v839_v60 = vrot.slane %v3494_v49, 1  ;;  %v3516_v63 = vsel %vm761_vm1, %v756_v12, %v757_v46  ;;  %v3520_v0 = vpack.c.bf16 %v3467_v33, %v3494_v49 }
 0x18a   : > { %v769_v5 = vsel %vm761_vm1, %v760_v52, %v753_v6  ;;  %v3530_v15 = vpack.c.bf16 %v3516_v63, %v3446_v25  ;;  %v3534_v12 = vsel %vm842_vm0, %v837_v13, %v838_v48  ;;  %v3538_v16 = vsel %vm761_vm1, %v759_v42, %v760_v52 }
 0x18b   : > { %v2353_v6 = vpack.c.bf16 %v769_v5, %v3103_v8  ;;  %v2365_v18 = vpack.c.bf16 %v768_v31, %v769_v5  ;;  %v3543_v22 = vsel %vm761_vm1, %v757_v46, %v758_v57  ;;  %v3547_v25 = vsel %vm842_vm0, %v838_v48, %v839_v60  ;;  %v2858_v5 = vld [vmem:[#allocation7 + $0x188] sm:$0xff]  }
 0x18c   : > { %v2377_v30 = vpack.c.bf16 %v3543_v22, %v3516_v63  ;;  %v3560_v31 = vpack.c.bf16 %v3547_v25, %v3534_v12  ;;  %v3564_v32 = vsel %vm761_vm1, %v758_v57, %v759_v42  ;;  %v3568_v34 = vsel %vm842_vm0, %v840_v51, %v841_v53 }
 0x18d   : > { %2354 = vmatmul.mubr.msk.bf16.vlgmr.msra.gmra.mrb[0].mxu1 %vm3510_vm8, %v2353_v6  ;;  %2366 = vmatprep.mubr.msk.bf16.mxu0 %vm2364_vm9, %v2365_v18  ;;  %v561_v42 = vand.u32 7, %v3453_v27  ;;  %v2383_v46 = vpack.c.bf16 %v3538_v16, %v3564_v32  ;;  %v3590_v48 = vpack.c.bf16 %v3564_v32, %v3543_v22  ;;  %v3594_v52 = vsel %vm842_vm0, %v839_v60, %v840_v51  ;;  %v2859_v51 = vld [vmem:[#allocation7 + $0x150] sm:$0xff]  }
 0x18e   : > { %2533 = vmatpush3.bf16.msra.mxu1 %v2852_v9  ;;  %1670 = vmatprep.mubr.bf16.mxu1 %v3430_v20  ;;  %v3600_v27 = vpack.c.bf16 %v3568_v34, %v3594_v52  ;;  %v2392_v57 = vpack.c.bf16 %v3534_v12, %v3450_v26  ;;  %v2395_v61 = vpack.c.bf16 %v3594_v52, %v3547_v25  ;;  %v528_v18 = vadd.s32 56, %v3375_v47  ;;  %v2877_v32 = vld [vmem:[#allocation7 + $0x1f0] sm:$0xff]   ;;  %v2895_v26 = vld [vmem:[#allocation8 + $0x20] sm:$0xff]  }
 0x18f   : > { %2369 = vmatmul.mubr.msk.bf16.vlgmr.msra.gmra.mrb[8].mxu0 %vm3552_vm10, %v2368_v44  ;;  %2534 = vmatprep.subr.bf16.mxu1 %v2855_v21  ;;  %v917_v60 = vpack.c.bf16 %v3494_v49, %v3474_v38  ;;  %v3614_v37 = vsel %vm842_vm0, %v841_v53, %v834_v11  ;;  %v918_v63 = vpack.c.bf16 %v3484_v43, %v3467_v33  ;;  %v2861_v11 = vld [vmem:[#allocation7 + $0x1d0] sm:$0xff]   ;;  %vm741_vm14 = vcmp.ge.s32.totalorder %v561_v42, 1  ;;  %v2863_v21 = vld [vmem:[#allocation7 + $0x158] sm:$0xff]   ;;  %vm3636_vm0 = vmpackc.low %vm748_vm13, %vm747_vm12 }
 0x190   : > { %2372 = vmatprep.mubr.msk.bf16.mxu0 %vm3581_vm11, %v2371_v36  ;;  %2573 = vmatpush3.bf16.msra.mxu0 %v2854_v29  ;;  %v2398_v44 = vpack.c.bf16 %v3614_v37, %v3568_v34  ;;  %v3624_v9 = vpack.c.bf16 %v3103_v8, %v3538_v16  ;;  %v3628_v6 = vpack.c.bf16 %v3103_v8, %v3614_v37  ;;  %v2860_v36 = vld [vmem:[#allocation7 + $0x110] sm:$0xff]   ;;  %v527_v53 = vadd.s32 48, %v3375_v47  ;;  %vm3643_vm1 = vmpackc.low %vm742_vm15, %vm741_vm14  ;;  %v2879_v47 = vld [vmem:[#allocation7 + $0x178] sm:$0xff]  }
 0x191   : > { %2574 = vmatprep.subr.bf16.mxu0 %v2857_v39  ;;  %v582_v29 = vand.u32 7, %v528_v18  ;;  %v2867_v39 = vld [vmem:[#allocation7 + $0x160] sm:$0xff]   ;;  %vm749_vm5 = vcmp.lt.s32.totalorder %v561_v42, 7  ;;  %v2872_v18 = vld [vmem:[#allocation7 + $0x128] sm:$0xff]   ;;  %vm3686_vm14 = vcmp.lt.s32.totalorder %v533_v58, 7  ;;  %v2878_v58 = vld [vmem:[#allocation7 + $0x1b0] sm:$0xff]  }
 0x192   : > { %2535 = vmatpush3.bf16.msra.mxu1 %v2856_v23  ;;  %v575_v13 = vand.u32 7, %v527_v53  ;;  %v2866_v23 = vld [vmem:[#allocation7 + $0x198] sm:$0xff]   ;;  %v2871_v53 = vld [vmem:[#allocation7 + $0x168] sm:$0xff]   ;;  %vm3661_vm12 = vmpackc.low %vm750_vm6, %vm749_vm5 }
 0x193   : > { %2536 = vmatprep.subr.bf16.mxu1 %v2859_v51  ;;  %v2869_v51 = vld [vmem:[#allocation7 + $0x1e0] sm:$0xff]   ;;  %vm3657_vm10 = vcmp.ge.s32.totalorder %v582_v29, 1  ;;  %vm3694_vm5 = vcmp.lt.s32.totalorder %v582_v29, 7  ;;  %vm2388_vm6 = vmpackc.low %vm3424_vm4, %vm3686_vm14  ;;  %v2880_v29 = vld [vmem:[#allocation7 + $0x138] sm:$0xff]  }
 0x194   : > { %2575 = vmatpush3.bf16.msra.mxu0 %v2858_v5  ;;  %v2868_v5 = vld [vmem:[#allocation7 + $0x120] sm:$0xff]   ;;  %vm3653_vm8 = vcmp.ge.s32.totalorder %v575_v13, 1  ;;  %vm3690_vm15 = vcmp.lt.s32.totalorder %v575_v13, 7  ;;  %v2881_v13 = vld [vmem:[#allocation7 + $0x1f8] sm:$0xff]   ;;  %v2896_v33 = vld [vmem:[#allocation8 + $0x28] sm:$0xff]  }
 0x195   : > { %2357 = vmatmul.mubr.msk.bf16.gmra.mrb[4].mxu1 %vm3581_vm11, %v3477_v40  ;;  %2576 = vmatprep.subr.bf16.mxu0 %v2861_v11  ;;  %v2870_v42 = vld [vmem:[#allocation7 + $0x1a0] sm:$0xff]   ;;  %vm2361_vm13 = vmpackc.low %vm3657_vm10, %vm3653_vm8  ;;  %v2897_v38 = vld [vmem:[#allocation8 + $0x30] sm:$0xff]  }
 0x196   : > { %2537 = vmatpush3.bf16.msra.mxu1 %v2860_v36  ;;  %1678 = vmatprep.mubr.bf16.mxu1 %v3498_v50  ;;  %vm2385_vm7 = vmpackc.low %vm3694_vm5, %vm3690_vm15  ;;  %v2891_v8 = vld [vmem:[#allocation8] sm:$0xff]  }
 0x197   : > { %2375 = vmatmul.mubr.msk.bf16.gmra.mrb[12].mxu0 %vm3636_vm0, %v3490_v45  ;;  %2538 = vmatprep.subr.bf16.mxu1 %v2863_v21  ;;  %v2875_v21 = vld [vmem:[#allocation7 + $0x170] sm:$0xff]   ;;  %vm2409_vm3 = vmpackc.low %vm3926_vm2, %vm3653_vm8 }
 0x198   : > { %2378 = vmatprep.mubr.msk.bf16.mxu0 %vm3643_vm1, %v2377_v30  ;;  %2577 = vmatpush3.bf16.msra.mxu0 %v2862_v54  ;;  %v2874_v54 = vld [vmem:[#allocation7 + $0x1a8] sm:$0xff]  }
 0x199   : > { %2578 = vmatprep.subr.bf16.mxu0 %v2865_v3 }
 0x19a   : > { %2539 = vmatpush3.bf16.msra.mxu1 %v2864_v4 }
 0x19b   : > { %2540 = vmatprep.subr.bf16.mxu1 %v2867_v39  ;;  %v2883_v39 = vld [vmem:[#allocation7 + $0x200] sm:$0xff]  }
 0x19c   : > { %2579 = vmatpush3.bf16.msra.mxu0 %v2866_v23 }
 0x19d   : > { %2360 = vmatmul.mubr.msk.bf16.gmra.mrb[8].mxu1 %vm3643_vm1, %v3530_v15  ;;  %2580 = vmatprep.subr.bf16.mxu0 %v2869_v51 }
 0x19e   : > { %2541 = vmatpush3.bf16.msra.mxu1 %v2868_v5  ;;  %1686 = vmatprep.mubr.bf16.mxu1 %v3520_v0 }
 0x19f   : > { %2381 = vmatmul.mubr.msk.bf16.gmra.mrb[16].mxu0 %vm3661_vm12, %v3560_v31  ;;  %2542 = vmatprep.subr.bf16.mxu1 %v2871_v53 }
 0x1a0   : > { %2384 = vmatprep.mubr.msk.bf16.mxu0 %vm2361_vm13, %v2383_v46  ;;  %2581 = vmatpush3.bf16.msra.mxu0 %v2870_v42  ;;  %v2876_v46 = vld [vmem:[#allocation7 + $0x130] sm:$0xff]  }
 0x1a1   : > { %2582 = vmatprep.subr.bf16.mxu0 %v2873_v24 }
 0x1a2   : > { %2543 = vmatpush3.bf16.msra.mxu1 %v2872_v18 }
 0x1a3   : > { %2544 = vmatprep.subr.bf16.mxu1 %v2875_v21 }
 0x1a4   : > { %2583 = vmatpush3.bf16.msra.mxu0 %v2874_v54 }
 0x1a5   : > { %2363 = vmatmul.mubr.msk.bf16.gmra.mrb[12].mxu1 %vm2361_vm13, %v3590_v48  ;;  %2584 = vmatprep.subr.bf16.mxu0 %v2877_v32 }
 0x1a6   : > { %2545 = vmatpush3.bf16.msra.mxu1 %v2876_v46  ;;  %2390 = vmatprep.mubr.msk.bf16.mxu1 %vm2388_vm6, %v2389_v56 }
 0x1a7   : > { %2387 = vmatmul.mubr.msk.bf16.gmra.mrb[20].mxu0 %vm2385_vm7, %v3600_v27  ;;  %2546 = vmatprep.subr.bf16.mxu1 %v2879_v47 }
 0x1a8   : > { %2585 = vmatpush3.bf16.msra.mxu0 %v2878_v58  ;;  %1857 = vmatprep.mubr.bf16.mxu0 %v3430_v20  ;;  %v2885_v20 = vld [vmem:[#allocation7 + $0x210] sm:$0xff]  }
 0x1a9   : > { %2586 = vmatprep.subr.bf16.mxu0 %v2881_v13 }
 0x1aa   : > { %2547 = vmatpush3.bf16.msra.mxu1 %v2880_v29 }
 0x1ab   : > { %2660 = vmatprep.subr.bf16.mxu1 %v2883_v39 }
 0x1ac   : > { %2587 = vmatpush3.bf16.msra.mxu0 %v2882_v28 }
 0x1ad   : > { %1793 = vmatmul.mubr.bf16.vlgmr.msra.gmra.mrb[16].mxu1 %v915_v17  ;;  %2684 = vmatprep.subr.bf16.mxu0 %v2891_v8  ;;  %v2893_v17 = vld [vmem:[#allocation8 + $0x10] sm:$0xff]  }
 0x1ae   : > { %2661 = vmatpush3.bf16.msra.mxu1 %v2883_v39  ;;  %2393 = vmatprep.mubr.msk.bf16.mxu1 %vm3636_vm0, %v2392_v57 }
 0x1af   : > { %2402 = vmatmul.mubr.msk.bf16.vlgmr.msra.gmra.mrb[24].mxu0 %vm2364_vm9, %v3477_v40  ;;  %2662 = vmatprep.subr.bf16.mxu1 %v2884_v41  ;;  %v2898_v40 = vld [vmem:[#allocation8 + $0x38] sm:$0xff]  }
 0x1b0   : > { %1865 = vmatprep.mubr.bf16.mxu0 %v3498_v50  ;;  %2685 = vmatpush3.bf16.msra.mxu0 %v2891_v8 }
 0x1b2   : > { %2663 = vmatpush3.bf16.msra.mxu1 %v2884_v41 }
 0x1b3   : > { %2664 = vmatprep.subr.bf16.mxu1 %v2885_v20 }
 0x1b5   : > { %1801 = vmatmul.mubr.bf16.gmra.mrb[20].mxu1 %v916_v14  ;;  %v2892_v14 = vld [vmem:[#allocation8 + $0x8] sm:$0xff]  }
 0x1b6   : > { %2665 = vmatpush3.bf16.msra.mxu1 %v2885_v20  ;;  %2396 = vmatprep.mubr.msk.bf16.mxu1 %vm3661_vm12, %v2395_v61 }
 0x1b7   : > { %2405 = vmatmul.mubr.msk.bf16.gmra.mrb[28].mxu0 %vm3581_vm11, %v3530_v15  ;;  %2666 = vmatprep.subr.bf16.mxu1 %v2886_v62 }
 0x1b8   : > { %1873 = vmatprep.mubr.bf16.mxu0 %v3520_v0  ;;  %2686 = vmatprep.subr.bf16.mxu0 %v2892_v14 }
 0x1b9   : > { %2687 = vmatpush3.bf16.msra.mxu0 %v2892_v14 }
 0x1ba   : > { %2667 = vmatpush3.bf16.msra.mxu1 %v2886_v62  ;;  %2688 = vmatprep.subr.bf16.mxu0 %v2893_v17 }
 0x1bb   : > { %2668 = vmatprep.subr.bf16.mxu1 %v2887_v2 }
 0x1bd   : > { %1809 = vmatmul.mubr.bf16.gmra.mrb[24].mxu1 %v917_v60  ;;  %2689 = vmatpush3.bf16.msra.mxu0 %v2893_v17 }
 0x1be   : > { %2669 = vmatpush3.bf16.msra.mxu1 %v2887_v2  ;;  %2399 = vmatprep.mubr.msk.bf16.mxu1 %vm2385_vm7, %v2398_v44  ;;  %vm2421_vm7 = vmpackc.low %vm3926_vm2, %vm3690_vm15 }
 0x1bf   : > { %2408 = vmatmul.mubr.msk.bf16.gmra.mrb[32].mxu0 %vm3643_vm1, %v3590_v48  ;;  %2670 = vmatprep.subr.bf16.mxu1 %v2888_v7 }
 0x1c0   : > { %1881 = vmatprep.mubr.bf16.mxu0 %v1010_v59  ;;  %2690 = vmatprep.subr.bf16.mxu0 %v2894_v19 }
 0x1c1   : > { %2691 = vmatpush3.bf16.msra.mxu0 %v2894_v19 }
 0x1c2   : > { %2671 = vmatpush3.bf16.msra.mxu1 %v2888_v7  ;;  %2692 = vmatprep.subr.bf16.mxu0 %v2895_v26 }
 0x1c3   : > { %2672 = vmatprep.subr.bf16.mxu1 %v2889_v1 }
 0x1c5   : > { %1817 = vmatmul.mubr.bf16.gmra.mrb[28].mxu1 %v918_v63  ;;  %2693 = vmatpush3.bf16.msra.mxu0 %v2895_v26 }
 0x1c6   : > { %2673 = vmatpush3.bf16.msra.mxu1 %v2889_v1  ;;  %2676 = vmatprep.mubr.msk.bf16.mxu1 %vm2388_vm6, %v3490_v45  ;;  %v2279_v45 = vld [vmem:[%s3869_s4] ss:$0 sm:$0xff] }
 0x1c7   : > { %2411 = vmatmul.mubr.msk.bf16.gmra.mrb[36].mxu0 %vm2409_vm3, %v3624_v9  ;;  %2674 = vmatprep.subr.bf16.mxu1 %v2890_v10 }
 0x1c8   : > { %2694 = vmatprep.subr.bf16.mxu0 %v2896_v33 }
 0x1c9   : > { %2695 = vmatpush3.bf16.msra.mxu0 %v2896_v33 }
 0x1ca   : > { %2675 = vmatpush3.bf16.msra.mxu1 %v2890_v10  ;;  %2696 = vmatprep.subr.bf16.mxu0 %v2897_v38 }
 0x1cb   : > { %2708 = vmatprep.subr.bf16.mxu1 %v2891_v8 }
 0x1cd   : > { %2677 = vmatmul.mubr.msk.bf16.vlgmr.msra.gmra.mrb[32].mxu1 %vm3636_vm0, %v3560_v31  ;;  %2697 = vmatpush3.bf16.msra.mxu0 %v2897_v38 }
 0x1ce   : > { %2680 = vmatprep.mubr.msk.bf16.mxu1 %vm3661_vm12, %v3600_v27  ;;  %2716 = vmatpush3.bf16.msra.mxu1 %v2891_v8 }
 0x1cf   : > { %2709 = vmatprep.subr.bf16.mxu1 %v2892_v14  ;;  %2698 = vmatprep.subr.bf16.mxu0 %v2898_v40 }
 0x1d1   : > { %2699 = vmatpush3.bf16.msra.mxu0 %v2898_v40 }
 0x1d2   : > { %2717 = vmatpush3.bf16.msra.mxu1 %v2892_v14 }
 0x1d3   : > { %2710 = vmatprep.subr.bf16.mxu1 %v2893_v17 }
 0x1d5   : > { %2681 = vmatmul.mubr.msk.bf16.gmra.mrb[36].mxu1 %vm2421_vm7, %v3628_v6 }
 0x1d6   : > { %2718 = vmatpush3.bf16.msra.mxu1 %v2893_v17 }
 0x1d7   : > { %2711 = vmatprep.subr.bf16.mxu1 %v2894_v19 }
 0x1da   : > { %2719 = vmatpush3.bf16.msra.mxu1 %v2894_v19 }
 0x1db   : > { %2712 = vmatprep.subr.bf16.mxu1 %v2895_v26 }
 0x1de   : > { %2720 = vmatpush3.bf16.msra.mxu1 %v2895_v26 }
 0x1df   : > { %2713 = vmatprep.subr.bf16.mxu1 %v2896_v33 }
 0x1e2   : > { %2721 = vmatpush3.bf16.msra.mxu1 %v2896_v33 }
 0x1e3   : > { %2714 = vmatprep.subr.bf16.mxu1 %v2897_v38 }
 0x1e6   : > { %2722 = vmatpush3.bf16.msra.mxu1 %v2897_v38 }
 0x1e7   : > { %2715 = vmatprep.subr.bf16.mxu1 %v2898_v40 }
 0x1ea   : > { %2723 = vmatpush3.bf16.msra.mxu1 %v2898_v40 }
 0x260   : > { %v2468_v43 = vpop.f32.mrb[0].mxu1 }
 0x261   : > { %v2469_v49 = vpop.f32.mrb[1].mxu1 }
 0x262   : > { %v2470_v50 = vadd.f32 %v2469_v49, %v2468_v43  ;;  %v2508_v56 = vpop.f32.mrb[8].mxu0  ;;  %v2471_v0 = vpop.f32.mrb[2].mxu1 }
 0x263   : > { %v2509_v15 = vpop.f32.mrb[9].mxu0  ;;  %v2472_v12 = vpop.f32.mrb[3].mxu1 }
 0x264   : > { %v1665_v25 = vadd.f32 %v2470_v50, %v2279_v45  ;;  %v2510_v31 = vadd.f32 %v2509_v15, %v2508_v56  ;;  %v2473_v34 = vadd.f32 %v2472_v12, %v2471_v0  ;;  %v2511_v35 = vpop.f32.mrb[10].mxu0 }
 0x265   : > { %v2512_v48 = vpop.f32.mrb[11].mxu0 }
 0x266   : > { %v1730_v52 = vadd.f32 %v2510_v31, %v1665_v25  ;;  %v1668_v27 = vadd.f32 %v2473_v34, %v2279_v45  ;;  %v2513_v57 = vadd.f32 %v2512_v48, %v2511_v35 }
 0x268   : > { %v1733_v61 = vadd.f32 %v2513_v57, %v1668_v27  ;;  %v2474_v60 = vpop.f32.mrb[4].mxu1 }
 0x269   : > { %v2475_v37 = vpop.f32.mrb[5].mxu1 }
 0x26a   : > { %v2476_v63 = vadd.f32 %v2475_v37, %v2474_v60  ;;  %v2514_v44 = vpop.f32.mrb[12].mxu0  ;;  %v2477_v9 = vpop.f32.mrb[6].mxu1 }
 0x26b   : > { %v2515_v6 = vpop.f32.mrb[13].mxu0  ;;  %v2478_v22 = vpop.f32.mrb[7].mxu1 }
 0x26c   : > { %v1673_v55 = vadd.f32 %v2476_v63, %v2279_v45  ;;  %v2516_v23 = vadd.f32 %v2515_v6, %v2514_v44  ;;  %v2479_v51 = vadd.f32 %v2478_v22, %v2477_v9  ;;  %v2517_v5 = vpop.f32.mrb[14].mxu0 }
 0x26d   : > { %v2518_v11 = vpop.f32.mrb[15].mxu0 }
 0x26e   : > { %v1738_v36 = vadd.f32 %v2516_v23, %v1673_v55  ;;  %v1676_v53 = vadd.f32 %v2479_v51, %v2279_v45  ;;  %v2519_v30 = vadd.f32 %v2518_v11, %v2517_v5 }
 0x270   : > { %v1741_v42 = vadd.f32 %v2519_v30, %v1676_v53  ;;  %v2480_v24 = vpop.f32.mrb[8].mxu1 }
 0x271   : > { %v2481_v18 = vpop.f32.mrb[9].mxu1 }
 0x272   : > { %v2482_v21 = vadd.f32 %v2481_v18, %v2480_v24  ;;  %v2520_v54 = vpop.f32.mrb[16].mxu0  ;;  %v2483_v3 = vpop.f32.mrb[10].mxu1 }
 0x273   : > { %v2521_v4 = vpop.f32.mrb[17].mxu0  ;;  %v2484_v16 = vpop.f32.mrb[11].mxu1 }
 0x274   : > { %v1681_v32 = vadd.f32 %v2482_v21, %v2279_v45  ;;  %v2522_v46 = vadd.f32 %v2521_v4, %v2520_v54  ;;  %v2485_v47 = vadd.f32 %v2484_v16, %v2483_v3  ;;  %v2523_v58 = vpop.f32.mrb[18].mxu0 }
 0x275   : > { %v2524_v13 = vpop.f32.mrb[19].mxu0 }
 0x276   : > { %v1746_v29 = vadd.f32 %v2522_v46, %v1681_v32  ;;  %v1684_v39 = vadd.f32 %v2485_v47, %v2279_v45  ;;  %v2525_v28 = vadd.f32 %v2524_v13, %v2523_v58 }
 0x278   : > { %v1749_v41 = vadd.f32 %v2525_v28, %v1684_v39  ;;  %v2486_v20 = vpop.f32.mrb[12].mxu1 }
 0x279   : > { %v2487_v62 = vpop.f32.mrb[13].mxu1 }
 0x27a   : > { %v2488_v2 = vadd.f32 %v2487_v62, %v2486_v20  ;;  %v2526_v7 = vpop.f32.mrb[20].mxu0  ;;  %v2489_v59 = vpop.f32.mrb[14].mxu1 }
 0x27b   : > { %v2527_v1 = vpop.f32.mrb[21].mxu0  ;;  %v2490_v10 = vpop.f32.mrb[15].mxu1 }
 0x27c   : > { %v1689_v8 = vadd.f32 %v2488_v2, %v2279_v45  ;;  %v2528_v14 = vadd.f32 %v2527_v1, %v2526_v7  ;;  %v2491_v17 = vadd.f32 %v2490_v10, %v2489_v59  ;;  %v2529_v19 = vpop.f32.mrb[22].mxu0 }
 0x27d   : > { %v2530_v26 = vpop.f32.mrb[23].mxu0 }
 0x27e   : > { %v1754_v33 = vadd.f32 %v2528_v14, %v1689_v8  ;;  %v1692_v38 = vadd.f32 %v2491_v17, %v2279_v45  ;;  %v2531_v40 = vadd.f32 %v2530_v26, %v2529_v19 }
 0x280   : > { %v1757_v43 = vadd.f32 %v2531_v40, %v1692_v38  ;;  %v2548_v49 = vpop.f32.mrb[16].mxu1 }
 0x281   : > { %v2549_v50 = vpop.f32.mrb[17].mxu1 }
 0x282   : > { %v2550_v56 = vadd.f32 %v2549_v50, %v2548_v49  ;;  %v2588_v0 = vpop.f32.mrb[24].mxu0  ;;  %v2551_v15 = vpop.f32.mrb[18].mxu1 }
 0x283   : > { %v2589_v12 = vpop.f32.mrb[25].mxu0  ;;  %v2552_v25 = vpop.f32.mrb[19].mxu1 }
 0x284   : > { %v1795_v31 = vadd.f32 %v2550_v56, %v1730_v52  ;;  %v2590_v34 = vadd.f32 %v2589_v12, %v2588_v0  ;;  %v2553_v35 = vadd.f32 %v2552_v25, %v2551_v15  ;;  %v2591_v48 = vpop.f32.mrb[26].mxu0 }
 0x285   : > { %v2592_v27 = vpop.f32.mrb[27].mxu0 }
 0x286   : > { %v1798_v57 = vadd.f32 %v2553_v35, %v1733_v61  ;;  %v2593_v60 = vadd.f32 %v2592_v27, %v2591_v48  ;;  %v1860_v37 = vadd.f32 %v2590_v34, %v1795_v31 }
 0x288   : > { %v2554_v63 = vpop.f32.mrb[20].mxu1  ;;  %v1863_v44 = vadd.f32 %v2593_v60, %v1798_v57 }
 0x289   : > { %v2555_v45 = vpop.f32.mrb[21].mxu1 }
 0x28a   : > { %v2556_v9 = vadd.f32 %v2555_v45, %v2554_v63  ;;  %v2594_v6 = vpop.f32.mrb[28].mxu0  ;;  %v2557_v22 = vpop.f32.mrb[22].mxu1 }
 0x28b   : > { %v2595_v55 = vpop.f32.mrb[29].mxu0  ;;  %v2558_v23 = vpop.f32.mrb[23].mxu1 }
 0x28c   : > { %v1803_v51 = vadd.f32 %v2556_v9, %v1738_v36  ;;  %v2596_v5 = vadd.f32 %v2595_v55, %v2594_v6  ;;  %v2559_v11 = vadd.f32 %v2558_v23, %v2557_v22  ;;  %v2597_v53 = vpop.f32.mrb[30].mxu0 }
 0x28d   : > { %v2598_v52 = vpop.f32.mrb[31].mxu0 }
 0x28e   : > { %v1806_v30 = vadd.f32 %v2559_v11, %v1741_v42  ;;  %v2599_v24 = vadd.f32 %v2598_v52, %v2597_v53  ;;  %v1868_v18 = vadd.f32 %v2596_v5, %v1803_v51 }
 0x290   : > { %v2560_v21 = vpop.f32.mrb[24].mxu1  ;;  %v1871_v61 = vadd.f32 %v2599_v24, %v1806_v30  ;;  %v2424_v30 = vld [vmem:[%s3871_s6] ss:$0 sm:$0xff]  ;;  %v2903_v24 = vld [vmem:[%s3357_s20 + $0x8] sm:$0xff]  }
 0x291   : > { %v2561_v54 = vpop.f32.mrb[25].mxu1 }
 0x292   : > { %v2562_v3 = vadd.f32 %v2561_v54, %v2560_v21  ;;  %v2600_v4 = vpop.f32.mrb[32].mxu0  ;;  %v2563_v16 = vpop.f32.mrb[26].mxu1  ;;  %v2904_v21 = vld [vmem:[%s3357_s20] sm:$0xff]  }
 0x293   : > { %v2601_v32 = vpop.f32.mrb[33].mxu0  ;;  %v2564_v46 = vpop.f32.mrb[27].mxu1 }
 0x294   : > { %v1811_v47 = vadd.f32 %v2562_v3, %v1746_v29  ;;  %v2602_v58 = vadd.f32 %v2601_v32, %v2600_v4  ;;  %v2565_v13 = vadd.f32 %v2564_v46, %v2563_v16  ;;  %v2603_v39 = vpop.f32.mrb[34].mxu0  ;;  %v1986_v16 = vunpack.c.h.bf16 %v2903_v24 }
 0x295   : > { %v2604_v36 = vpop.f32.mrb[35].mxu0  ;;  %v1984_v32 = vunpack.c.h.bf16 %v2904_v21 }
 0x296   : > { %v1814_v28 = vadd.f32 %v2565_v13, %v1749_v41  ;;  %v2605_v20 = vadd.f32 %v2604_v36, %v2603_v39  ;;  %v1876_v62 = vadd.f32 %v2602_v58, %v1811_v47 }
 0x298   : > { %v2566_v2 = vpop.f32.mrb[28].mxu1  ;;  %v1879_v42 = vadd.f32 %v2605_v20, %v1814_v28 }
 0x299   : > { %v2567_v7 = vpop.f32.mrb[29].mxu1 }
 0x29a   : > { %v2568_v59 = vadd.f32 %v2567_v7, %v2566_v2  ;;  %v2606_v1 = vpop.f32.mrb[36].mxu0  ;;  %v2569_v10 = vpop.f32.mrb[30].mxu1 }
 0x29b   : > { %v2607_v8 = vpop.f32.mrb[37].mxu0  ;;  %v2570_v14 = vpop.f32.mrb[31].mxu1 }
 0x29c   : > { %v1819_v17 = vadd.f32 %v2568_v59, %v1754_v33  ;;  %v2608_v19 = vadd.f32 %v2607_v8, %v2606_v1  ;;  %v2571_v26 = vadd.f32 %v2570_v14, %v2569_v10  ;;  %v2609_v38 = vpop.f32.mrb[38].mxu0  ;;  %v2905_v59 = vld [vmem:[%s3357_s20 + $0x18] sm:$0xff]   ;;  %v2906_v14 = vld [vmem:[%s3357_s20 + $0x10] sm:$0xff]   ;;  %s3021_s20 = scalar_lea.vmem %s3812_s21, 1024 }
 0x29d   : > { %v2610_v29 = vpop.f32.mrb[39].mxu0  ;;  %v1989_v1 = vunpack.c.l.bf16 %v2905_v59  ;;  %p3022_p10 = scmp.ne.s32.totalorder %s3812_s21, %s3021_s20  ;;  %p3029_p1 = scmp.lt.s32.totalorder %s3027_s13, %s3021_s20 }
 0x29e   : > { %v1822_v40 = vadd.f32 %v2571_v26, %v1757_v43  ;;  %v2611_v49 = vadd.f32 %v2610_v29, %v2609_v38  ;;  %v1884_v50 = vadd.f32 %v2608_v19, %v1819_v17  ;;  %v1987_v17 = vunpack.c.l.bf16 %v2906_v14 }
 0x29f   : > { %v1990_v38 = vunpack.c.h.bf16 %v2905_v59  ;;  %p3023_p3 = pnand %p3022_p10, %p3302_p5  ;;  %p3030_p2 = por %p3029_p1, %p3028_p12 }
 0x2a0   : > { %v2678_v56 = vpop.f32.mrb[32].mxu1  ;;  %v1887_v41 = vadd.f32 %v2611_v49, %v1822_v40  ;;  %v1988_v49 = vunpack.c.h.bf16 %v2906_v14 }
 0x2a1   : > { %v1933_v0 = vadd.f32 %v2678_v56, %v1868_v18  ;;  %v1924_v15 = vpop.f32.mrb[33].mxu1  ;;  %v1985_v18 = vunpack.c.l.bf16 %v2903_v24  ;;  %p3024_p7 = pneg %p3023_p3 }
 0x2a2   : > { %v1925_v12 = vadd.f32 %v1924_v15, %v1860_v37  ;;  %v2679_v25 = vpop.f32.mrb[34].mxu1 }
 0x2a3   : > { %v1936_v31 = vadd.f32 %v2679_v25, %v1871_v61  ;;  %v1927_v34 = vpop.f32.mrb[35].mxu1  ;;  %v1957_v48 = vmax.f32 %v1933_v0, 0.0  ;;  %v1983_v61 = vunpack.c.l.bf16 %v2904_v21  ;;  %p3031_p4 = pnand %p3030_p2, %p3024_p7 }
 0x2a4   : > { %v1928_v35 = vadd.f32 %v1927_v34, %v1863_v44  ;;  %v1955_v57 = vmax.f32 %v1925_v12, 0.0 }
 0x2a5   : > { %v1958_v27 = vmax.f32 %v1936_v31, 0.0 }
 0x2a6   : > { %v1956_v33 = vmax.f32 %v1928_v35, 0.0 }
 0x2a7   : > { %v1964_v60 = vpack.c.bf16 %v1958_v27, %v1957_v48 }
 0x2a8   : > { %v1963_v63 = vpack.c.bf16 %v1956_v33, %v1955_v57  ;;  %v2682_v45 = vpop.f32.mrb[36].mxu1 }
 0x2a9   : > { %v1949_v9 = vadd.f32 %v2682_v45, %v1884_v50  ;;  %v1940_v43 = vpop.f32.mrb[37].mxu1 }
 0x2aa   : > { %v1941_v6 = vadd.f32 %v1940_v43, %v1876_v62  ;;  %v2683_v22 = vpop.f32.mrb[38].mxu1  ;;  %2700 = vmatprep.mubr.bf16.mxu0 %v1963_v63 }
 0x2ab   : > { %v1952_v55 = vadd.f32 %v2683_v22, %v1887_v41  ;;  %v1943_v37 = vpop.f32.mrb[39].mxu1  ;;  %2701 = vmatmul.mubr.bf16.vlgmr.msra.gmra.mrb[40].mxu0 %v1964_v60  ;;  %v1961_v44 = vmax.f32 %v1949_v9, 0.0 }
 0x2ac   : > { %v1944_v23 = vadd.f32 %v1943_v37, %v1879_v42  ;;  %v1959_v5 = vmax.f32 %v1941_v6, 0.0 }
 0x2ad   : > { %v1962_v51 = vmax.f32 %v1952_v55, 0.0 }
 0x2ae   : > { %v1960_v11 = vmax.f32 %v1944_v23, 0.0 }
 0x2af   : > { %v1966_v53 = vpack.c.bf16 %v1962_v51, %v1961_v44 }
 0x2b0   : > { %v1965_v52 = vpack.c.bf16 %v1960_v11, %v1959_v5 }
 0x2b2   : > { %2704 = vmatprep.mubr.bf16.mxu1 %v1965_v52 }
 0x2b3   : > { %2705 = vmatmul.mubr.bf16.vlgmr.msra.gmra.mrb[40].mxu1 %v1966_v53 }
 0x37e   : > { %v2702_v54 = vpop.f32.mrb[40].mxu0 }
 0x37f   : > { %v2089_v3 = vadd.f32 %v2702_v54, %v2424_v30  ;;  %v2080_v4 = vpop.f32.mrb[41].mxu0 }
 0x380   : > { %v2081_v46 = vadd.f32 %v2424_v30, %v2080_v4  ;;  %v2703_v47 = vpop.f32.mrb[42].mxu0 }
 0x381   : > { %v2113_v58 = vadd.f32 %v2089_v3, %v1985_v18  ;;  %v2092_v13 = vadd.f32 %v2703_v47, %v2424_v30  ;;  %v2083_v39 = vpop.f32.mrb[43].mxu0 }
 0x382   : > { %v2111_v36 = vadd.f32 %v2081_v46, %v1983_v61  ;;  %v2084_v28 = vadd.f32 %v2424_v30, %v2083_v39 }
 0x383   : > { %v2121_v20 = vmax.f32 %v2113_v58, 0.0  ;;  %v2114_v62 = vadd.f32 %v2092_v13, %v1986_v16 }
 0x384   : > { %v2119_v2 = vmax.f32 %v2111_v36, 0.0  ;;  %v2112_v42 = vadd.f32 %v2084_v28, %v1984_v32 }
 0x385   : > { %2129 = vst [vmem:[%s3802_s12 + $0x10] sm:$0xff] %v2121_v20  ;;  %v2122_v7 = vmax.f32 %v2114_v62, 0.0 }
 0x386   : > { %2127 = vst [vmem:[%s3802_s12] sm:$0xff] %v2119_v2  ;;  %v2120_v10 = vmax.f32 %v2112_v42, 0.0  ;;  %v2706_v8 = vpop.f32.mrb[40].mxu1 }
 0x387   : > { %2130 = vst [vmem:[%s3802_s12 + $0x18] sm:$0xff] %v2122_v7  ;;  %v2105_v19 = vadd.f32 %v2706_v8, %v2424_v30  ;;  %v2096_v26 = vpop.f32.mrb[41].mxu1 }
 0x388   : > { %2128 = vst [vmem:[%s3802_s12 + $0x8] sm:$0xff] %v2120_v10  ;;  %v2097_v29 = vadd.f32 %v2424_v30, %v2096_v26  ;;  %v2707_v40 = vpop.f32.mrb[42].mxu1 }
 0x389   : > { %v2117_v50 = vadd.f32 %v2105_v19, %v1989_v1  ;;  %v2108_v56 = vadd.f32 %v2707_v40, %v2424_v30  ;;  %v2099_v41 = vpop.f32.mrb[43].mxu1 }
 0x38a   : > { %v2115_v0 = vadd.f32 %v2097_v29, %v1987_v17  ;;  %v2100_v15 = vadd.f32 %v2424_v30, %v2099_v41 }
 0x38b   : > { %v2125_v12 = vmax.f32 %v2117_v50, 0.0  ;;  %v2118_v25 = vadd.f32 %v2108_v56, %v1990_v38 }
 0x38c   : > { %v2123_v31 = vmax.f32 %v2115_v0, 0.0  ;;  %v2116_v34 = vadd.f32 %v2100_v15, %v1988_v49 }
 0x38d   : > { %2133 = vst [vmem:[%s3802_s12 + $0x30] sm:$0xff] %v2125_v12  ;;  %v2126_v35 = vmax.f32 %v2118_v25, 0.0 }
 0x38e   : > { %2131 = vst [vmem:[%s3802_s12 + $0x20] sm:$0xff] %v2123_v31  ;;  %v2124_v48 = vmax.f32 %v2116_v34, 0.0 }
 0x38f   : > { %2134 = vst [vmem:[%s3802_s12 + $0x38] sm:$0xff] %v2126_v35 }
 0x390   : > { %2132 = vst [vmem:[%s3802_s12 + $0x28] sm:$0xff] %v2124_v48 }
 0x391   : > { %3034 = shalt.err (!%p3031_p4)
}
 0x392   : > { %s3035_s15 = scalar_lea.hbm %s3818_s11, 1024  ;;  %s3039_s8 = scalar_lea.hbm %s3872_s7, 2048 }
 0x393   : > { %p3036_p9 = scmp.ne.s32.totalorder %s3818_s11, %s3035_s15  ;;  %p3040_p8 = scmp.lt.u32.totalorder %s3818_s11, %s3872_s7 }
 0x394   : > { %p3041_p13 = scmp.lt.u32.totalorder %s3039_s8, %s3035_s15  ;;  %p3043_p10 = scmp.lt.u32.totalorder %s3035_s15, %s3818_s11 }
 0x395   : > { %p3037_p0 = pnand %p3036_p9, %p3302_p5 }
 0x396   : > { %p3042_p6 = por %p3041_p13, %p3040_p8 }
 0x397   : > { %p3038_p11 = pneg %p3037_p0 }
 0x398   : > { %p3044_p3 = por %p3043_p10, %p3042_p6 }
 0x39a   : > { %p3045_p7 = pnand %p3044_p3, %p3038_p11 }
 0x39c   : > { %3048 = shalt.err (!%p3045_p7)
}
 0x39d   : > { %s3106_s29 = smov 128   ;;  %s3107_s23 = smov 8  }
 0x39e   : > { %2738 = dma.vmem_to_hbm [thread:$0]  (%p3302_p5), %s3812_s21, 1024, %s3818_s11, %s2136_s28, %s3106_s29, %s3106_s29, %s3107_s23  }
 0x39f PF: > { %s3927_s20 = sld [smem:[#allocation15_spill]]  ;;  %s2164_s30 = sand.u32 1, %s3083_s24  }
 0x3a0   : > { %p3929_p1 = scmp.ge.s32.totalorder %s3095_s27, 2  ;;  %s2165_s9 = scalar_lea.sflag [#allocation4], %s2164_s30 }
 0x3a5   : > { %p3928_p12 = scmp.ne.s32.totalorder %s3927_s20, 0 }
 0x3a7   : > { %p2755_p2 = pnand %p3929_p1, %p3928_p12 }
 0x3a9   : > { %3078 = dma.done.wait (!%p2755_p2), %s2165_s9, 1024  }
 0x3aa   : > { %3080 = vsyncadd (!%p2755_p2), %s2165_s9, 4294966272  ;;  %p22_p4 = scmp.ge.s32.totalorder %s3288_s22, 4   ;;  %s3930_s24 = smov %s3087_s25 }
 0x3ab   : > { %s3931_s25 = smov %s3091_s26  ;;  %s3932_s26 = smov %s3298_s18 }
 0x3ac   : > { %s3933_s27 = smov %s3288_s22  ;;  %24 = sbr.rel (!%p22_p4) target bundleno = 7 (0x7), region = 105 }
 0x3b3   :  { %2170 = vsyncpa [#allocation3], 1 }
 0x3b4   :  { %2172 = vsyncpa [#allocation3 + $0x1], 1 }
 0x3b5   :  { %2173 = vsyncpa [#allocation6], 1 }
 0x3b6   :  { %2174 = vsyncpa [#allocation9], 1 }
 0x3b7   :  { %2175 = vsyncpa [#allocation4], 1 }
 0x3b8   :  { %2177 = vsyncpa [#allocation4 + $0x1], 1 }

</bundles_post_ra>
